<compile_context>
chip_gen: v7x
topology: tpu7x:2x2x1
jax: 0.10.0
libtpu: 0.0.40
codegen_flags: <defaults>
</compile_context>

<pallas_src>
import functools

import jax
import jax.numpy as jnp
from jax.experimental import pallas as pl
from jax.experimental.pallas import tpu as pltpu


def _causal_conv3d_kernel(x_ref, w_ref, b_ref, o_ref, xim_ref, *,
                          kt, kh, kw, t_blk, h, w, hp, wp):
    # x_ref  : (t_blk, h, w, cin)              raw (un-padded) input T block, compute dtype
    # w_ref  : (kt*kh, kw*cin, cout)           kw-folded per-tap weight matrices
    # b_ref  : (1, cout) f32                   bias
    # o_ref  : (t_blk, h, w, cout)             channels-last output block
    # xim_ref: (t_blk+kt-1, h+2*hp, w, kw*cin) history + W-im2col staging (VMEM)
    tt = pl.program_id(1)
    cin = x_ref.shape[-1]
    cout = o_ref.shape[-1]
    kwc = kw * cin
    m = t_blk * h * w

    # First T tile of each batch: zero the H-halo rows of the staging buffer once so
    # the fused spatial zero pad reads as zero (they are never written afterwards),
    # and so stale state from a previous batch cannot leak in.
    if hp > 0:
        @pl.when(tt == 0)
        def _zero_h_halo():
            zrow = jnp.zeros((xim_ref.shape[0], hp, w, kwc), xim_ref.dtype)
            xim_ref[:, 0:hp, :, :] = zrow
            xim_ref[:, hp + h:, :, :] = zrow

    # Build the W-im2col of the current block (kw W-shifted copies concatenated along
    # the channel/lane axis, W zero-halo folded in as explicit zeros) and stage it
    # behind the kt-1 carried history frames with one dense store.
    x_cur = x_ref[...]
    cols = []
    for dw in range(kw):
        s = dw - wp
        if s < 0:
            zpad = jnp.zeros((t_blk, h, -s, cin), x_cur.dtype)
            cols.append(jnp.concatenate([zpad, x_cur[:, :, :w + s, :]], axis=2))
        elif s == 0:
            cols.append(x_cur)
        else:
            zpad = jnp.zeros((t_blk, h, s, cin), x_cur.dtype)
            cols.append(jnp.concatenate([x_cur[:, :, s:, :], zpad], axis=2))
    staged = cols[0] if kw == 1 else jnp.concatenate(cols, axis=-1)
    xim_ref[kt - 1:kt - 1 + t_blk, hp:hp + h, :, :] = staged

    if kt > 1:
        # Causal temporal pad: the first T tile of a batch replicates frame 0 into the
        # history slots (fuses torch's "first_frame_pad" concatenate into the kernel).
        @pl.when(tt == 0)
        def _init_history():
            frame0 = xim_ref[kt - 1]
            for i in range(kt - 1):
                xim_ref[i] = frame0

    # kt*kh MXU matmuls with K = kw*cin (bf16 operands, f32 accumulation). The
    # accumulator is a traced f32 value (no per-tap VMEM round trips); the bias is
    # folded into the first tap.  Slices below only move along T/H (leading dims) and
    # w is sublane-aligned, so the reshape to (m, kwc) is layout-preserving.
    acc = None
    for dt in range(kt):
        for dh in range(kh):
            xs = xim_ref[dt:dt + t_blk, dh:dh + h, :, :].reshape(m, kwc)
            part = jnp.dot(xs, w_ref[dt * kh + dh],
                           preferred_element_type=jnp.float32)
            acc = (part + b_ref[...]) if acc is None else (acc + part)
    o_ref[...] = acc.reshape(t_blk, h, w, cout).astype(o_ref.dtype)

    if kt > 1:
        # Carry the last kt-1 input frames (in im2col form) for the next T tile of
        # this batch.  The wrapper guarantees t_blk >= kt-1 so src/dst don't overlap.
        xim_ref[0:kt - 1] = xim_ref[t_blk:t_blk + kt - 1]


def _round_up(v, m):
    return (v + m - 1) // m * m


def _vmem_limit_bytes():
    """Generation-aware VMEM budget (v5e/v6e: 128 MiB, v7x: 64 MiB per core)."""
    cap = 64 * 1024 * 1024
    try:
        info = pltpu.get_tpu_info()
        c = getattr(info, "vmem_capacity_bytes", None)
        if c:
            cap = int(c)
    except Exception:
        pass
    return min(int(cap * 3 // 4), 112 * 1024 * 1024)


def _pick_t_block(t_in, h, w_al, cin, cout, kt, kh, kw, c_bytes, out_bytes,
                  budget_bytes):
    hp = kh // 2
    hpad = h + 2 * hp
    sub = 32 // c_bytes
    cin_l = _round_up(cin, 128)
    cout_l = _round_up(cout, 128)
    kwc_l = _round_up(kw * cin, 128)
    # Per-output-frame VMEM (lane-padded): double-buffered input/output blocks, one
    # frame of im2col scratch, one frame of traced f32 accumulator.
    per_t = (2 * h * w_al * cin_l * c_bytes
             + 2 * h * w_al * cout_l * out_bytes
             + hpad * w_al * kwc_l * c_bytes
             + h * w_al * cout_l * 4)
    # Resident weights (budget 2 buffers) + bias + the kt-1 history frames.
    fixed = (2 * kt * kh * _round_up(kw * cin, sub) * cout_l * c_bytes
             + 2 * 8 * cout_l * 4
             + (kt - 1) * hpad * w_al * kwc_l * c_bytes)
    avail = max(budget_bytes - fixed, per_t)
    return int(max(1, min(t_in, avail // per_t)))


def causal_conv3d(x, weight, bias, *, causal=True, t_block=None, compute_dtype=None):
    """x: (N, Cin, T, H, W); weight: (Cout, Cin, kt, kh, kw); bias: (Cout,)."""
    n, cin, t, h, w0 = x.shape
    cout, cin_w, kt, kh, kw = weight.shape
    assert cin == cin_w, "groups != 1 not supported"  # TODO(synk): grouped conv path
    assert kh % 2 == 1 and kw % 2 == 1, "even spatial kernel sizes not supported"
    hp, wp = kh // 2, kw // 2

    out_dtype = x.dtype
    if compute_dtype is None:
        # bf16 MXU operands for floating inputs (native MXU rate, half the DMA bytes).
        compute_dtype = jnp.bfloat16 if jnp.issubdtype(x.dtype, jnp.floating) else x.dtype
    c_bytes = jnp.dtype(compute_dtype).itemsize
    out_bytes = jnp.dtype(out_dtype).itemsize

    # Sublane alignment for W so in-kernel reshapes and output stores stay tile-dense.
    w_align = max(32 // c_bytes, 32 // out_bytes)
    w_al = _round_up(w0, w_align)

    # NCDHW -> NTHWC (+ cast to the MXU compute dtype; fuses with the transpose copy).
    x_cl = jnp.transpose(x, (0, 2, 3, 4, 1)).astype(compute_dtype)

    if causal:
        t_start, t_out = 0, t
    else:
        # Non-causal = replicate-pad both ends here, reuse the causal kernel, then
        # drop its first kt-1 (history-warmup) output frames.
        assert kt % 2 == 1, "non-causal path requires odd temporal kernel size"
        p = (kt - 1) // 2
        x_cl = jnp.concatenate(
            [jnp.repeat(x_cl[:, :1], p, axis=1), x_cl,
             jnp.repeat(x_cl[:, -1:], p, axis=1)], axis=1)
        t_start, t_out = kt - 1, t + 2 * p - (kt - 1)

    t_in = x_cl.shape[1]
    vmem_limit = _vmem_limit_bytes()
    if t_block is None:
        t_block = _pick_t_block(t_in, h, w_al, cin, cout, kt, kh, kw,
                                c_bytes, out_bytes, int(vmem_limit * 0.8))
    # t_block >= kt-1 keeps the history-carry copy overlap-free.
    t_block = max(kt - 1, 1, min(int(t_block), t_in))
    n_t = -(-t_in // t_block)
    t_total = n_t * t_block

    # Only T (to a t_block multiple) and W (to the sublane multiple) are padded here;
    # the spatial conv halo is fused into the kernel, so there is no HBM pad pass for
    # the H/W halos.  Trailing padded frames/columns only feed outputs sliced away.
    if t_total != t_in or w_al != w0:
        x_cl = jnp.pad(x_cl, ((0, 0), (0, t_total - t_in), (0, 0),
                              (0, w_al - w0), (0, 0)))

    w_taps = jnp.transpose(weight, (2, 3, 4, 1, 0)).reshape(kt * kh, kw * cin, cout)
    w_taps = w_taps.astype(compute_dtype)
    b2 = bias.reshape(1, cout).astype(jnp.float32)

    kernel = functools.partial(_causal_conv3d_kernel, kt=kt, kh=kh, kw=kw,
                               t_blk=t_block, h=h, w=w_al, hp=hp, wp=wp)

    out_cl = pl.pallas_call(
        kernel,
        out_shape=jax.ShapeDtypeStruct((n, t_total, h, w_al, cout), out_dtype),
        grid=(n, n_t),
        in_specs=[
            # Non-overlapping T blocks (halo comes from the in-kernel history carry).
            pl.BlockSpec((None, t_block, h, w_al, cin),
                         lambda i, j: (i, j, 0, 0, 0)),
            # Full weight / bias tables resident in VMEM.
            # TODO(synk): stream Cin slabs when weights don't fit (v7x, big channels).
            pl.BlockSpec((kt * kh, kw * cin, cout), lambda i, j: (0, 0, 0)),
            pl.BlockSpec((1, cout), lambda i, j: (0, 0)),
        ],
        out_specs=pl.BlockSpec((None, t_block, h, w_al, cout),
                               lambda i, j: (i, j, 0, 0, 0)),
        scratch_shapes=[
            pltpu.VMEM((t_block + kt - 1, h + 2 * hp, w_al, kw * cin), compute_dtype),
        ],
        compiler_params=pltpu.CompilerParams(
            # N is parallel (megacore-shardable); T tiles carry the causal history and
            # MUST stay the inner, sequentially executed ("arbitrary") axis.
            dimension_semantics=("parallel", "arbitrary"),
            vmem_limit_bytes=vmem_limit,
        ),
    )(x_cl, w_taps, b2)

    out_cl = out_cl[:, t_start:t_start + t_out, :, :w0, :]
    return jnp.transpose(out_cl, (0, 4, 1, 2, 3))  # back to NCDHW


def _lax_reference(x, weight, bias, kt, causal):
    if causal:
        xt = jnp.concatenate([jnp.repeat(x[:, :, :1], kt - 1, axis=2), x], axis=2)
    else:
        p = (kt - 1) // 2
        xt = jnp.concatenate(
            [jnp.repeat(x[:, :, :1], p, axis=2), x,
             jnp.repeat(x[:, :, -1:], p, axis=2)], axis=2)
    kh, kw = weight.shape[3], weight.shape[4]
    return jax.lax.conv_general_dilated(
        xt, weight, (1, 1, 1), ((0, 0), (kh // 2, kh // 2), (kw // 2, kw // 2)),
        dimension_numbers=("NCDHW", "OIDHW", "NCDHW"),
        precision=jax.lax.Precision.HIGHEST,
    ) + bias[None, :, None, None, None]


if __name__ == "__main__":
    key = jax.random.PRNGKey(0)
    kx, kw_, kb, kx2 = jax.random.split(key, 4)

    # Small shapes consistent with the module: NCDHW input, kernel_size=3.
    N, Cin, Cout, T, H, W, K = 2, 4, 8, 8, 16, 16, 3
    x = jax.random.normal(kx, (N, Cin, T, H, W), dtype=jnp.float32)

    # Deterministic params mimicking nn.Conv3d defaults (uniform +-1/sqrt(fan_in)).
    fan_in = Cin * K * K * K
    bound = 1.0 / (fan_in ** 0.5)
    weight = jax.random.uniform(kw_, (Cout, Cin, K, K, K), jnp.float32, -bound, bound)
    bias = jax.random.uniform(kb, (Cout,), jnp.float32, -bound, bound)

    # bf16 MXU operands + f32 accumulation -> compare against the exact f32 reference
    # with a bf16-appropriate tolerance.
    TOL = dict(atol=3e-2, rtol=3e-2)

    # t_block=4 -> 2 temporal tiles per batch, exercising the history-carry path.
    out = causal_conv3d(x, weight, bias, causal=True, t_block=4)
    out = jax.block_until_ready(out)
    assert out.shape == (N, Cout, T, H, W)
    ref = _lax_reference(x, weight, bias, K, causal=True)
    assert jnp.allclose(out, ref, **TOL), "mismatch vs lax ref (causal)"

    # Non-causal branch, auto t_block (single temporal tile path).
    out_nc = causal_conv3d(x, weight, bias, causal=False)
    out_nc = jax.block_until_ready(out_nc)
    ref_nc = _lax_reference(x, weight, bias, K, causal=False)
    assert out_nc.shape == ref_nc.shape
    assert jnp.allclose(out_nc, ref_nc, **TOL), "mismatch vs lax ref (non-causal)"

    # Ragged config: W not sublane-aligned, T not a t_block multiple -> exercises the
    # fused-pad, W-alignment and output-slicing paths.
    N2, T2, H2, W2 = 1, 5, 10, 12
    x2 = jax.random.normal(kx2, (N2, Cin, T2, H2, W2), dtype=jnp.float32)
    out2 = causal_conv3d(x2, weight, bias, causal=True, t_block=2)
    out2 = jax.block_until_ready(out2)
    assert out2.shape == (N2, Cout, T2, H2, W2)
    ref2 = _lax_reference(x2, weight, bias, K, causal=True)
    assert jnp.allclose(out2, ref2, **TOL), "mismatch vs lax ref (ragged causal)"

    print("KERNEL_OK")
</pallas_src>

<mosaic_0001>
module attributes {stable_mosaic.version = 11 : i64} {
  func.func @_causal_conv3d_kernel(%arg0: i32, %arg1: i32, %arg2: memref<1x4x16x16x4xbf16, #tpu.memory_space<vmem>>, %arg3: memref<9x12x8xbf16, #tpu.memory_space<vmem>>, %arg4: memref<1x8xf32, #tpu.memory_space<vmem>>, %arg5: memref<1x4x16x16x8xf32, #tpu.memory_space<vmem>>, %arg6: memref<6x18x16x12xbf16, #tpu.memory_space<vmem>>) attributes {dimension_semantics = [#tpu.dimension_semantics<parallel>, #tpu.dimension_semantics<arbitrary>], iteration_bounds = array<i64: 2, 2>, scalar_prefetch = 0 : i64, scratch_operands = 1 : i64, tpu.core_type = #tpu.core_type<tc>, window_params = [{transform_indices = @transform_0, window_bounds = array<i64: 1, 4, 16, 16, 4>}, {pipeline_mode = #tpu.pipeline_mode<synchronous>, transform_indices = @transform_1, window_bounds = array<i64: 9, 12, 8>}, {pipeline_mode = #tpu.pipeline_mode<synchronous>, transform_indices = @transform_2, window_bounds = array<i64: 1, 8>}, {transform_indices = @transform_3, window_bounds = array<i64: 1, 4, 16, 16, 8>}]} {
    %c0_i32 = arith.constant 0 : i32
    %0 = arith.cmpi eq, %arg1, %c0_i32 : i32
    %1 = arith.extui %0 : i1 to i32
    %c0_i32_0 = arith.constant 0 : i32
    %2 = arith.cmpi ne, %1, %c0_i32_0 : i32
    scf.if %2 {
      %cst_91 = arith.constant 0.000000e+00 : bf16
      %78 = vector.broadcast %cst_91 : bf16 to vector<6x1x16x12xbf16>
      %c0_92 = arith.constant 0 : index
      %c0_93 = arith.constant 0 : index
      %c0_94 = arith.constant 0 : index
      %c0_95 = arith.constant 0 : index
      %79 = vector.load %arg6[%c0_92, %c0_93, %c0_94, %c0_95] : memref<6x18x16x12xbf16, #tpu.memory_space<vmem>>, vector<6x1x16x12xbf16>
      tpu.vector_store %arg6[%c0_92, %c0_93, %c0_94, %c0_95], %78 {strides = array<i32>} : memref<6x18x16x12xbf16, #tpu.memory_space<vmem>>, vector<6x1x16x12xbf16>,
      %c0_96 = arith.constant 0 : index
      %c17 = arith.constant 17 : index
      %c0_97 = arith.constant 0 : index
      %c0_98 = arith.constant 0 : index
      %80 = vector.load %arg6[%c0_96, %c17, %c0_97, %c0_98] : memref<6x18x16x12xbf16, #tpu.memory_space<vmem>>, vector<6x1x16x12xbf16>
      tpu.vector_store %arg6[%c0_96, %c17, %c0_97, %c0_98], %78 {strides = array<i32>} : memref<6x18x16x12xbf16, #tpu.memory_space<vmem>>, vector<6x1x16x12xbf16>,
    } else {
    }
    %c0 = arith.constant 0 : index
    %c0_1 = arith.constant 0 : index
    %c0_2 = arith.constant 0 : index
    %c0_3 = arith.constant 0 : index
    %c0_4 = arith.constant 0 : index
    %3 = vector.load %arg2[%c0, %c0_1, %c0_2, %c0_3, %c0_4] : memref<1x4x16x16x4xbf16, #tpu.memory_space<vmem>>, vector<1x4x16x16x4xbf16>
    %4 = vector.shape_cast %3 : vector<1x4x16x16x4xbf16> to vector<4x16x16x4xbf16>
    %cst = arith.constant 0.000000e+00 : bf16
    %5 = vector.broadcast %cst : bf16 to vector<4x16x1x4xbf16>
    %6 = vector.extract_strided_slice %4 {offsets = [0, 0, 0, 0], sizes = [4, 16, 15, 4], strides = [1, 1, 1, 1]} : vector<4x16x16x4xbf16> to vector<4x16x15x4xbf16>
    %7 = tpu.concatenate %5, %6 in 2 : vector<4x16x1x4xbf16>, vector<4x16x15x4xbf16> -> vector<4x16x16x4xbf16>
    %cst_5 = arith.constant 0.000000e+00 : bf16
    %8 = vector.broadcast %cst_5 : bf16 to vector<4x16x1x4xbf16>
    %9 = vector.extract_strided_slice %4 {offsets = [0, 0, 1, 0], sizes = [4, 16, 15, 4], strides = [1, 1, 1, 1]} : vector<4x16x16x4xbf16> to vector<4x16x15x4xbf16>
    %10 = tpu.concatenate %9, %8 in 2 : vector<4x16x15x4xbf16>, vector<4x16x1x4xbf16> -> vector<4x16x16x4xbf16>
    %11 = tpu.concatenate %7, %4, %10 in 3 : vector<4x16x16x4xbf16>, vector<4x16x16x4xbf16>, vector<4x16x16x4xbf16> -> vector<4x16x16x12xbf16>
    %c2 = arith.constant 2 : index
    %c1 = arith.constant 1 : index
    %c0_6 = arith.constant 0 : index
    %c0_7 = arith.constant 0 : index
    %12 = vector.load %arg6[%c2, %c1, %c0_6, %c0_7] : memref<6x18x16x12xbf16, #tpu.memory_space<vmem>>, vector<4x16x16x12xbf16>
    tpu.vector_store %arg6[%c2, %c1, %c0_6, %c0_7], %11 {strides = array<i32>} : memref<6x18x16x12xbf16, #tpu.memory_space<vmem>>, vector<4x16x16x12xbf16>,
    %c0_i32_8 = arith.constant 0 : i32
    %13 = arith.cmpi eq, %arg1, %c0_i32_8 : i32
    %14 = arith.extui %13 : i1 to i32
    %c0_i32_9 = arith.constant 0 : i32
    %15 = arith.cmpi ne, %14, %c0_i32_9 : i32
    scf.if %15 {
      %c2_91 = arith.constant 2 : index
      %c0_92 = arith.constant 0 : index
      %c0_93 = arith.constant 0 : index
      %c0_94 = arith.constant 0 : index
      %78 = vector.load %arg6[%c2_91, %c0_92, %c0_93, %c0_94] : memref<6x18x16x12xbf16, #tpu.memory_space<vmem>>, vector<1x18x16x12xbf16>
      %79 = vector.shape_cast %78 : vector<1x18x16x12xbf16> to vector<18x16x12xbf16>
      %c0_95 = arith.constant 0 : index
      %c0_96 = arith.constant 0 : index
      %c0_97 = arith.constant 0 : index
      %c0_98 = arith.constant 0 : index
      %80 = vector.load %arg6[%c0_95, %c0_96, %c0_97, %c0_98] : memref<6x18x16x12xbf16, #tpu.memory_space<vmem>>, vector<1x18x16x12xbf16>
      %81 = vector.shape_cast %80 : vector<1x18x16x12xbf16> to vector<18x16x12xbf16>
      %82 = vector.shape_cast %79 : vector<18x16x12xbf16> to vector<1x18x16x12xbf16>
      tpu.vector_store %arg6[%c0_95, %c0_96, %c0_97, %c0_98], %82 {strides = array<i32>} : memref<6x18x16x12xbf16, #tpu.memory_space<vmem>>, vector<1x18x16x12xbf16>,
      %c1_99 = arith.constant 1 : index
      %c0_100 = arith.constant 0 : index
      %c0_101 = arith.constant 0 : index
      %c0_102 = arith.constant 0 : index
      %83 = vector.load %arg6[%c1_99, %c0_100, %c0_101, %c0_102] : memref<6x18x16x12xbf16, #tpu.memory_space<vmem>>, vector<1x18x16x12xbf16>
      %84 = vector.shape_cast %83 : vector<1x18x16x12xbf16> to vector<18x16x12xbf16>
      %85 = vector.shape_cast %79 : vector<18x16x12xbf16> to vector<1x18x16x12xbf16>
      tpu.vector_store %arg6[%c1_99, %c0_100, %c0_101, %c0_102], %85 {strides = array<i32>} : memref<6x18x16x12xbf16, #tpu.memory_space<vmem>>, vector<1x18x16x12xbf16>,
    } else {
    }
    %c0_10 = arith.constant 0 : index
    %c0_11 = arith.constant 0 : index
    %c0_12 = arith.constant 0 : index
    %c0_13 = arith.constant 0 : index
    %16 = vector.load %arg6[%c0_10, %c0_11, %c0_12, %c0_13] : memref<6x18x16x12xbf16, #tpu.memory_space<vmem>>, vector<4x16x16x12xbf16>
    %17 = vector.shape_cast %16 : vector<4x16x16x12xbf16> to vector<1024x12xbf16>
    %c0_14 = arith.constant 0 : index
    %c0_15 = arith.constant 0 : index
    %c0_16 = arith.constant 0 : index
    %18 = vector.load %arg3[%c0_14, %c0_15, %c0_16] : memref<9x12x8xbf16, #tpu.memory_space<vmem>>, vector<1x12x8xbf16>
    %19 = vector.shape_cast %18 : vector<1x12x8xbf16> to vector<12x8xbf16>
    %cst_17 = arith.constant dense<0.000000e+00> : vector<1024x8xf32>
    %20 = tpu.matmul %17, %19, %cst_17 {dimension_numbers = #tpu.dot_dimension_numbers<[1], [0], [0], [1], [0, 0, 1, 1], [], []>} : vector<1024x12xbf16>, vector<12x8xbf16>, vector<1024x8xf32> -> vector<1024x8xf32>
    %c0_18 = arith.constant 0 : index
    %c0_19 = arith.constant 0 : index
    %21 = vector.load %arg4[%c0_18, %c0_19] : memref<1x8xf32, #tpu.memory_space<vmem>>, vector<1x8xf32>
    %22 = vector.broadcast %21 : vector<1x8xf32> to vector<1024x8xf32>
    %23 = arith.addf %20, %22 : vector<1024x8xf32>
    %c0_20 = arith.constant 0 : index
    %c1_21 = arith.constant 1 : index
    %c0_22 = arith.constant 0 : index
    %c0_23 = arith.constant 0 : index
    %24 = vector.load %arg6[%c0_20, %c1_21, %c0_22, %c0_23] : memref<6x18x16x12xbf16, #tpu.memory_space<vmem>>, vector<4x16x16x12xbf16>
    %25 = vector.shape_cast %24 : vector<4x16x16x12xbf16> to vector<1024x12xbf16>
    %c1_24 = arith.constant 1 : index
    %c0_25 = arith.constant 0 : index
    %c0_26 = arith.constant 0 : index
    %26 = vector.load %arg3[%c1_24, %c0_25, %c0_26] : memref<9x12x8xbf16, #tpu.memory_space<vmem>>, vector<1x12x8xbf16>
    %27 = vector.shape_cast %26 : vector<1x12x8xbf16> to vector<12x8xbf16>
    %cst_27 = arith.constant dense<0.000000e+00> : vector<1024x8xf32>
    %28 = tpu.matmul %25, %27, %cst_27 {dimension_numbers = #tpu.dot_dimension_numbers<[1], [0], [0], [1], [0, 0, 1, 1], [], []>} : vector<1024x12xbf16>, vector<12x8xbf16>, vector<1024x8xf32> -> vector<1024x8xf32>
    %29 = arith.addf %23, %28 : vector<1024x8xf32>
    %c0_28 = arith.constant 0 : index
    %c2_29 = arith.constant 2 : index
    %c0_30 = arith.constant 0 : index
    %c0_31 = arith.constant 0 : index
    %30 = vector.load %arg6[%c0_28, %c2_29, %c0_30, %c0_31] : memref<6x18x16x12xbf16, #tpu.memory_space<vmem>>, vector<4x16x16x12xbf16>
    %31 = vector.shape_cast %30 : vector<4x16x16x12xbf16> to vector<1024x12xbf16>
    %c2_32 = arith.constant 2 : index
    %c0_33 = arith.constant 0 : index
    %c0_34 = arith.constant 0 : index
    %32 = vector.load %arg3[%c2_32, %c0_33, %c0_34] : memref<9x12x8xbf16, #tpu.memory_space<vmem>>, vector<1x12x8xbf16>
    %33 = vector.shape_cast %32 : vector<1x12x8xbf16> to vector<12x8xbf16>
    %cst_35 = arith.constant dense<0.000000e+00> : vector<1024x8xf32>
    %34 = tpu.matmul %31, %33, %cst_35 {dimension_numbers = #tpu.dot_dimension_numbers<[1], [0], [0], [1], [0, 0, 1, 1], [], []>} : vector<1024x12xbf16>, vector<12x8xbf16>, vector<1024x8xf32> -> vector<1024x8xf32>
    %35 = arith.addf %29, %34 : vector<1024x8xf32>
    %c1_36 = arith.constant 1 : index
    %c0_37 = arith.constant 0 : index
    %c0_38 = arith.constant 0 : index
    %c0_39 = arith.constant 0 : index
    %36 = vector.load %arg6[%c1_36, %c0_37, %c0_38, %c0_39] : memref<6x18x16x12xbf16, #tpu.memory_space<vmem>>, vector<4x16x16x12xbf16>
    %37 = vector.shape_cast %36 : vector<4x16x16x12xbf16> to vector<1024x12xbf16>
    %c3 = arith.constant 3 : index
    %c0_40 = arith.constant 0 : index
    %c0_41 = arith.constant 0 : index
    %38 = vector.load %arg3[%c3, %c0_40, %c0_41] : memref<9x12x8xbf16, #tpu.memory_space<vmem>>, vector<1x12x8xbf16>
    %39 = vector.shape_cast %38 : vector<1x12x8xbf16> to vector<12x8xbf16>
    %cst_42 = arith.constant dense<0.000000e+00> : vector<1024x8xf32>
    %40 = tpu.matmul %37, %39, %cst_42 {dimension_numbers = #tpu.dot_dimension_numbers<[1], [0], [0], [1], [0, 0, 1, 1], [], []>} : vector<1024x12xbf16>, vector<12x8xbf16>, vector<1024x8xf32> -> vector<1024x8xf32>
    %41 = arith.addf %35, %40 : vector<1024x8xf32>
    %c1_43 = arith.constant 1 : index
    %c1_44 = arith.constant 1 : index
    %c0_45 = arith.constant 0 : index
    %c0_46 = arith.constant 0 : index
    %42 = vector.load %arg6[%c1_43, %c1_44, %c0_45, %c0_46] : memref<6x18x16x12xbf16, #tpu.memory_space<vmem>>, vector<4x16x16x12xbf16>
    %43 = vector.shape_cast %42 : vector<4x16x16x12xbf16> to vector<1024x12xbf16>
    %c4 = arith.constant 4 : index
    %c0_47 = arith.constant 0 : index
    %c0_48 = arith.constant 0 : index
    %44 = vector.load %arg3[%c4, %c0_47, %c0_48] : memref<9x12x8xbf16, #tpu.memory_space<vmem>>, vector<1x12x8xbf16>
    %45 = vector.shape_cast %44 : vector<1x12x8xbf16> to vector<12x8xbf16>
    %cst_49 = arith.constant dense<0.000000e+00> : vector<1024x8xf32>
    %46 = tpu.matmul %43, %45, %cst_49 {dimension_numbers = #tpu.dot_dimension_numbers<[1], [0], [0], [1], [0, 0, 1, 1], [], []>} : vector<1024x12xbf16>, vector<12x8xbf16>, vector<1024x8xf32> -> vector<1024x8xf32>
    %47 = arith.addf %41, %46 : vector<1024x8xf32>
    %c1_50 = arith.constant 1 : index
    %c2_51 = arith.constant 2 : index
    %c0_52 = arith.constant 0 : index
    %c0_53 = arith.constant 0 : index
    %48 = vector.load %arg6[%c1_50, %c2_51, %c0_52, %c0_53] : memref<6x18x16x12xbf16, #tpu.memory_space<vmem>>, vector<4x16x16x12xbf16>
    %49 = vector.shape_cast %48 : vector<4x16x16x12xbf16> to vector<1024x12xbf16>
    %c5 = arith.constant 5 : index
    %c0_54 = arith.constant 0 : index
    %c0_55 = arith.constant 0 : index
    %50 = vector.load %arg3[%c5, %c0_54, %c0_55] : memref<9x12x8xbf16, #tpu.memory_space<vmem>>, vector<1x12x8xbf16>
    %51 = vector.shape_cast %50 : vector<1x12x8xbf16> to vector<12x8xbf16>
    %cst_56 = arith.constant dense<0.000000e+00> : vector<1024x8xf32>
    %52 = tpu.matmul %49, %51, %cst_56 {dimension_numbers = #tpu.dot_dimension_numbers<[1], [0], [0], [1], [0, 0, 1, 1], [], []>} : vector<1024x12xbf16>, vector<12x8xbf16>, vector<1024x8xf32> -> vector<1024x8xf32>
    %53 = arith.addf %47, %52 : vector<1024x8xf32>
    %c2_57 = arith.constant 2 : index
    %c0_58 = arith.constant 0 : index
    %c0_59 = arith.constant 0 : index
    %c0_60 = arith.constant 0 : index
    %54 = vector.load %arg6[%c2_57, %c0_58, %c0_59, %c0_60] : memref<6x18x16x12xbf16, #tpu.memory_space<vmem>>, vector<4x16x16x12xbf16>
    %55 = vector.shape_cast %54 : vector<4x16x16x12xbf16> to vector<1024x12xbf16>
    %c6 = arith.constant 6 : index
    %c0_61 = arith.constant 0 : index
    %c0_62 = arith.constant 0 : index
    %56 = vector.load %arg3[%c6, %c0_61, %c0_62] : memref<9x12x8xbf16, #tpu.memory_space<vmem>>, vector<1x12x8xbf16>
    %57 = vector.shape_cast %56 : vector<1x12x8xbf16> to vector<12x8xbf16>
    %cst_63 = arith.constant dense<0.000000e+00> : vector<1024x8xf32>
    %58 = tpu.matmul %55, %57, %cst_63 {dimension_numbers = #tpu.dot_dimension_numbers<[1], [0], [0], [1], [0, 0, 1, 1], [], []>} : vector<1024x12xbf16>, vector<12x8xbf16>, vector<1024x8xf32> -> vector<1024x8xf32>
    %59 = arith.addf %53, %58 : vector<1024x8xf32>
    %c2_64 = arith.constant 2 : index
    %c1_65 = arith.constant 1 : index
    %c0_66 = arith.constant 0 : index
    %c0_67 = arith.constant 0 : index
    %60 = vector.load %arg6[%c2_64, %c1_65, %c0_66, %c0_67] : memref<6x18x16x12xbf16, #tpu.memory_space<vmem>>, vector<4x16x16x12xbf16>
    %61 = vector.shape_cast %60 : vector<4x16x16x12xbf16> to vector<1024x12xbf16>
    %c7 = arith.constant 7 : index
    %c0_68 = arith.constant 0 : index
    %c0_69 = arith.constant 0 : index
    %62 = vector.load %arg3[%c7, %c0_68, %c0_69] : memref<9x12x8xbf16, #tpu.memory_space<vmem>>, vector<1x12x8xbf16>
    %63 = vector.shape_cast %62 : vector<1x12x8xbf16> to vector<12x8xbf16>
    %cst_70 = arith.constant dense<0.000000e+00> : vector<1024x8xf32>
    %64 = tpu.matmul %61, %63, %cst_70 {dimension_numbers = #tpu.dot_dimension_numbers<[1], [0], [0], [1], [0, 0, 1, 1], [], []>} : vector<1024x12xbf16>, vector<12x8xbf16>, vector<1024x8xf32> -> vector<1024x8xf32>
    %65 = arith.addf %59, %64 : vector<1024x8xf32>
    %c2_71 = arith.constant 2 : index
    %c2_72 = arith.constant 2 : index
    %c0_73 = arith.constant 0 : index
    %c0_74 = arith.constant 0 : index
    %66 = vector.load %arg6[%c2_71, %c2_72, %c0_73, %c0_74] : memref<6x18x16x12xbf16, #tpu.memory_space<vmem>>, vector<4x16x16x12xbf16>
    %67 = vector.shape_cast %66 : vector<4x16x16x12xbf16> to vector<1024x12xbf16>
    %c8 = arith.constant 8 : index
    %c0_75 = arith.constant 0 : index
    %c0_76 = arith.constant 0 : index
    %68 = vector.load %arg3[%c8, %c0_75, %c0_76] : memref<9x12x8xbf16, #tpu.memory_space<vmem>>, vector<1x12x8xbf16>
    %69 = vector.shape_cast %68 : vector<1x12x8xbf16> to vector<12x8xbf16>
    %cst_77 = arith.constant dense<0.000000e+00> : vector<1024x8xf32>
    %70 = tpu.matmul %67, %69, %cst_77 {dimension_numbers = #tpu.dot_dimension_numbers<[1], [0], [0], [1], [0, 0, 1, 1], [], []>} : vector<1024x12xbf16>, vector<12x8xbf16>, vector<1024x8xf32> -> vector<1024x8xf32>
    %71 = arith.addf %65, %70 : vector<1024x8xf32>
    %72 = vector.shape_cast %71 : vector<1024x8xf32> to vector<4x16x16x8xf32>
    %c0_78 = arith.constant 0 : index
    %c0_79 = arith.constant 0 : index
    %c0_80 = arith.constant 0 : index
    %c0_81 = arith.constant 0 : index
    %c0_82 = arith.constant 0 : index
    %73 = vector.load %arg5[%c0_78, %c0_79, %c0_80, %c0_81, %c0_82] : memref<1x4x16x16x8xf32, #tpu.memory_space<vmem>>, vector<1x4x16x16x8xf32>
    %74 = vector.shape_cast %73 : vector<1x4x16x16x8xf32> to vector<4x16x16x8xf32>
    %75 = vector.shape_cast %72 : vector<4x16x16x8xf32> to vector<1x4x16x16x8xf32>
    tpu.vector_store %arg5[%c0_78, %c0_79, %c0_80, %c0_81, %c0_82], %75 {strides = array<i32>} : memref<1x4x16x16x8xf32, #tpu.memory_space<vmem>>, vector<1x4x16x16x8xf32>,
    %c4_83 = arith.constant 4 : index
    %c0_84 = arith.constant 0 : index
    %c0_85 = arith.constant 0 : index
    %c0_86 = arith.constant 0 : index
    %76 = vector.load %arg6[%c4_83, %c0_84, %c0_85, %c0_86] : memref<6x18x16x12xbf16, #tpu.memory_space<vmem>>, vector<2x18x16x12xbf16>
    %c0_87 = arith.constant 0 : index
    %c0_88 = arith.constant 0 : index
    %c0_89 = arith.constant 0 : index
    %c0_90 = arith.constant 0 : index
    %77 = vector.load %arg6[%c0_87, %c0_88, %c0_89, %c0_90] : memref<6x18x16x12xbf16, #tpu.memory_space<vmem>>, vector<2x18x16x12xbf16>
    tpu.vector_store %arg6[%c0_87, %c0_88, %c0_89, %c0_90], %76 {strides = array<i32>} : memref<6x18x16x12xbf16, #tpu.memory_space<vmem>>, vector<2x18x16x12xbf16>,
    return
  }
  func.func @transform_0(%arg0: i32, %arg1: i32) -> (i32, i32, i32, i32, i32) {
    %c0_i32 = arith.constant 0 : i32
    %c0_i32_0 = arith.constant 0 : i32
    %c0_i32_1 = arith.constant 0 : i32
    %c0_i32_2 = arith.constant 0 : i32
    return %arg0, %arg1, %c0_i32, %c0_i32_0, %c0_i32_1 : i32, i32, i32, i32, i32
  }
  func.func @transform_1(%arg0: i32, %arg1: i32) -> (i32, i32, i32) {
    %c0_i32 = arith.constant 0 : i32
    %c0_i32_0 = arith.constant 0 : i32
    %c0_i32_1 = arith.constant 0 : i32
    %c0_i32_2 = arith.constant 0 : i32
    return %c0_i32, %c0_i32_0, %c0_i32_1 : i32, i32, i32
  }
  func.func @transform_2(%arg0: i32, %arg1: i32) -> (i32, i32) {
    %c0_i32 = arith.constant 0 : i32
    %c0_i32_0 = arith.constant 0 : i32
    %c0_i32_1 = arith.constant 0 : i32
    return %c0_i32, %c0_i32_0 : i32, i32
  }
  func.func @transform_3(%arg0: i32, %arg1: i32) -> (i32, i32, i32, i32, i32) {
    %c0_i32 = arith.constant 0 : i32
    %c0_i32_0 = arith.constant 0 : i32
    %c0_i32_1 = arith.constant 0 : i32
    %c0_i32_2 = arith.constant 0 : i32
    return %arg0, %arg1, %c0_i32, %c0_i32_0, %c0_i32_1 : i32, i32, i32, i32, i32
  }
}

</mosaic_0001>

<bundles_post_ra>
// kernel: tpu_custom_call.1
= control target key start
LH: loop header
LB: loop body
LE: loop exit
PB: predicated region body
PF: predicated region fallthrough
CT: control target
= control target key end

     0   :  { %8 = vsyncpa [#allocation4], 0  ;;  %s14850_s12 = smov 0   ;;  %s14852_s13 = smov 0   ;;  %s19072_s0 = inlined_call_operand.vmem [shape: bf16[2,8,16,16,4], index: 0, kind: input, shape index: {}]   ;;  %s19073_s1 = inlined_call_operand.vmem [shape: bf16[9,12,8], index: 1, kind: input, shape index: {}]   ;;  %s19074_s2 = inlined_call_operand.hbm [shape: f32[1,8], index: 2, kind: input, shape index: {}]   ;;  %s19075_s3 = inlined_call_operand.vmem [shape: f32[2,8,16,16,8], index: 3, kind: output, shape index: {}]  }
   0x1   :  { %s14854_s14 = smov 0   ;;  %s14856_s15 = smov 0  }
   0x2   :  { %s14858_s16 = smov 0  }
   0x3 LB: > { %s11022_s17 = sadd.s32 4294967295, %s14824_s16   ;;  %s23_s18 = sadd.s32 1, %s14816_s14  ;;  %s14824_s16 = sphi %s14858_s16, %s14_s16   ;;  %s14820_s15 = sphi %s14856_s15, %s19714_s15   ;;  %s14816_s14 = sphi %s14854_s14, %s19713_s14   ;;  %s14812_s13 = sphi %s14852_s13, %s19712_s13   ;;  %s14808_s12 = sphi %s14850_s12, %s19711_s12  }
   0x4   : > { %p24_p0 = scmp.ge.s32.totalorder %s23_s18, 2  ;;  %s26_s19 = sadd.s32 1, %s14820_s15 }
   0x5   : > { %p11024_p1 = scmp.ge.s32.totalorder %s14824_s16, 1  ;;  %p129_p2 = scmp.lt.s32.totalorder %s14824_s16, 5 }
   0x6   : > { %s19716_s18 = smov (%p24_p0, %s23_s18), 0  ;;  %s19718_s19 = smov (!%p24_p0, %s26_s19), %s14820_s15 }
   0x7   : > { %p14883_p3 = pnand %p11024_p1, %p129_p2  ;;  %p28_p4 = scmp.ge.s32.totalorder %s19718_s19, 2 }
   0x8   : > { %p14887_p5 = scmp.eq.s32.totalorder %s11022_s17, 0  ;;  %s14826_s22 = smov [#allocation3]  }
   0x9   : > { %s19236_s20 = scalar_select %p14883_p3, 1, 0 }
   0xa   : > { %s19237_s21 = scalar_select %p14887_p5, 1, 0 }
   0xb   : > { %p14630_p6 = pneg %p14883_p3  ;;  %s19720_s19 = smov (%p28_p4, %s19718_s19), 0 }
   0xc   : > { %s145_s23 = sshll.u32 %s14826_s22, 4  ;;  %s14754_s27 = scalar_lea.hbm %s19074_s2, 16  ;;  %s146_s23 = int_to_ptr.vmem [resolvable:$true] %s145_s23 }
   0xd   : > { %p14897_p7 = pnand %p14887_p5, %p14630_p6  ;;  %p14755_p8 = scmp.ne.s32.totalorder %s19074_s2, %s14754_s27 }
   0xe   : > { %p14761_p12 = scmp.lt.u32.totalorder %s14754_s27, %s19074_s2 }
   0xf   : > { %p14756_p9 = pneg %p14897_p7 }
  0x11   : > { %p14757_p10 = pnand %p14756_p9, %p14755_p8 }
  0x13   : > { %p14758_p11 = pneg %p14757_p10 }
  0x15   : > { %p14763_p13 = pnand %p14761_p12, %p14758_p11 }
  0x17   : > { %14766 = shalt.err (!%p14763_p13)
}
  0x18   : > { %s14767_s5 = scalar_lea.vmem %s146_s23, 16  ;;  %s14774_s6 = scalar_lea.vmem %s146_s23, 32 }
  0x19   : > { %p14768_p0 = scmp.ne.s32.totalorder %s146_s23, %s14767_s5  ;;  %p14775_p4 = scmp.lt.s32.totalorder %s146_s23, %s146_s23 }
  0x1a   : > { %p14776_p6 = scmp.lt.s32.totalorder %s14774_s6, %s14767_s5 }
  0x1b   : > { %p14770_p1 = pnand %p14768_p0, %p14756_p9 }
  0x1c   : > { %p14777_p5 = por %p14776_p6, %p14775_p4 }
  0x1d   : > { %p14771_p2 = pneg %p14770_p1 }
  0x1f   : > { %p14778_p3 = pnand %p14777_p5, %p14771_p2 }
  0x21   : > { %14781 = shalt.err (!%p14778_p3)
}
  0x22   : > { %14633 = dma.hbm_to_vmem [thread:$0]  (!%p14897_p7), %s19074_s2, 16, %s146_s23, [#allocation4]  }
  0x23   : > { %p19239_p8 = scmp.ne.s32.totalorder %s19236_s20, 0 }
  0x25   : > { %172 = sbr.rel (%p19239_p8) target bundleno = 1803 (0x70b), region = 32 }
  0x2c   : > { %p19240_p10 = scmp.ne.s32.totalorder %s19237_s21, 0 }
  0x2e   : > { %14803 = dma.done.wait (%p19240_p10), [#allocation4], 16  }
  0x2f   : > { %14805 = vsyncadd (%p19240_p10), [#allocation4], 4294967280  ;;  %s11029_s9 = sshll.u32 %s14808_s12, 2  ;;  %p207_p3 = scmp.lt.s32.totalorder %s14812_s13, 1 }
  0x30   : > { %p209_p5 = scmp.lt.s32.totalorder %s11029_s9, 7  ;;  %p11037_p7 = scmp.ne.s32.totalorder %s14808_s12, 0 }
  0x31   : > { %s19722_s13 = smov (!%p207_p3, %s14812_s13), 1  ;;  %vm233_vm0 = vcmask (!%p11037_p7), 97280   ;;  %v14827_v0 = vmov (!%p11037_p7), 0  }
  0x32   : > { %s19724_s9 = smov (!%p209_p5, %s11029_s9), 7  ;;  %s11031_s10 = sshll.u32 %s19722_s13, 8  ;;  %234 = vst.msk [vmem:[#allocation2] sm:$0xff] (!%p11037_p7), %vm233_vm0, %v14827_v0  ;;  %235 = vst.msk [vmem:[#allocation2 + $0x90] sm:$0xff] (!%p11037_p7), %vm233_vm0, %v14827_v0 }
  0x33   : > { %s11030_s11 = sshll.u32 %s19724_s9, 5  ;;  %232 = sbr.rel (%p11037_p7) target bundleno = 58 (0x3a), region = 40  ;;  %236 = vst.msk [vmem:[#allocation2 + $0x120] sm:$0xff] (!%p11037_p7), %vm233_vm0, %v14827_v0  ;;  %237 = vst.msk [vmem:[#allocation2 + $0x1b0] sm:$0xff] (!%p11037_p7), %vm233_vm0, %v14827_v0 }
  0x34   : > { %s213_s17 = sadd.s32 %s11031_s10, %s11030_s11  ;;  %238 = vst.msk [vmem:[#allocation2 + $0x240] sm:$0xff] (!%p11037_p7), %vm233_vm0, %v14827_v0  ;;  %239 = vst.msk [vmem:[#allocation2 + $0x2d0] sm:$0xff] (!%p11037_p7), %vm233_vm0, %v14827_v0 }
  0x35   : > { %s11032_s22 = sshll.u32 %s213_s17, 2  ;;  %s11036_s20 = sshll.u32 %s213_s17, 3  ;;  %241 = vst.msk [vmem:[#allocation2 + $0x88] sm:$0xff] (!%p11037_p7), %vm233_vm0, %v14827_v0  ;;  %242 = vst.msk [vmem:[#allocation2 + $0x118] sm:$0xff] (!%p11037_p7), %vm233_vm0, %v14827_v0 }
  0x36   : > { %s14929_s25 = scalar_lea.vmem %s19072_s0, %s11032_s22  ;;  %s14934_s27 = scalar_lea.vmem %s19075_s3, %s11036_s20  ;;  %243 = vst.msk [vmem:[#allocation2 + $0x1a8] sm:$0xff] (!%p11037_p7), %vm233_vm0, %v14827_v0  ;;  %244 = vst.msk [vmem:[#allocation2 + $0x238] sm:$0xff] (!%p11037_p7), %vm233_vm0, %v14827_v0 }
  0x37   : > { %245 = vst.msk [vmem:[#allocation2 + $0x2c8] sm:$0xff] (!%p11037_p7), %vm233_vm0, %v14827_v0  ;;  %246 = vst.msk [vmem:[#allocation2 + $0x358] sm:$0xff] (!%p11037_p7), %vm233_vm0, %v14827_v0 }
  0x3a PF: > { %v14940_v1 = vld [vmem:[%s14929_s25 + $0x10] sm:$0xff]   ;;  %v14943_v2 = vld [vmem:[%s14929_s25] sm:$0xff]   ;;  %s14828_s13 = smov 4   ;;  %v14948_v3 = vld [vmem:[%s14929_s25 + $0x18] sm:$0xff]   ;;  %vm1466_vm1 = vcmask 1047552   ;;  %s14829_s28 = smov 8  }
  0x3b   : > { %1537 = vrot.lane.b32.xlu1 %v14940_v1, %s14828_s13  ;;  %1533 = vrot.lane.b32.xlu0 %v14943_v2, %s14828_s13  ;;  %v14953_v4 = vld [vmem:[%s14929_s25 + $0x8] sm:$0xff]   ;;  %v14963_v6 = vld [vmem:[%s14929_s25 + $0x20] sm:$0xff]   ;;  %v19085_v29 = vshrl.u32 %v14940_v1, 16  ;;  %v19097_v31 = vshrl.u32 %v14943_v2, 16  ;;  %v19086_v33 = vshrl.u32 %v14948_v3, 16  ;;  %v19093_v38 = vshll.u32 %v14940_v1, 16 }
  0x3c   : > { %v14958_v5 = vld [vmem:[%s14929_s25 + $0x28] sm:$0xff]   ;;  %v14968_v7 = vld [vmem:[%s14929_s25 + $0x38] sm:$0xff]   ;;  %v14973_v8 = vld [vmem:[%s14929_s25 + $0x30] sm:$0xff]   ;;  %v19098_v34 = vshrl.u32 %v14953_v4, 16  ;;  %v19102_v40 = vshll.u32 %v14943_v2, 16  ;;  %v19079_v42 = vshrl.u32 %v14963_v6, 16 }
  0x3d   : > { %v14978_v9 = vld [vmem:[%s14929_s25 + $0x48] sm:$0xff]   ;;  %v14983_v10 = vld [vmem:[%s14929_s25 + $0x40] sm:$0xff]   ;;  %v14988_v11 = vld [vmem:[%s14929_s25 + $0x58] sm:$0xff]   ;;  %v712_v36 = vrot.slane %v19085_v29, 7  ;;  %v698_v39 = vrot.slane %v19097_v31, 7  ;;  %v19081_v41 = vshrl.u32 %v14958_v5, 16 }
  0x3e   : > { %v14993_v12 = vld [vmem:[%s14929_s25 + $0x50] sm:$0xff]   ;;  %v14998_v13 = vld [vmem:[%s14929_s25 + $0x68] sm:$0xff]   ;;  %v15003_v14 = vld [vmem:[%s14929_s25 + $0x60] sm:$0xff]   ;;  %v719_v45 = vrot.slane %v19086_v33, 7  ;;  %v19094_v46 = vshll.u32 %v14948_v3, 16  ;;  %v705_v48 = vrot.slane %v19098_v34, 7 }
  0x3f   : > { %1539 = vrot.lane.b32.xlu1 %v14948_v3, %s14828_s13  ;;  %1535 = vrot.lane.b32.xlu0 %v14953_v4, %s14828_s13  ;;  %v15008_v15 = vld [vmem:[%s14929_s25 + $0x78] sm:$0xff]   ;;  %v15013_v16 = vld [vmem:[%s14929_s25 + $0x70] sm:$0xff]   ;;  %v15109_v43 = vor.u32 %v19093_v38, %v712_v36  ;;  %v15113_v44 = vor.u32 %v19102_v40, %v698_v39  ;;  %v19103_v49 = vshll.u32 %v14953_v4, 16  ;;  %v19080_v50 = vshrl.u32 %v14968_v7, 16 }
  0x40   : > { %v15018_v17 = vld [vmem:[%s14929_s25 + $0x88] sm:$0xff]   ;;  %v15023_v18 = vld [vmem:[%s14929_s25 + $0x80] sm:$0xff]   ;;  %v15028_v19 = vld [vmem:[%s14929_s25 + $0x98] sm:$0xff]   ;;  %v15134_v52 = vor.u32 %v19094_v46, %v719_v45  ;;  %v19082_v53 = vshrl.u32 %v14973_v8, 16  ;;  %v733_v55 = vrot.slane %v19081_v41, 7  ;;  %v19090_v56 = vshll.u32 %v14958_v5, 16 }
  0x41   : > { %v15033_v20 = vld [vmem:[%s14929_s25 + $0x90] sm:$0xff]   ;;  %v15038_v21 = vld [vmem:[%s14929_s25 + $0xa8] sm:$0xff]   ;;  %v15043_v22 = vld [vmem:[%s14929_s25 + $0xa0] sm:$0xff]   ;;  %19251 = vst [vmem:[#allocation16_spill] sm:$0xff] %v15109_v43  ;;  %v15139_v54 = vor.u32 %v19103_v49, %v705_v48  ;;  %v726_v57 = vrot.slane %v19079_v42, 7  ;;  %v19084_v58 = vshll.u32 %v14963_v6, 16 }
  0x42   : > { %v15048_v23 = vld [vmem:[%s14929_s25 + $0xb8] sm:$0xff]   ;;  %v15053_v24 = vld [vmem:[%s14929_s25 + $0xb0] sm:$0xff]   ;;  %v15058_v25 = vld [vmem:[%s14929_s25 + $0xc8] sm:$0xff]   ;;  %19252 = vst [vmem:[#allocation17_spill] sm:$0xff] %v15113_v44  ;;  %v19088_v59 = vshrl.u32 %v14978_v9, 16  ;;  %v15155_v61 = vor.u32 %v19090_v56, %v733_v55  ;;  %v19089_v62 = vshrl.u32 %v14983_v10, 16 }
  0x43   : > { %1543 = vrot.lane.b32.xlu1 %v14958_v5, %s14828_s13  ;;  %1541 = vrot.lane.b32.xlu0 %v14963_v6, %s14828_s13  ;;  %19241 = vst [vmem:[#allocation6_spill] sm:$0xff] %v15048_v23  ;;  %19242 = vst [vmem:[#allocation7_spill] sm:$0xff] %v15053_v24  ;;  %v15063_v26 = vld [vmem:[%s14929_s25 + $0xc0] sm:$0xff]   ;;  %v15068_v27 = vld [vmem:[%s14929_s25 + $0xd8] sm:$0xff]   ;;  %v15165_v0 = vor.u32 %v19084_v58, %v726_v57  ;;  %v747_v36 = vrot.slane %v19080_v50, 7  ;;  %v19083_v39 = vshll.u32 %v14968_v7, 16 }
  0x44   : > { %19243 = vst [vmem:[#allocation8_spill] sm:$0xff] %v15058_v25  ;;  %19244 = vst [vmem:[#allocation9_spill] sm:$0xff] %v15063_v26  ;;  %v15073_v28 = vld [vmem:[%s14929_s25 + $0xd0] sm:$0xff]   ;;  %v15079_v30 = vld [vmem:[%s14929_s25 + $0xe8] sm:$0xff]   ;;  %v740_v45 = vrot.slane %v19082_v53, 7  ;;  %v19087_v48 = vshll.u32 %v14973_v8, 16 }
  0x45   : > { %19245 = vst [vmem:[#allocation10_spill] sm:$0xff] %v15068_v27  ;;  %19246 = vst [vmem:[#allocation11_spill] sm:$0xff] %v15073_v28  ;;  %v15085_v32 = vld [vmem:[%s14929_s25 + $0xe0] sm:$0xff]   ;;  %v15092_v35 = vld [vmem:[%s14929_s25 + $0xf8] sm:$0xff]   ;;  %v19092_v55 = vshrl.u32 %v14988_v11, 16  ;;  %v15176_v42 = vor.u32 %v19083_v39, %v747_v36  ;;  %v19096_v57 = vshrl.u32 %v14993_v12, 16 }
  0x46   : > { %19247 = vst [vmem:[#allocation12_spill] sm:$0xff] %v15079_v30  ;;  %19248 = vst [vmem:[#allocation13_spill] sm:$0xff] %v15085_v32  ;;  %v15099_v37 = vld [vmem:[%s14929_s25 + $0xf0] sm:$0xff]   ;;  %v15121_v47 = vld [vmem:[%s14929_s25 + $0x108] sm:$0xff]   ;;  %v15186_v41 = vor.u32 %v19087_v48, %v740_v45  ;;  %v761_v36 = vrot.slane %v19088_v59, 7  ;;  %v19091_v39 = vshll.u32 %v14978_v9, 16 }
  0x47   : > { %1547 = vrot.lane.b32.xlu1 %v14968_v7, %s14828_s13  ;;  %1545 = vrot.lane.b32.xlu0 %v14973_v8, %s14828_s13  ;;  %19249 = vst [vmem:[#allocation14_spill] sm:$0xff] %v15092_v35  ;;  %19250 = vst [vmem:[#allocation15_spill] sm:$0xff] %v15099_v37  ;;  %v15130_v51 = vld [vmem:[%s14929_s25 + $0x100] sm:$0xff]   ;;  %v15151_v60 = vld [vmem:[%s14929_s25 + $0x118] sm:$0xff]   ;;  %v754_v58 = vrot.slane %v19089_v62, 7  ;;  %v19095_v29 = vshll.u32 %v14983_v10, 16 }
  0x48   : > { %19253 = vst [vmem:[#allocation18_spill] sm:$0xff] %v15121_v47  ;;  %19254 = vst [vmem:[#allocation19_spill] sm:$0xff] %v15130_v51  ;;  %v15161_v63 = vld [vmem:[%s14929_s25 + $0x110] sm:$0xff]   ;;  %v15182_v50 = vld [vmem:[%s14929_s25 + $0x128] sm:$0xff]   ;;  %v19100_v33 = vshrl.u32 %v14998_v13, 16  ;;  %v15202_v45 = vor.u32 %v19091_v39, %v761_v36  ;;  %v775_v48 = vrot.slane %v19092_v55, 7 }
  0x49   : > { %19255 = vst [vmem:[#allocation20_spill] sm:$0xff] %v15134_v52  ;;  %19256 = vst [vmem:[#allocation21_spill] sm:$0xff] %v15139_v54  ;;  %v15191_v53 = vld [vmem:[%s14929_s25 + $0x120] sm:$0xff]   ;;  %v15209_v59 = vld [vmem:[%s14929_s25 + $0x138] sm:$0xff]   ;;  %v15213_v62 = vor.u32 %v19095_v29, %v754_v58  ;;  %v19099_v56 = vshll.u32 %v14988_v11, 16  ;;  %v768_v36 = vrot.slane %v19096_v57, 7 }
  0x4a   : > { %19257 = vst [vmem:[#allocation22_spill] sm:$0xff] %v15151_v60  ;;  %19258 = vst [vmem:[#allocation23_spill] sm:$0xff] %v15155_v61  ;;  %v19104_v39 = vshrl.u32 %v15003_v14, 16  ;;  %v15222_v55 = vld [vmem:[%s14929_s25 + $0x130] sm:$0xff]   ;;  %v19101_v38 = vshll.u32 %v14993_v12, 16  ;;  %v19106_v58 = vshrl.u32 %v15008_v15, 16 }
  0x4b   : > { %1551 = vrot.lane.b32.xlu1 %v14978_v9, %s14828_s13  ;;  %1549 = vrot.lane.b32.xlu0 %v14983_v10, %s14828_s13  ;;  %19259 = vst [vmem:[#allocation24_spill] sm:$0xff] %v15161_v63  ;;  %19260 = vst [vmem:[#allocation25_spill] sm:$0xff] %v15165_v0  ;;  %v15227_v46 = vor.u32 %v19099_v56, %v775_v48  ;;  %v789_v57 = vrot.slane %v19100_v33, 7  ;;  %v15240_v34 = vld [vmem:[%s14929_s25 + $0x148] sm:$0xff]   ;;  %v19105_v48 = vshll.u32 %v14998_v13, 16  ;;  %v15246_v56 = vld [vmem:[%s14929_s25 + $0x140] sm:$0xff]  }
  0x4c   : > { %19261 = vst [vmem:[#allocation26_spill] sm:$0xff] %v15176_v42  ;;  %19262 = vst [vmem:[#allocation27_spill] sm:$0xff] %v15182_v50  ;;  %v15232_v29 = vor.u32 %v19101_v38, %v768_v36  ;;  %v782_v36 = vrot.slane %v19104_v39, 7  ;;  %v19107_v33 = vshll.u32 %v15003_v14, 16  ;;  %v19108_v39 = vshll.u32 %v15008_v15, 16  ;;  %v15267_v38 = vld [vmem:[%s14929_s25 + $0x158] sm:$0xff]  }
  0x4d   : > { %19263 = vst [vmem:[#allocation28_spill] sm:$0xff] %v15186_v41  ;;  %19264 = vst [vmem:[#allocation29_spill] sm:$0xff] %v15191_v53  ;;  %v15254_v40 = vor.u32 %v19105_v48, %v789_v57  ;;  %v19271_v57 = vshrl.u32 %v15013_v16, 16  ;;  %v19109_v49 = vshll.u32 %v15013_v16, 16  ;;  %v19279_v41 = vshrl.u32 %v15033_v20, 16  ;;  %v15379_v43 = vld [vmem:[%s14929_s25 + $0x198] sm:$0xff]  }
  0x4e   : > { %19265 = vst [vmem:[#allocation30_spill] sm:$0xff] %v15202_v45  ;;  %19266 = vst [vmem:[#allocation31_spill] sm:$0xff] %v15213_v62  ;;  %v15259_v31 = vor.u32 %v19107_v33, %v782_v36  ;;  %v19110_v36 = vshll.u32 %v15018_v17, 16  ;;  %v19275_v62 = vshrl.u32 %v15023_v18, 16  ;;  %v19113_v0 = vshll.u32 %v15033_v20, 16  ;;  %v15408_v44 = vld [vmem:[%s14929_s25 + $0x1a8] sm:$0xff]  }
  0x4f   : > { %1555 = vrot.lane.b32.xlu1 %v14988_v11, %s14828_s13  ;;  %1553 = vrot.lane.b32.xlu0 %v14993_v12, %s14828_s13  ;;  %19267 = vst [vmem:[#allocation32_spill] sm:$0xff] %v15227_v46  ;;  %19268 = vst [vmem:[#allocation33_spill] sm:$0xff] %v15232_v29  ;;  %v803_v29 = vrot.slane %v19106_v58, 7  ;;  %v796_v48 = vrot.slane %v19271_v57, 7  ;;  %v15276_v58 = vld [vmem:[%s14929_s25 + $0x150] sm:$0xff]   ;;  %v19274_v57 = vshrl.u32 %v15018_v17, 16 }
  0x50   : > { %19269 = vst [vmem:[#allocation34_spill] sm:$0xff] %v15254_v40  ;;  %19270 = vst [vmem:[#allocation35_spill] sm:$0xff] %v15259_v31  ;;  %v810_v45 = vrot.slane %v19275_v62, 7  ;;  %v19277_v62 = vshrl.u32 %v15028_v19, 16  ;;  %v824_v42 = vrot.slane %v19279_v41, 7  ;;  %v19115_v61 = vshll.u32 %v15048_v23, 16 }
  0x51   : > { %v15280_v33 = vor.u32 %v19108_v39, %v803_v29  ;;  %v15284_v31 = vor.u32 %v19109_v49, %v796_v48  ;;  %v817_v40 = vrot.slane %v19274_v57, 7  ;;  %v15295_v29 = vld [vmem:[%s14929_s25 + $0x168] sm:$0xff]   ;;  %v19111_v39 = vshll.u32 %v15023_v18, 16  ;;  %v15302_v57 = vld [vmem:[%s14929_s25 + $0x160] sm:$0xff]  }
  0x52   : > { %v831_v46 = vrot.slane %v19277_v62, 7  ;;  %v19112_v48 = vshll.u32 %v15028_v19, 16  ;;  %v15323_v62 = vld [vmem:[%s14929_s25 + $0x178] sm:$0xff]   ;;  %v15336_v41 = vor.u32 %v19113_v0, %v824_v42  ;;  %v15349_v42 = vld [vmem:[%s14929_s25 + $0x188] sm:$0xff]   ;;  %v19285_v0 = vshrl.u32 %v15048_v23, 16 }
  0x53   : > { %1559 = vrot.lane.b32.xlu1 %v14998_v13, %s14828_s13  ;;  %1557 = vrot.lane.b32.xlu0 %v15003_v14, %s14828_s13  ;;  %19272 = vst [vmem:[#allocation36_spill] sm:$0xff] %v15280_v33  ;;  %19273 = vst [vmem:[#allocation37_spill] sm:$0xff] %v15284_v31  ;;  %v15306_v49 = vor.u32 %v19110_v36, %v817_v40  ;;  %v15313_v33 = vor.u32 %v19111_v39, %v810_v45  ;;  %v15332_v45 = vld [vmem:[%s14929_s25 + $0x170] sm:$0xff]   ;;  %v19282_v39 = vshrl.u32 %v15038_v21, 16  ;;  %vm1467_vm2 = vsmask.f32 7424 }
  0x54   : > { %v15327_v36 = vor.u32 %v19112_v48, %v831_v46  ;;  %19281 = vst [vmem:[#allocation41_spill] sm:$0xff] %v15336_v41  ;;  %v19283_v46 = vshrl.u32 %v15043_v22, 16  ;;  %v859_v31 = vrot.slane %v19285_v0, 7  ;;  %v19118_v52 = vshll.u32 %v15063_v26, 16  ;;  %vm15575_vm3 = vmand %vm1466_vm1, %vm1467_vm2 }
  0x55   : > { %19276 = vst [vmem:[#allocation38_spill] sm:$0xff] %v15306_v49  ;;  %19278 = vst [vmem:[#allocation39_spill] sm:$0xff] %v15313_v33  ;;  %v845_v40 = vrot.slane %v19282_v39, 7  ;;  %v19114_v33 = vshll.u32 %v15038_v21, 16  ;;  %v19286_v49 = vshll.u32 %v15043_v22, 16  ;;  %vm1207_vm4 = vcmask 1040384  }
  0x56   : > { %19280 = vst [vmem:[#allocation40_spill] sm:$0xff] %v15327_v36  ;;  %v838_v48 = vrot.slane %v19283_v46, 7  ;;  %v15361_v36 = vld [vmem:[%s14929_s25 + $0x180] sm:$0xff]   ;;  %v15374_v46 = vor.u32 %v19115_v61, %v859_v31  ;;  %v15391_v31 = vld [vmem:[%s14929_s25 + $0x190] sm:$0xff]   ;;  %v19117_v61 = vshll.u32 %v15058_v25, 16  ;;  %vm1853_vm7 = vcmask 31744  }
  0x57   : > { %1563 = vrot.lane.b32.xlu1 %v15008_v15, %s14828_s13  ;;  %1561 = vrot.lane.b32.xlu0 %v15013_v16, %s14828_s13  ;;  %v15353_v39 = vor.u32 %v19114_v33, %v845_v40  ;;  %v19288_v40 = vshrl.u32 %v15053_v24, 16  ;;  %vm1208_vm5 = vsmask.f32 256  ;;  %vm2046_vm8 = vcmask 64512  }
  0x58   : > { %v15365_v41 = vor.u32 %v19286_v49, %v838_v48  ;;  %19289 = vst [vmem:[#allocation44_spill] sm:$0xff] %v15374_v46  ;;  %v19291_v48 = vshrl.u32 %v15058_v25, 16  ;;  %v19292_v46 = vshrl.u32 %v15063_v26, 16  ;;  %vm16004_vm6 = vmand %vm1207_vm4, %vm1208_vm5  ;;  %vm2240_vm9 = vcmask 97280  }
  0x59   : > { %19284 = vst [vmem:[#allocation42_spill] sm:$0xff] %v15353_v39  ;;  %v852_v33 = vrot.slane %v19288_v40, 7  ;;  %v19116_v39 = vshll.u32 %v15053_v24, 16 }
  0x5a   : > { %19287 = vst [vmem:[#allocation43_spill] sm:$0xff] %v15365_v41  ;;  %v873_v40 = vrot.slane %v19291_v48, 7  ;;  %v866_v41 = vrot.slane %v19292_v46, 7 }
  0x5b   : > { %1567 = vrot.lane.b32.xlu1 %v15018_v17, %s14828_s13  ;;  %1565 = vrot.lane.b32.xlu0 %v15023_v18, %s14828_s13  ;;  %v15383_v49 = vor.u32 %v19116_v39, %v852_v33  ;;  %v19294_v39 = vshrl.u32 %v15068_v27, 16  ;;  %v19121_v33 = vshll.u32 %v15068_v27, 16 }
  0x5c   : > { %v15400_v48 = vor.u32 %v19117_v61, %v873_v40  ;;  %v15412_v46 = vor.u32 %v19118_v52, %v866_v41  ;;  %v15418_v40 = vld [vmem:[%s14929_s25 + $0x1a0] sm:$0xff]   ;;  %v19299_v52 = vshrl.u32 %v15079_v30, 16 }
  0x5d   : > { %19290 = vst [vmem:[#allocation45_spill] sm:$0xff] %v15383_v49  ;;  %v887_v0 = vrot.slane %v19294_v39, 7  ;;  %v19296_v39 = vshrl.u32 %v15073_v28, 16  ;;  %v19122_v49 = vshll.u32 %v15073_v28, 16 }
  0x5e   : > { %19293 = vst [vmem:[#allocation46_spill] sm:$0xff] %v15400_v48  ;;  %19295 = vst [vmem:[#allocation47_spill] sm:$0xff] %v15412_v46  ;;  %v901_v46 = vrot.slane %v19299_v52, 7  ;;  %v19127_v48 = vshll.u32 %v15079_v30, 16  ;;  %v19128_v52 = vshll.u32 %v15085_v32, 16 }
  0x5f   : > { %1571 = vrot.lane.b32.xlu1 %v15028_v19, %s14828_s13  ;;  %1569 = vrot.lane.b32.xlu0 %v15033_v20, %s14828_s13  ;;  %v880_v61 = vrot.slane %v19296_v39, 7  ;;  %v15426_v54 = vor.u32 %v19121_v33, %v887_v0  ;;  %v15438_v39 = vld [vmem:[%s14929_s25 + $0x1b8] sm:$0xff]   ;;  %v19301_v0 = vshrl.u32 %v15085_v32, 16 }
  0x60   : > { %19300 = vst [vmem:[#allocation50_spill] sm:$0xff] %v15438_v39 }
  0x61   : > { %19297 = vst [vmem:[#allocation48_spill] sm:$0xff] %v15426_v54  ;;  %v15430_v41 = vor.u32 %v19122_v49, %v880_v61  ;;  %v894_v33 = vrot.slane %v19301_v0, 7  ;;  %v15446_v61 = vld [vmem:[%s14929_s25 + $0x1b0] sm:$0xff]   ;;  %v15465_v49 = vld [vmem:[%s14929_s25 + $0x1c8] sm:$0xff]  }
  0x62   : > { %19302 = vst [vmem:[#allocation51_spill] sm:$0xff] %v15446_v61  ;;  %19306 = vst [vmem:[#allocation54_spill] sm:$0xff] %v15465_v49 }
  0x63   : > { %1575 = vrot.lane.b32.xlu1 %v15038_v21, %s14828_s13  ;;  %1573 = vrot.lane.b32.xlu0 %v15043_v22, %s14828_s13  ;;  %19298 = vst [vmem:[#allocation49_spill] sm:$0xff] %v15430_v41  ;;  %v19304_v41 = vshrl.u32 %v15092_v35, 16  ;;  %v15459_v0 = vor.u32 %v19128_v52, %v894_v33  ;;  %v15474_v33 = vld [vmem:[%s14929_s25 + $0x1c0] sm:$0xff]  }
  0x64   : > { %19308 = vst [vmem:[#allocation55_spill] sm:$0xff] %v15474_v33 }
  0x65   : > { %v915_v54 = vrot.slane %v19304_v41, 7  ;;  %19305 = vst [vmem:[#allocation53_spill] sm:$0xff] %v15459_v0  ;;  %v19136_v41 = vshll.u32 %v15099_v37, 16 }
  0x67   : > { %1579 = vrot.lane.b32.xlu1 %v15048_v23, %s14828_s13  ;;  %1577 = vrot.lane.b32.xlu0 %v15053_v24, %s14828_s13 }
  0x6b   : > { %1583 = vrot.lane.b32.xlu1 %v15058_v25, %s14828_s13  ;;  %1581 = vrot.lane.b32.xlu0 %v15063_v26, %s14828_s13  ;;  %v15452_v26 = vor.u32 %v19127_v48, %v901_v46  ;;  %v19307_v46 = vshrl.u32 %v15099_v37, 16 }
  0x6d   : > { %19303 = vst [vmem:[#allocation52_spill] sm:$0xff] %v15452_v26  ;;  %v908_v48 = vrot.slane %v19307_v46, 7  ;;  %v19311_v26 = vshrl.u32 %v15121_v47, 16 }
  0x6f   : > { %1587 = vrot.lane.b32.xlu1 %v15068_v27, %s14828_s13  ;;  %1585 = vrot.lane.b32.xlu0 %v15073_v28, %s14828_s13  ;;  %v19135_v27 = vshll.u32 %v15092_v35, 16  ;;  %v15482_v0 = vor.u32 %v19136_v41, %v908_v48  ;;  %v929_v46 = vrot.slane %v19311_v26, 7  ;;  %v19143_v28 = vshll.u32 %v15121_v47, 16  ;;  %v15499_v48 = vld [vmem:[%s14929_s25 + $0x1d0] sm:$0xff]  }
  0x70   : > { %19314 = vst [vmem:[#allocation59_spill] sm:$0xff] %v15499_v48  ;;  %v19316_v41 = vshrl.u32 %v15151_v60, 16 }
  0x71   : > { %v15478_v52 = vor.u32 %v19135_v27, %v915_v54  ;;  %19310 = vst [vmem:[#allocation57_spill] sm:$0xff] %v15482_v0  ;;  %v15493_v54 = vld [vmem:[%s14929_s25 + $0x1d8] sm:$0xff]   ;;  %v19146_v27 = vshll.u32 %v15130_v51, 16  ;;  %v15503_v26 = vor.u32 %v19143_v28, %v929_v46  ;;  %v19320_v46 = vshrl.u32 %v15161_v63, 16 }
  0x72   : > { %19313 = vst [vmem:[#allocation58_spill] sm:$0xff] %v15493_v54 }
  0x73   : > { %1591 = vrot.lane.b32.xlu1 %v15079_v30, %s14828_s13  ;;  %1589 = vrot.lane.b32.xlu0 %v15085_v32, %s14828_s13  ;;  %19309 = vst [vmem:[#allocation56_spill] sm:$0xff] %v15478_v52  ;;  %v19312_v30 = vshrl.u32 %v15130_v51, 16  ;;  %19315 = vst [vmem:[#allocation60_spill] sm:$0xff] %v15503_v26  ;;  %v19149_v52 = vshll.u32 %v15151_v60, 16  ;;  %v936_v28 = vrot.slane %v19320_v46, 7  ;;  %v15537_v46 = vld [vmem:[%s14929_s25 + $0x1e0] sm:$0xff]  }
  0x74   : > { %19325 = vst [vmem:[#allocation66_spill] sm:$0xff] %v15537_v46 }
  0x75   : > { %v922_v25 = vrot.slane %v19312_v30, 7  ;;  %v943_v30 = vrot.slane %v19316_v41, 7  ;;  %v15523_v41 = vld [vmem:[%s14929_s25 + $0x1e8] sm:$0xff]  }
  0x76   : > { %19321 = vst [vmem:[#allocation64_spill] sm:$0xff] %v15523_v41 }
  0x77   : > { %1595 = vrot.lane.b32.xlu1 %v15092_v35, %s14828_s13  ;;  %1593 = vrot.lane.b32.xlu0 %v15099_v37, %s14828_s13  ;;  %v15513_v0 = vor.u32 %v19146_v27, %v922_v25  ;;  %v19322_v37 = vshll.u32 %v14953_v4, 16  ;;  %v15531_v25 = vor.u32 %v19149_v52, %v943_v30  ;;  %v19328_v52 = vshrl.u32 %v15191_v53, 16 }
  0x78   : > { %v19333_v30 = vshrl.u32 %v14943_v2, 16 }
  0x79   : > { %19318 = vst [vmem:[#allocation62_spill] sm:$0xff] %v15513_v0  ;;  %v1276_v32 = vrot.slane %v19322_v37, 1  ;;  %19324 = vst [vmem:[#allocation65_spill] sm:$0xff] %v15531_v25  ;;  %v950_v27 = vrot.slane %v19328_v52, 7  ;;  %v19334_v52 = vshll.u32 %v15182_v50, 16 }
  0x7b   : > { %1599 = vrot.lane.b32.xlu1 %v15121_v47, %s14828_s13  ;;  %1597 = vrot.lane.b32.xlu0 %v15130_v51, %s14828_s13 }
  0x7f   : > { %1603 = vrot.lane.b32.xlu1 %v15151_v60, %s14828_s13  ;;  %1601 = vrot.lane.b32.xlu0 %v15161_v63, %s14828_s13 }
  0x83   : > { %1607 = vrot.lane.b32.xlu1 %v15182_v50, %s14828_s13  ;;  %1605 = vrot.lane.b32.xlu0 %v15191_v53, %s14828_s13 }
  0x87   : > { %1611 = vrot.lane.b32.xlu1 %v15209_v59, %s14828_s13  ;;  %1609 = vrot.lane.b32.xlu0 %v15222_v55, %s14828_s13 }
  0x8b   : > { %1615 = vrot.lane.b32.xlu1 %v15240_v34, %s14828_s13  ;;  %1613 = vrot.lane.b32.xlu0 %v15246_v56, %s14828_s13 }
  0x8f   : > { %1619 = vrot.lane.b32.xlu1 %v15267_v38, %s14828_s13  ;;  %1617 = vrot.lane.b32.xlu0 %v15276_v58, %s14828_s13 }
  0x93   : > { %1623 = vrot.lane.b32.xlu1 %v15295_v29, %s14828_s13  ;;  %1621 = vrot.lane.b32.xlu0 %v15302_v57, %s14828_s13 }
  0x97   : > { %1627 = vrot.lane.b32.xlu1 %v15323_v62, %s14828_s13  ;;  %1625 = vrot.lane.b32.xlu0 %v15332_v45, %s14828_s13 }
  0x9b   : > { %1631 = vrot.lane.b32.xlu1 %v15349_v42, %s14828_s13  ;;  %1629 = vrot.lane.b32.xlu0 %v15361_v36, %s14828_s13 }
  0x9f   : > { %1635 = vrot.lane.b32.xlu1 %v15379_v43, %s14828_s13  ;;  %1633 = vrot.lane.b32.xlu0 %v15391_v31, %s14828_s13 }
  0xa3   : > { %1639 = vrot.lane.b32.xlu1 %v15408_v44, %s14828_s13  ;;  %1637 = vrot.lane.b32.xlu0 %v15418_v40, %s14828_s13 }
  0xa7   : > { %1643 = vrot.lane.b32.xlu1 %v15438_v39, %s14828_s13  ;;  %1641 = vrot.lane.b32.xlu0 %v15446_v61, %s14828_s13 }
  0xab   : > { %1647 = vrot.lane.b32.xlu1 %v15465_v49, %s14828_s13  ;;  %1645 = vrot.lane.b32.xlu0 %v15474_v33, %s14828_s13 }
  0xad   : > { %v15509_v35 = vpop.permute.xlu1 %1537  ;;  %v15516_v24 = vpop.permute.xlu0 %1533 }
  0xae   : > { %19317 = vst [vmem:[#allocation61_spill] sm:$0xff] %v15509_v35  ;;  %19319 = vst [vmem:[#allocation63_spill] sm:$0xff] %v15516_v24  ;;  %v19323_v35 = vshll.u32 %v14943_v2, 16  ;;  %v19154_v24 = vshll.u32 %v15161_v63, 16  ;;  %v19339_v2 = vshll.u32 %v14948_v3, 16 }
  0xaf   : > { %1651 = vrot.lane.b32.xlu1 %v15493_v54, %s14828_s13  ;;  %1649 = vrot.lane.b32.xlu0 %v15499_v48, %s14828_s13 }
  0xb0   : > { %v1274_v51 = vrot.slane %v19323_v35, 1  ;;  %v19327_v35 = vshrl.u32 %v15182_v50, 16  ;;  %v15552_v0 = vor.u32 %v19154_v24, %v936_v28  ;;  %v15571_v28 = vld [vmem:[%s14929_s25 + $0x1f0] sm:$0xff]   ;;  %v19343_v50 = vshrl.u32 %v15209_v59, 16 }
  0xb1   : > { %v15540_v37 = vpop.permute.xlu1 %1539  ;;  %v15548_v25 = vpop.permute.xlu0 %1535  ;;  %19336 = vst [vmem:[#allocation72_spill] sm:$0xff] %v15571_v28 }
  0xb2   : > { %19326 = vst [vmem:[#allocation67_spill] sm:$0xff] %v15540_v37  ;;  %v957_v60 = vrot.slane %v19327_v35, 7  ;;  %19329 = vst [vmem:[#allocation68_spill] sm:$0xff] %v15548_v25  ;;  %v15557_v37 = vld [vmem:[%s14929_s25 + $0x1f8] sm:$0xff]   ;;  %v19332_v35 = vshrl.u32 %v14953_v4, 16  ;;  %v1275_v23 = vor.u32 %v1274_v51, %v19333_v30  ;;  %v19159_v25 = vshll.u32 %v15191_v53, 16 }
  0xb3   : > { %19330 = vst [vmem:[#allocation69_spill] sm:$0xff] %v15552_v0  ;;  %1655 = vrot.lane.b32.xlu1 %v15523_v41, %s14828_s13  ;;  %19331 = vst [vmem:[#allocation70_spill] sm:$0xff] %v15557_v37  ;;  %1653 = vrot.lane.b32.xlu0 %v15537_v46, %s14828_s13  ;;  %v1280_v4 = vrot.slane %v19339_v2, 1  ;;  %v971_v63 = vrot.slane %v19343_v50, 7  ;;  %v19346_v50 = vshll.u32 %v14958_v5, 16  ;;  %v19347_v2 = vshrl.u32 %v14948_v3, 16 }
  0xb4   : > { %v1277_v26 = vor.u32 %v1276_v32, %v19332_v35  ;;  %v15565_v47 = vor.u32 %v19334_v52, %v957_v60  ;;  %v19340_v32 = vshll.u32 %v14940_v1, 16  ;;  %v15589_v52 = vor.u32 %v19159_v25, %v950_v27 }
  0xb5   : > { %v15585_v35 = vpop.permute.xlu1 %1543  ;;  %v15594_v0 = vpop.permute.xlu0 %1541  ;;  %v1469_v27 = vsel %vm15575_vm3, %v1275_v23, 0  ;;  %v1284_v25 = vrot.slane %v19346_v50, 1  ;;  %v19349_v53 = vshll.u32 %v14963_v6, 16 }
  0xb6   : > { %19335 = vst [vmem:[#allocation71_spill] sm:$0xff] %v15565_v47  ;;  %v1278_v51 = vrot.slane %v19340_v32, 1  ;;  %19341 = vst [vmem:[#allocation73_spill] sm:$0xff] %v15585_v35  ;;  %v19345_v32 = vshrl.u32 %v15222_v55, 16  ;;  %v1470_v30 = vsel %vm15575_vm3, %v1277_v26, 0  ;;  %v19166_v47 = vshll.u32 %v15222_v55, 16 }
  0xb7   : > { %19342 = vst [vmem:[#allocation74_spill] sm:$0xff] %v15589_v52  ;;  %19344 = vst [vmem:[#allocation75_spill] sm:$0xff] %v15594_v0  ;;  %1659 = vrot.lane.b32.xlu1 %v15557_v37, %s14828_s13  ;;  %1657 = vrot.lane.b32.xlu0 %v15571_v28, %s14828_s13  ;;  %v19348_v0 = vshrl.u32 %v14940_v1, 16  ;;  %v1282_v26 = vrot.slane %v19349_v53, 1  ;;  %v19350_v52 = vshll.u32 %v15209_v59, 16  ;;  %v19352_v28 = vshrl.u32 %v15240_v34, 16 }
  0xb8   : > { %v964_v60 = vrot.slane %v19345_v32, 7  ;;  %v1281_v32 = vor.u32 %v1280_v4, %v19347_v2  ;;  %v19167_v4 = vshll.u32 %v15240_v34, 16  ;;  %v19353_v1 = vshrl.u32 %v15246_v56, 16 }
  0xb9   : > { %v1279_v35 = vor.u32 %v1278_v51, %v19348_v0  ;;  %v15618_v23 = vor.u32 %v19350_v52, %v971_v63  ;;  %v15620_v37 = vpop.permute.xlu1 %1547  ;;  %v985_v3 = vrot.slane %v19352_v28, 7  ;;  %v15632_v51 = vpop.permute.xlu0 %1545  ;;  %v19168_v2 = vshll.u32 %v15246_v56, 16 }
  0xba   : > { %19351 = vst [vmem:[#allocation76_spill] sm:$0xff] %v15620_v37  ;;  %v15624_v50 = vor.u32 %v19166_v47, %v964_v60  ;;  %v978_v0 = vrot.slane %v19353_v1, 7  ;;  %19354 = vst [vmem:[#allocation77_spill] sm:$0xff] %v15632_v51  ;;  %v19355_v60 = vshrl.u32 %v14958_v5, 16  ;;  %v1472_v1 = vsel %vm15575_vm3, %v1281_v32, 0 }
  0xbb   : > { %1727 = vrot.lane.b32.xlu1 %v1470_v30, %s14829_s28  ;;  %v15640_v28 = vor.u32 %v19167_v4, %v985_v3  ;;  %1725 = vrot.lane.b32.xlu0 %v1469_v27, %s14829_s28  ;;  %v19356_v47 = vshrl.u32 %v14963_v6, 16  ;;  %v19357_v53 = vshll.u32 %v14968_v7, 16  ;;  %v19358_v5 = vshll.u32 %v14973_v8, 16 }
  0xbc   : > { %v1285_v52 = vor.u32 %v1284_v25, %v19355_v60  ;;  %v1471_v3 = vsel %vm15575_vm3, %v1279_v35, 0  ;;  %v15658_v27 = vor.u32 %v19168_v2, %v978_v0  ;;  %v19360_v32 = vshrl.u32 %v15267_v38, 16 }
  0xbd   : > { %v1283_v63 = vor.u32 %v1282_v26, %v19356_v47  ;;  %v1288_v30 = vrot.slane %v19357_v53, 1  ;;  %v1286_v25 = vrot.slane %v19358_v5, 1  ;;  %v15652_v60 = vpop.permute.xlu1 %1551  ;;  %v19169_v6 = vshll.u32 %v15267_v38, 16  ;;  %v15664_v26 = vpop.permute.xlu0 %1549 }
  0xbe   : > { %19359 = vst [vmem:[#allocation78_spill] sm:$0xff] %v15652_v60  ;;  %v999_v4 = vrot.slane %v19360_v32, 7  ;;  %19361 = vst [vmem:[#allocation79_spill] sm:$0xff] %v15664_v26  ;;  %v19362_v53 = vshrl.u32 %v15276_v58, 16  ;;  %v1474_v35 = vsel %vm15575_vm3, %v1285_v52, 0  ;;  %v19170_v32 = vshll.u32 %v15276_v58, 16 }
  0xbf   : > { %1731 = vrot.lane.b32.xlu1 %v1472_v1, %s14829_s28  ;;  %1729 = vrot.lane.b32.xlu0 %v1471_v3, %s14829_s28  ;;  %v1473_v2 = vsel %vm15575_vm3, %v1283_v63, 0  ;;  %v19364_v60 = vshrl.u32 %v14973_v8, 16  ;;  %v19365_v26 = vshll.u32 %v14978_v9, 16  ;;  %v19368_v63 = vshrl.u32 %v15295_v29, 16 }
  0xc0   : > { %v992_v5 = vrot.slane %v19362_v53, 7  ;;  %v15674_v0 = vor.u32 %v19169_v6, %v999_v4  ;;  %v19363_v53 = vshrl.u32 %v14968_v7, 16  ;;  %v19367_v4 = vshll.u32 %v14983_v10, 16 }
  0xc1   : > { %v1287_v1 = vor.u32 %v1286_v25, %v19364_v60  ;;  %v1292_v52 = vrot.slane %v19365_v26, 1  ;;  %v15686_v51 = vpop.permute.xlu1 %1555  ;;  %v1013_v37 = vrot.slane %v19368_v63, 7  ;;  %v19171_v7 = vshll.u32 %v15295_v29, 16  ;;  %v19580_v24 = vld [vmem:[#allocation76_spill] sm:$0xff] }
  0xc2   : > { %v1289_v47 = vor.u32 %v1288_v30, %v19363_v53  ;;  %19366 = vst [vmem:[#allocation80_spill] sm:$0xff] %v15686_v51  ;;  %v1290_v6 = vrot.slane %v19367_v4, 1  ;;  %v15692_v3 = vor.u32 %v19170_v32, %v992_v5  ;;  %v15698_v30 = vpop.permute.xlu0 %1553  ;;  %v19370_v25 = vshrl.u32 %v15302_v57, 16 }
  0xc3   : > { %19369 = vst [vmem:[#allocation81_spill] sm:$0xff] %v15698_v30  ;;  %1735 = vrot.lane.b32.xlu1 %v1474_v35, %s14829_s28  ;;  %v19371_v53 = vshll.u32 %v14988_v11, 16  ;;  %v15708_v4 = vor.u32 %v19171_v7, %v1013_v37  ;;  %v19172_v63 = vshll.u32 %v15302_v57, 16  ;;  %1733 = vrot.lane.b32.xlu0 %v1473_v2, %s14829_s28  ;;  %v19372_v26 = vshrl.u32 %v14978_v9, 16 }
  0xc4   : > { %v1006_v60 = vrot.slane %v19370_v25, 7  ;;  %v1476_v32 = vsel %vm15575_vm3, %v1289_v47, 0  ;;  %v1475_v25 = vsel %vm15575_vm3, %v1287_v1, 0  ;;  %v19373_v8 = vshll.u32 %v14993_v12, 16 }
  0xc5   : > { %v1296_v5 = vrot.slane %v19371_v53, 1  ;;  %v1293_v35 = vor.u32 %v1292_v52, %v19372_v26  ;;  %v15720_v30 = vpop.permute.xlu1 %1559  ;;  %v19375_v37 = vshrl.u32 %v14983_v10, 16  ;;  %v19376_v47 = vshrl.u32 %v15323_v62, 16 }
  0xc6   : > { %v1294_v53 = vrot.slane %v19373_v8, 1  ;;  %19374 = vst [vmem:[#allocation82_spill] sm:$0xff] %v15720_v30  ;;  %v15726_v2 = vor.u32 %v19172_v63, %v1006_v60  ;;  %v19173_v1 = vshll.u32 %v15323_v62, 16  ;;  %v19175_v9 = vshrl.u32 %v15361_v36, 16  ;;  %v15732_v52 = vpop.permute.xlu0 %1557 }
  0xc7   : > { %v1291_v7 = vor.u32 %v1290_v6, %v19375_v37  ;;  %v1027_v51 = vrot.slane %v19376_v47, 7  ;;  %19377 = vst [vmem:[#allocation83_spill] sm:$0xff] %v15732_v52  ;;  %v19378_v8 = vshrl.u32 %v15332_v45, 16  ;;  %1739 = vrot.lane.b32.xlu1 %v1476_v32, %s14829_s28  ;;  %v19379_v10 = vshrl.u32 %v14988_v11, 16  ;;  %1737 = vrot.lane.b32.xlu0 %v1475_v25, %s14829_s28 }
  0xc8   : > { %v19174_v37 = vshll.u32 %v15332_v45, 16  ;;  %v1478_v47 = vsel %vm15575_vm3, %v1293_v35, 0  ;;  %v19381_v30 = vshll.u32 %v14998_v13, 16  ;;  %v19382_v11 = vshll.u32 %v15003_v14, 16 }
  0xc9   : > { %v1020_v26 = vrot.slane %v19378_v8, 7  ;;  %v1297_v6 = vor.u32 %v1296_v5, %v19379_v10  ;;  %v15742_v60 = vor.u32 %v19173_v1, %v1027_v51  ;;  %v19380_v8 = vshrl.u32 %v14993_v12, 16  ;;  %v15754_v10 = vpop.permute.xlu1 %1563 }
  0xca   : > { %v1300_v32 = vrot.slane %v19381_v30, 1  ;;  %v1298_v5 = vrot.slane %v19382_v11, 1  ;;  %19383 = vst [vmem:[#allocation84_spill] sm:$0xff] %v15754_v10  ;;  %v1477_v51 = vsel %vm15575_vm3, %v1291_v7, 0  ;;  %v19384_v35 = vshrl.u32 %v15349_v42, 16  ;;  %v15766_v30 = vpop.permute.xlu0 %1561 }
  0xcb   : > { %v1295_v63 = vor.u32 %v1294_v53, %v19380_v8  ;;  %v15760_v25 = vor.u32 %v19174_v37, %v1020_v26  ;;  %v19176_v12 = vshll.u32 %v15349_v42, 16  ;;  %19385 = vst [vmem:[#allocation85_spill] sm:$0xff] %v15766_v30  ;;  %v1034_v8 = vrot.slane %v19175_v9, 7  ;;  %1743 = vrot.lane.b32.xlu1 %v1478_v47, %s14829_s28  ;;  %1741 = vrot.lane.b32.xlu0 %v1477_v51, %s14829_s28 }
  0xcc   : > { %v1041_v1 = vrot.slane %v19384_v35, 7  ;;  %v1480_v7 = vsel %vm15575_vm3, %v1297_v6, 0  ;;  %v19177_v35 = vshll.u32 %v15361_v36, 16  ;;  %v19386_v9 = vshrl.u32 %v14998_v13, 16 }
  0xcd   : > { %v1479_v37 = vsel %vm15575_vm3, %v1295_v63, 0  ;;  %v19387_v11 = vshrl.u32 %v15003_v14, 16  ;;  %v19388_v30 = vshll.u32 %v15008_v15, 16  ;;  %v15788_v10 = vpop.permute.xlu1 %1567  ;;  %v19391_v63 = vshrl.u32 %v15379_v43, 16 }
  0xce   : > { %v15776_v26 = vor.u32 %v19176_v12, %v1041_v1  ;;  %v1301_v53 = vor.u32 %v1300_v32, %v19386_v9  ;;  %19389 = vst [vmem:[#allocation86_spill] sm:$0xff] %v15788_v10  ;;  %v19390_v1 = vshll.u32 %v15013_v16, 16  ;;  %v15794_v51 = vor.u32 %v19177_v35, %v1034_v8  ;;  %v15800_v9 = vpop.permute.xlu0 %1565 }
  0xcf   : > { %v1299_v47 = vor.u32 %v1298_v5, %v19387_v11  ;;  %v1304_v6 = vrot.slane %v19388_v30, 1  ;;  %v1055_v52 = vrot.slane %v19391_v63, 7  ;;  %v19178_v13 = vshll.u32 %v15379_v43, 16  ;;  %19392 = vst [vmem:[#allocation87_spill] sm:$0xff] %v15800_v9  ;;  %1747 = vrot.lane.b32.xlu1 %v1480_v7, %s14829_s28  ;;  %1745 = vrot.lane.b32.xlu0 %v1479_v37, %s14829_s28 }
  0xd0   : > { %v1302_v12 = vrot.slane %v19390_v1, 1  ;;  %v19393_v32 = vshrl.u32 %v15391_v31, 16  ;;  %v19394_v11 = vshll.u32 %v15018_v17, 16  ;;  %v19179_v63 = vshll.u32 %v15391_v31, 16 }
  0xd1   : > { %v15810_v1 = vor.u32 %v19178_v13, %v1055_v52  ;;  %v1482_v35 = vsel %vm15575_vm3, %v1301_v53, 0  ;;  %v19395_v30 = vshrl.u32 %v15008_v15, 16  ;;  %v19396_v14 = vshll.u32 %v15023_v18, 16  ;;  %v15822_v9 = vpop.permute.xlu1 %1571 }
  0xd2   : > { %v1048_v5 = vrot.slane %v19393_v32, 7  ;;  %v1308_v8 = vrot.slane %v19394_v11, 1  ;;  %v1481_v32 = vsel %vm15575_vm3, %v1299_v47, 0  ;;  %19397 = vst [vmem:[#allocation88_spill] sm:$0xff] %v15822_v9  ;;  %v19398_v52 = vshrl.u32 %v15013_v16, 16 }
  0xd3   : > { %v1305_v7 = vor.u32 %v1304_v6, %v19395_v30  ;;  %v1306_v11 = vrot.slane %v19396_v14, 1  ;;  %v19399_v53 = vshrl.u32 %v15408_v44, 16  ;;  %v19180_v47 = vshll.u32 %v15408_v44, 16  ;;  %v15834_v6 = vpop.permute.xlu0 %1569  ;;  %1751 = vrot.lane.b32.xlu1 %v1482_v35, %s14829_s28  ;;  %1749 = vrot.lane.b32.xlu0 %v1481_v32, %s14829_s28 }
  0xd4   : > { %v1303_v13 = vor.u32 %v1302_v12, %v19398_v52  ;;  %v15828_v37 = vor.u32 %v19179_v63, %v1048_v5  ;;  %v19182_v15 = vshrl.u32 %v15446_v61, 16  ;;  %19400 = vst [vmem:[#allocation89_spill] sm:$0xff] %v15834_v6  ;;  %v19401_v14 = vshrl.u32 %v15418_v40, 16 }
  0xd5   : > { %v1069_v10 = vrot.slane %v19399_v53, 7  ;;  %v19402_v16 = vshrl.u32 %v15018_v17, 16  ;;  %v19181_v52 = vshll.u32 %v15418_v40, 16  ;;  %v1484_v53 = vsel %vm15575_vm3, %v1305_v7, 0 }
  0xd6   : > { %v1062_v30 = vrot.slane %v19401_v14, 7  ;;  %v19403_v14 = vshrl.u32 %v15023_v18, 16  ;;  %v19404_v9 = vshll.u32 %v15028_v19, 16  ;;  %v19405_v17 = vshll.u32 %v15033_v20, 16 }
  0xd7   : > { %v1309_v12 = vor.u32 %v1308_v8, %v19402_v16  ;;  %v15844_v5 = vor.u32 %v19180_v47, %v1069_v10  ;;  %v15856_v16 = vpop.permute.xlu1 %1575  ;;  %v1483_v10 = vsel %vm15575_vm3, %v1303_v13, 0  ;;  %v19407_v7 = vshrl.u32 %v15438_v39, 16  ;;  %1755 = vrot.lane.b32.xlu1 %v1484_v53, %s14829_s28 }
  0xd8   : > { %v1307_v63 = vor.u32 %v1306_v11, %v19403_v14  ;;  %v1312_v35 = vrot.slane %v19404_v9, 1  ;;  %v1310_v8 = vrot.slane %v19405_v17, 1  ;;  %19406 = vst [vmem:[#allocation90_spill] sm:$0xff] %v15856_v16  ;;  %v15862_v32 = vor.u32 %v19181_v52, %v1062_v30  ;;  %v15868_v9 = vpop.permute.xlu0 %1573  ;;  %1753 = vrot.lane.b32.xlu0 %v1483_v10, %s14829_s28 }
  0xd9   : > { %v1083_v47 = vrot.slane %v19407_v7, 7  ;;  %v19183_v18 = vshll.u32 %v15438_v39, 16  ;;  %19408 = vst [vmem:[#allocation91_spill] sm:$0xff] %v15868_v9  ;;  %v1076_v14 = vrot.slane %v19182_v15, 7  ;;  %v1486_v13 = vsel %vm15575_vm3, %v1309_v12, 0  ;;  %v19430_v39 = vld [vmem:[#allocation8_spill] sm:$0xff] }
  0xda   : > { %v19184_v7 = vshll.u32 %v15446_v61, 16  ;;  %v1485_v52 = vsel %vm15575_vm3, %v1307_v63, 0  ;;  %v19409_v15 = vshrl.u32 %v15028_v19, 16  ;;  %v19410_v17 = vshrl.u32 %v15033_v20, 16 }
  0xdb   : > { %v15878_v30 = vor.u32 %v19183_v18, %v1083_v47  ;;  %v19411_v9 = vshll.u32 %v15038_v21, 16  ;;  %v15890_v16 = vpop.permute.xlu1 %1579  ;;  %v19413_v47 = vshll.u32 %v15043_v22, 16  ;;  %v19414_v63 = vshrl.u32 %v15465_v49, 16  ;;  %1759 = vrot.lane.b32.xlu1 %v1486_v13, %s14829_s28 }
  0xdc   : > { %v1313_v11 = vor.u32 %v1312_v35, %v19409_v15  ;;  %v1311_v53 = vor.u32 %v1310_v8, %v19410_v17  ;;  %19412 = vst [vmem:[#allocation92_spill] sm:$0xff] %v15890_v16  ;;  %v15896_v10 = vor.u32 %v19184_v7, %v1076_v14  ;;  %v19187_v19 = vshll.u32 %v15465_v49, 16  ;;  %v15902_v15 = vpop.permute.xlu0 %1577  ;;  %v19417_v17 = vld [vmem:[#allocation6_spill] sm:$0xff]  ;;  %1757 = vrot.lane.b32.xlu0 %v1485_v52, %s14829_s28 }
  0xdd   : > { %v1316_v12 = vrot.slane %v19411_v9, 1  ;;  %v1314_v18 = vrot.slane %v19413_v47, 1  ;;  %v1097_v6 = vrot.slane %v19414_v63, 7  ;;  %19415 = vst [vmem:[#allocation93_spill] sm:$0xff] %v15902_v15  ;;  %v19416_v35 = vshrl.u32 %v15474_v33, 16  ;;  %v19420_v15 = vld [vmem:[#allocation7_spill] sm:$0xff] }
  0xde   : > { %v19418_v47 = vshll.u32 %v19417_v17, 16  ;;  %v19192_v63 = vshll.u32 %v15474_v33, 16  ;;  %v1488_v20 = vsel %vm15575_vm3, %v1313_v11, 0  ;;  %v19419_v9 = vshrl.u32 %v15038_v21, 16 }
  0xdf   : > { %v1090_v8 = vrot.slane %v19416_v35, 7  ;;  %v15912_v7 = vor.u32 %v19187_v19, %v1097_v6  ;;  %v1487_v35 = vsel %vm15575_vm3, %v1311_v53, 0  ;;  %v19421_v16 = vshll.u32 %v19420_v15, 16  ;;  %v15924_v61 = vpop.permute.xlu1 %1583  ;;  %1763 = vrot.lane.b32.xlu1 %v1488_v20, %s14829_s28 }
  0xe0   : > { %v1320_v14 = vrot.slane %v19418_v47, 1  ;;  %v1317_v13 = vor.u32 %v1316_v12, %v19419_v9  ;;  %19422 = vst [vmem:[#allocation6_spill] sm:$0xff] %v15924_v61  ;;  %v19423_v6 = vshrl.u32 %v15043_v22, 16  ;;  %v19424_v11 = vshrl.u32 %v15493_v54, 16  ;;  %v15936_v12 = vpop.permute.xlu0 %1581  ;;  %v19427_v61 = vld [vmem:[#allocation70_spill] sm:$0xff]  ;;  %1761 = vrot.lane.b32.xlu0 %v1487_v35, %s14829_s28 }
  0xe1   : > { %v1318_v47 = vrot.slane %v19421_v16, 1  ;;  %v15930_v52 = vor.u32 %v19192_v63, %v1090_v8  ;;  %v19193_v53 = vshll.u32 %v15493_v54, 16  ;;  %19425 = vst [vmem:[#allocation7_spill] sm:$0xff] %v15936_v12  ;;  %v19426_v16 = vshrl.u32 %v15499_v48, 16  ;;  %v19432_v12 = vld [vmem:[#allocation9_spill] sm:$0xff] }
  0xe2   : > { %v1315_v19 = vor.u32 %v1314_v18, %v19423_v6  ;;  %v1111_v49 = vrot.slane %v19424_v11, 7  ;;  %v19428_v22 = vshrl.u32 %v19417_v17, 16  ;;  %v19194_v6 = vshll.u32 %v15499_v48, 16  ;;  %v19443_v48 = vld [vmem:[#allocation10_spill] sm:$0xff] }
  0xe3   : > { %v1104_v9 = vrot.slane %v19426_v16, 7  ;;  %v1490_v11 = vsel %vm15575_vm3, %v1317_v13, 0  ;;  %v19429_v16 = vshrl.u32 %v19420_v15, 16  ;;  %v19431_v21 = vshll.u32 %v19430_v39, 16 }
  0xe4   : > { %v1321_v18 = vor.u32 %v1320_v14, %v19428_v22  ;;  %v15946_v8 = vor.u32 %v19193_v53, %v1111_v49  ;;  %v19433_v17 = vshll.u32 %v19432_v12, 16  ;;  %v15958_v22 = vpop.permute.xlu1 %1587  ;;  %v1489_v49 = vsel %vm15575_vm3, %v1315_v19, 0  ;;  %1767 = vrot.lane.b32.xlu1 %v1490_v11, %s14829_s28 }
  0xe5   : > { %v1319_v63 = vor.u32 %v1318_v47, %v19429_v16  ;;  %v1324_v20 = vrot.slane %v19431_v21, 1  ;;  %19434 = vst [vmem:[#allocation8_spill] sm:$0xff] %v15958_v22  ;;  %v15964_v35 = vor.u32 %v19194_v6, %v1104_v9  ;;  %v19436_v13 = vshrl.u32 %v15523_v41, 16  ;;  %v19437_v47 = vld [vmem:[#allocation72_spill] sm:$0xff]  ;;  %v15970_v16 = vpop.permute.xlu0 %1585  ;;  %1765 = vrot.lane.b32.xlu0 %v1489_v49, %s14829_s28 }
  0xe6   : > { %v1322_v14 = vrot.slane %v19433_v17, 1  ;;  %v19201_v15 = vshll.u32 %v15523_v41, 16  ;;  %19438 = vst [vmem:[#allocation72_spill] sm:$0xff] %v15970_v16  ;;  %v19439_v17 = vshrl.u32 %v15537_v46, 16  ;;  %v1492_v19 = vsel %vm15575_vm3, %v1321_v18, 0 }
  0xe7   : > { %19435 = vst [vmem:[#allocation9_spill] sm:$0xff] %v15964_v35  ;;  %v1125_v53 = vrot.slane %v19436_v13, 7  ;;  %v19204_v13 = vshll.u32 %v15537_v46, 16  ;;  %v1491_v6 = vsel %vm15575_vm3, %v1319_v63, 0  ;;  %v19441_v21 = vshrl.u32 %v19430_v39, 16 }
  0xe8   : > { %v1118_v22 = vrot.slane %v19439_v17, 7  ;;  %v19442_v16 = vshrl.u32 %v19432_v12, 16  ;;  %v19444_v54 = vshll.u32 %v19443_v48, 16  ;;  %v15991_v33 = vpop.permute.xlu1 %1591  ;;  %v19449_v63 = vshrl.u32 %v19427_v61, 16  ;;  %1771 = vrot.lane.b32.xlu1 %v1492_v19, %s14829_s28 }
  0xe9   : > { %v15979_v9 = vor.u32 %v19201_v15, %v1125_v53  ;;  %v1325_v17 = vor.u32 %v1324_v20, %v19441_v21  ;;  %19445 = vst [vmem:[#allocation10_spill] sm:$0xff] %v15991_v33  ;;  %v19446_v53 = vld [vmem:[#allocation11_spill] sm:$0xff]  ;;  %v19208_v39 = vshll.u32 %v19427_v61, 16  ;;  %v19453_v20 = vshrl.u32 %v19437_v47, 16  ;;  %1769 = vrot.lane.b32.xlu0 %v1491_v6, %s14829_s28  ;;  %v19458_v33 = vld [vmem:[#allocation12_spill] sm:$0xff] }
  0xea   : > { %v1323_v11 = vor.u32 %v1322_v14, %v19442_v16  ;;  %v1328_v18 = vrot.slane %v19444_v54, 1  ;;  %v19447_v15 = vshll.u32 %v19446_v53, 16  ;;  %v15997_v49 = vor.u32 %v19204_v13, %v1118_v22  ;;  %v16008_v54 = vpop.permute.xlu0 %1589  ;;  %v19454_v22 = vld [vmem:[#allocation56_spill] sm:$0xff]  ;;  %v19461_v16 = vld [vmem:[#allocation13_spill] sm:$0xff] }
  0xeb   : > { %19440 = vst [vmem:[#allocation94_spill] sm:$0xff] %v15979_v9  ;;  %v1139_v9 = vrot.slane %v19449_v63, 7  ;;  %19452 = vst [vmem:[#allocation95_spill] sm:$0xff] %v16008_v54  ;;  %v1132_v14 = vrot.slane %v19453_v20, 7  ;;  %v19456_v63 = vld [vmem:[#allocation57_spill] sm:$0xff]  ;;  %v1494_v20 = vsel %vm15575_vm3, %v1325_v17, 0 }
  0xec   : > { %v1326_v41 = vrot.slane %v19447_v15, 1  ;;  %19448 = vst [vmem:[#allocation11_spill] sm:$0xff] %v15997_v49  ;;  %v1241_v15 = vsel %vm16004_vm6, 0, %v19454_v22  ;;  %v1240_v13 = vsel %vm16004_vm6, 0, %v19456_v63  ;;  %v19457_v19 = vshrl.u32 %v19443_v48, 16  ;;  %v1596_v61 = vpop.permute.xlu1 %1595  ;;  %1775 = vrot.lane.b32.xlu1 %v1494_v20, %s14829_s28 }
  0xed   : > { %v16018_v21 = vor.u32 %v19208_v39, %v1139_v9  ;;  %v19459_v22 = vshll.u32 %v19458_v33, 16  ;;  %v1493_v9 = vsel %vm15575_vm3, %v1323_v11, 0  ;;  %v19460_v39 = vshrl.u32 %v19446_v53, 16  ;;  %v19465_v11 = vld [vmem:[#allocation60_spill] sm:$0xff]  ;;  %v19466_v53 = vld [vmem:[#allocation62_spill] sm:$0xff] }
  0xee   : > { %v1329_v54 = vor.u32 %v1328_v18, %v19457_v19  ;;  %v19463_v63 = vshll.u32 %v19437_v47, 16  ;;  %v16042_v48 = vsel %vm1853_vm7, %v1241_v15, %v1596_v61  ;;  %v1594_v17 = vpop.permute.xlu0 %1593  ;;  %1773 = vrot.lane.b32.xlu0 %v1493_v9, %s14829_s28 }
  0xef   : > { %19455 = vst [vmem:[#allocation56_spill] sm:$0xff] %v16018_v21  ;;  %v1332_v46 = vrot.slane %v19459_v22, 1  ;;  %v1327_v6 = vor.u32 %v1326_v41, %v19460_v39  ;;  %v19462_v21 = vshll.u32 %v19461_v16, 16  ;;  %v16045_v18 = vsel %vm1853_vm7, %v1240_v13, %v1594_v17  ;;  %v19468_v13 = vld [vmem:[#allocation14_spill] sm:$0xff]  ;;  %v19471_v17 = vld [vmem:[#allocation15_spill] sm:$0xff] }
  0xf0   : > { %v16039_v35 = vor.u32 %v19463_v63, %v1132_v14  ;;  %19464 = vst [vmem:[#allocation57_spill] sm:$0xff] %v16045_v18  ;;  %v1243_v41 = vsel %vm16004_vm6, 0, %v19465_v11  ;;  %v1242_v39 = vsel %vm16004_vm6, 0, %v19466_v53  ;;  %v1496_v61 = vsel %vm15575_vm3, %v1329_v54, 0  ;;  %v1600_v20 = vpop.permute.xlu1 %1599 }
  0xf1   : > { %v1330_v49 = vrot.slane %v19462_v21, 1  ;;  %v19467_v14 = vshrl.u32 %v19458_v33, 16  ;;  %v19469_v21 = vshll.u32 %v19468_v13, 16  ;;  %v1495_v22 = vsel %vm15575_vm3, %v1327_v6, 0  ;;  %1779 = vrot.lane.b32.xlu1 %v1496_v61, %s14829_s28 }
  0xf2   : > { %v19470_v63 = vshrl.u32 %v19461_v16, 16  ;;  %v19472_v11 = vshll.u32 %v19471_v17, 16  ;;  %v16068_v53 = vsel %vm1853_vm7, %v1243_v41, %v1600_v20  ;;  %v1598_v54 = vpop.permute.xlu0 %1597  ;;  %1777 = vrot.lane.b32.xlu0 %v1495_v22, %s14829_s28  ;;  %v19476_v16 = vld [vmem:[#allocation69_spill] sm:$0xff]  ;;  %v19477_v41 = vshrl.u32 %v19468_v13, 16 }
  0xf3   : > { %v1333_v15 = vor.u32 %v1332_v46, %v19467_v14  ;;  %v1336_v19 = vrot.slane %v19469_v21, 1  ;;  %19473 = vst [vmem:[#allocation12_spill] sm:$0xff] %v16068_v53  ;;  %v16071_v33 = vsel %vm1853_vm7, %v1242_v39, %v1598_v54  ;;  %v19475_v46 = vld [vmem:[#allocation65_spill] sm:$0xff]  ;;  %v19478_v39 = vld [vmem:[#allocation18_spill] sm:$0xff]  ;;  %v19480_v54 = vshrl.u32 %v19471_v17, 16 }
  0xf4   : > { %v1331_v9 = vor.u32 %v1330_v49, %v19470_v63  ;;  %v1334_v18 = vrot.slane %v19472_v11, 1  ;;  %19474 = vst [vmem:[#allocation13_spill] sm:$0xff] %v16071_v33  ;;  %v1245_v14 = vsel %vm16004_vm6, 0, %v19475_v46  ;;  %v1244_v49 = vsel %vm16004_vm6, 0, %v19476_v16  ;;  %v1604_v61 = vpop.permute.xlu1 %1603  ;;  %v19481_v46 = vld [vmem:[#allocation19_spill] sm:$0xff] }
  0xf5   : > { %v1498_v6 = vsel %vm15575_vm3, %v1333_v15, 0  ;;  %v1337_v21 = vor.u32 %v1336_v19, %v19477_v41  ;;  %v19479_v20 = vshll.u32 %v19478_v39, 16  ;;  %v19482_v33 = vshll.u32 %v19481_v46, 16  ;;  %v19485_v19 = vld [vmem:[#allocation71_spill] sm:$0xff] }
  0xf6   : > { %v1497_v11 = vsel %vm15575_vm3, %v1331_v9, 0  ;;  %v1335_v22 = vor.u32 %v1334_v18, %v19480_v54  ;;  %v16094_v16 = vsel %vm1853_vm7, %v1245_v14, %v1604_v61  ;;  %v1602_v15 = vpop.permute.xlu0 %1601  ;;  %1783 = vrot.lane.b32.xlu1 %v1498_v6, %s14829_s28  ;;  %v1247_v41 = vsel %vm16004_vm6, 0, %v19485_v19  ;;  %v19486_v9 = vld [vmem:[#allocation74_spill] sm:$0xff]  ;;  %v19491_v19 = vld [vmem:[#allocation24_spill] sm:$0xff] }
  0xf7   : > { %v1340_v63 = vrot.slane %v19479_v20, 1  ;;  %v1338_v53 = vrot.slane %v19482_v33, 1  ;;  %19483 = vst [vmem:[#allocation60_spill] sm:$0xff] %v16094_v16  ;;  %v16097_v13 = vsel %vm1853_vm7, %v1244_v49, %v1602_v15  ;;  %1781 = vrot.lane.b32.xlu0 %v1497_v11, %s14829_s28  ;;  %v1246_v18 = vsel %vm16004_vm6, 0, %v19486_v9  ;;  %v19488_v49 = vld [vmem:[#allocation22_spill] sm:$0xff] }
  0xf8   : > { %19484 = vst [vmem:[#allocation62_spill] sm:$0xff] %v16097_v13  ;;  %v1500_v17 = vsel %vm15575_vm3, %v1337_v21, 0  ;;  %v19487_v33 = vshrl.u32 %v19478_v39, 16  ;;  %v19489_v20 = vshll.u32 %v19488_v49, 16  ;;  %v1608_v6 = vpop.permute.xlu1 %1607  ;;  %v1499_v54 = vsel %vm15575_vm3, %v1335_v22, 0 }
  0xf9   : > { %v19490_v15 = vshrl.u32 %v19481_v46, 16  ;;  %v19492_v13 = vshll.u32 %v19491_v19, 16  ;;  %v16120_v9 = vsel %vm1853_vm7, %v1247_v41, %v1608_v6  ;;  %v19493_v46 = vshrl.u32 %v19488_v49, 16  ;;  %v19494_v41 = vld [vmem:[#allocation27_spill] sm:$0xff] }
  0xfa   : > { %v1341_v14 = vor.u32 %v1340_v63, %v19487_v33  ;;  %v1344_v61 = vrot.slane %v19489_v20, 1  ;;  %v1606_v21 = vpop.permute.xlu0 %1605  ;;  %1787 = vrot.lane.b32.xlu1 %v1500_v17, %s14829_s28  ;;  %v1249_v63 = vsel %vm16004_vm6, 0, %v15618_v23  ;;  %v19496_v23 = vshrl.u32 %v19491_v19, 16 }
  0xfb   : > { %v1339_v11 = vor.u32 %v1338_v53, %v19490_v15  ;;  %v1342_v16 = vrot.slane %v19492_v13, 1  ;;  %v16123_v39 = vsel %vm1853_vm7, %v1246_v18, %v1606_v21  ;;  %1785 = vrot.lane.b32.xlu0 %v1499_v54, %s14829_s28  ;;  %v1248_v53 = vsel %vm16004_vm6, 0, %v15624_v50  ;;  %v19497_v54 = vld [vmem:[#allocation29_spill] sm:$0xff] }
  0xfc   : > { %v1502_v22 = vsel %vm15575_vm3, %v1341_v14, 0  ;;  %v1345_v13 = vor.u32 %v1344_v61, %v19493_v46  ;;  %v19495_v18 = vshll.u32 %v19494_v41, 16  ;;  %v1612_v17 = vpop.permute.xlu1 %1611  ;;  %v19498_v15 = vshll.u32 %v19497_v54, 16 }
  0xfd   : > { %v1501_v20 = vsel %vm15575_vm3, %v1339_v11, 0  ;;  %v1343_v6 = vor.u32 %v1342_v16, %v19496_v23  ;;  %v16146_v50 = vsel %vm1853_vm7, %v1249_v63, %v1612_v17  ;;  %v1251_v61 = vsel %vm16004_vm6, 0, %v15640_v28 }
  0xfe   : > { %v1348_v33 = vrot.slane %v19495_v18, 1  ;;  %v1346_v21 = vrot.slane %v19498_v15, 1  ;;  %v1610_v14 = vpop.permute.xlu0 %1609  ;;  %1791 = vrot.lane.b32.xlu1 %v1502_v22, %s14829_s28  ;;  %v1250_v16 = vsel %vm16004_vm6, 0, %v15658_v27  ;;  %v1504_v11 = vsel %vm15575_vm3, %v1345_v13, 0 }
  0xff   : > { %v16149_v49 = vsel %vm1853_vm7, %v1248_v53, %v1610_v14  ;;  %1789 = vrot.lane.b32.xlu0 %v1501_v20, %s14829_s28  ;;  %v19499_v19 = vshrl.u32 %v19494_v41, 16  ;;  %v19500_v53 = vshll.u32 %v15209_v59, 16  ;;  %v1503_v18 = vsel %vm15575_vm3, %v1343_v6, 0 }
 0x100   : > { %v1616_v22 = vpop.permute.xlu1 %1615  ;;  %v19501_v28 = vshrl.u32 %v19497_v54, 16  ;;  %v19502_v20 = vshll.u32 %v15222_v55, 16  ;;  %v1252_v6 = vsel %vm16004_vm6, 0, %v15692_v3  ;;  %v19503_v15 = vshrl.u32 %v15209_v59, 16 }
 0x101   : > { %v1349_v63 = vor.u32 %v1348_v33, %v19499_v19  ;;  %v1352_v46 = vrot.slane %v19500_v53, 1  ;;  %v16172_v27 = vsel %vm1853_vm7, %v1251_v61, %v1616_v22  ;;  %v1253_v33 = vsel %vm16004_vm6, 0, %v15674_v0 }
 0x102   : > { %v1347_v17 = vor.u32 %v1346_v21, %v19501_v28  ;;  %v1350_v23 = vrot.slane %v19502_v20, 1  ;;  %v1614_v13 = vpop.permute.xlu0 %1613  ;;  %1795 = vrot.lane.b32.xlu1 %v1504_v11, %s14829_s28  ;;  %v19504_v14 = vshll.u32 %v15240_v34, 16  ;;  %v19505_v0 = vshrl.u32 %v15222_v55, 16 }
 0x103   : > { %v16175_v41 = vsel %vm1853_vm7, %v1250_v16, %v1614_v13  ;;  %1793 = vrot.lane.b32.xlu0 %v1503_v18, %s14829_s28  ;;  %v1506_v54 = vsel %vm15575_vm3, %v1349_v63, 0  ;;  %v1353_v21 = vor.u32 %v1352_v46, %v19503_v15  ;;  %v19506_v53 = vshll.u32 %v15246_v56, 16 }
 0x104   : > { %v1356_v61 = vrot.slane %v19504_v14, 1  ;;  %v1620_v16 = vpop.permute.xlu1 %1619  ;;  %v1505_v11 = vsel %vm15575_vm3, %v1347_v17, 0  ;;  %v1351_v19 = vor.u32 %v1350_v23, %v19505_v0  ;;  %v1255_v46 = vsel %vm16004_vm6, 0, %v15708_v4 }
 0x105   : > { %v1354_v22 = vrot.slane %v19506_v53, 1  ;;  %v16198_v3 = vsel %vm1853_vm7, %v1253_v33, %v1620_v16  ;;  %v1254_v55 = vsel %vm16004_vm6, 0, %v15726_v2  ;;  %v1508_v18 = vsel %vm15575_vm3, %v1353_v21, 0 }
 0x106   : > { %v1618_v63 = vpop.permute.xlu0 %1617  ;;  %1799 = vrot.lane.b32.xlu1 %v1506_v54, %s14829_s28  ;;  %v19507_v28 = vshrl.u32 %v15240_v34, 16  ;;  %v19508_v20 = vshll.u32 %v15267_v38, 16  ;;  %v1507_v33 = vsel %vm15575_vm3, %v1351_v19, 0  ;;  %v19509_v4 = vshrl.u32 %v15246_v56, 16 }
 0x107   : > { %v16201_v59 = vsel %vm1853_vm7, %v1252_v6, %v1618_v63  ;;  %1797 = vrot.lane.b32.xlu0 %v1505_v11, %s14829_s28  ;;  %v19510_v54 = vshll.u32 %v15276_v58, 16  ;;  %v1257_v14 = vsel %vm16004_vm6, 0, %v15742_v60  ;;  %v1256_v56 = vsel %vm16004_vm6, 0, %v15760_v25 }
 0x108   : > { %v1357_v17 = vor.u32 %v1356_v61, %v19507_v28  ;;  %v1360_v23 = vrot.slane %v19508_v20, 1  ;;  %v1624_v13 = vpop.permute.xlu1 %1623  ;;  %v1355_v6 = vor.u32 %v1354_v22, %v19509_v4  ;;  %v19511_v16 = vshrl.u32 %v15267_v38, 16 }
 0x109   : > { %v1358_v15 = vrot.slane %v19510_v54, 1  ;;  %v16224_v2 = vsel %vm1853_vm7, %v1255_v46, %v1624_v13  ;;  %v19512_v0 = vshll.u32 %v15295_v29, 16  ;;  %v19513_v60 = vshrl.u32 %v15276_v58, 16 }
 0x10a   : > { %v1622_v21 = vpop.permute.xlu0 %1621  ;;  %1803 = vrot.lane.b32.xlu1 %v1508_v18, %s14829_s28  ;;  %v1510_v61 = vsel %vm15575_vm3, %v1357_v17, 0  ;;  %v1361_v11 = vor.u32 %v1360_v23, %v19511_v16  ;;  %v1509_v22 = vsel %vm15575_vm3, %v1355_v6, 0  ;;  %v19514_v46 = vshll.u32 %v15302_v57, 16 }
 0x10b   : > { %v16227_v34 = vsel %vm1853_vm7, %v1254_v55, %v1622_v21  ;;  %1801 = vrot.lane.b32.xlu0 %v1507_v33, %s14829_s28  ;;  %v1364_v19 = vrot.slane %v19512_v0, 1  ;;  %v1359_v63 = vor.u32 %v1358_v15, %v19513_v60  ;;  %v1259_v28 = vsel %vm16004_vm6, 0, %v15776_v26 }
 0x10c   : > { %v1628_v53 = vpop.permute.xlu1 %1627  ;;  %v1362_v55 = vrot.slane %v19514_v46, 1  ;;  %v1258_v58 = vsel %vm16004_vm6, 0, %v15794_v51  ;;  %v1512_v17 = vsel %vm15575_vm3, %v1361_v11, 0  ;;  %v19515_v20 = vshrl.u32 %v15295_v29, 16 }
 0x10d   : > { %v16250_v25 = vsel %vm1853_vm7, %v1257_v14, %v1628_v53  ;;  %v19516_v13 = vshll.u32 %v15323_v62, 16  ;;  %v1511_v6 = vsel %vm15575_vm3, %v1359_v63, 0  ;;  %v19517_v26 = vshrl.u32 %v15302_v57, 16 }
 0x10e   : > { %v1626_v18 = vpop.permute.xlu0 %1625  ;;  %1807 = vrot.lane.b32.xlu1 %v1510_v61, %s14829_s28  ;;  %v1365_v23 = vor.u32 %v1364_v19, %v19515_v20  ;;  %v19518_v15 = vshll.u32 %v15332_v45, 16  ;;  %v1260_v57 = vsel %vm16004_vm6, 0, %v15828_v37  ;;  %v19519_v16 = vshrl.u32 %v15323_v62, 16 }
 0x10f   : > { %v16253_v38 = vsel %vm1853_vm7, %v1256_v56, %v1626_v18  ;;  %1805 = vrot.lane.b32.xlu0 %v1509_v22, %s14829_s28  ;;  %v1368_v33 = vrot.slane %v19516_v13, 1  ;;  %v1363_v54 = vor.u32 %v1362_v55, %v19517_v26  ;;  %v1261_v56 = vsel %vm16004_vm6, 0, %v15810_v1 }
 0x110   : > { %v1632_v4 = vpop.permute.xlu1 %1631  ;;  %v1366_v21 = vrot.slane %v19518_v15, 1  ;;  %v1514_v61 = vsel %vm15575_vm3, %v1365_v23, 0  ;;  %v19520_v0 = vshll.u32 %v15349_v42, 16  ;;  %v19521_v1 = vshrl.u32 %v15332_v45, 16 }
 0x111   : > { %v16276_v51 = vsel %vm1853_vm7, %v1259_v28, %v1632_v4  ;;  %v1369_v11 = vor.u32 %v1368_v33, %v19519_v16  ;;  %v1513_v22 = vsel %vm15575_vm3, %v1363_v54, 0  ;;  %v19522_v63 = vshll.u32 %v15361_v36, 16 }
 0x112   : > { %v1630_v14 = vpop.permute.xlu0 %1629  ;;  %1811 = vrot.lane.b32.xlu1 %v1512_v17, %s14829_s28  ;;  %v1372_v19 = vrot.slane %v19520_v0, 1  ;;  %v1367_v60 = vor.u32 %v1366_v21, %v19521_v1  ;;  %v1263_v18 = vsel %vm16004_vm6, 0, %v15844_v5  ;;  %v1262_v45 = vsel %vm16004_vm6, 0, %v15862_v32 }
 0x113   : > { %v16279_v29 = vsel %vm1853_vm7, %v1258_v58, %v1630_v14  ;;  %1809 = vrot.lane.b32.xlu0 %v1511_v6, %s14829_s28  ;;  %v1370_v46 = vrot.slane %v19522_v63, 1  ;;  %v1516_v28 = vsel %vm15575_vm3, %v1369_v11, 0  ;;  %v19523_v58 = vshrl.u32 %v15349_v42, 16 }
 0x114   : > { %v1636_v53 = vpop.permute.xlu1 %1635  ;;  %v19524_v20 = vshll.u32 %v15379_v43, 16  ;;  %v1515_v33 = vsel %vm15575_vm3, %v1367_v60, 0  ;;  %v19525_v5 = vshrl.u32 %v15361_v36, 16  ;;  %v19526_v6 = vshll.u32 %v15391_v31, 16 }
 0x115   : > { %v16302_v37 = vsel %vm1853_vm7, %v1261_v56, %v1636_v53  ;;  %v1373_v17 = vor.u32 %v1372_v19, %v19523_v58  ;;  %v1265_v15 = vsel %vm16004_vm6, 0, %v15878_v30  ;;  %v1264_v36 = vsel %vm16004_vm6, 0, %v15896_v10 }
 0x116   : > { %v1634_v55 = vpop.permute.xlu0 %1633  ;;  %1815 = vrot.lane.b32.xlu1 %v1514_v61, %s14829_s28  ;;  %v1376_v23 = vrot.slane %v19524_v20, 1  ;;  %v1371_v4 = vor.u32 %v1370_v46, %v19525_v5  ;;  %v1374_v26 = vrot.slane %v19526_v6, 1  ;;  %v19527_v14 = vshrl.u32 %v15379_v43, 16  ;;  %v19535_v20 = vld [vmem:[#allocation51_spill] sm:$0xff] }
 0x117   : > { %v16305_v62 = vsel %vm1853_vm7, %v1260_v57, %v1634_v55  ;;  %1813 = vrot.lane.b32.xlu0 %v1513_v22, %s14829_s28  ;;  %v1518_v21 = vsel %vm15575_vm3, %v1373_v17, 0  ;;  %v19528_v57 = vshll.u32 %v15408_v44, 16  ;;  %v19529_v30 = vshrl.u32 %v15391_v31, 16  ;;  %v19532_v55 = vld [vmem:[#allocation50_spill] sm:$0xff] }
 0x118   : > { %v1640_v13 = vpop.permute.xlu1 %1639  ;;  %v1377_v56 = vor.u32 %v1376_v23, %v19527_v14  ;;  %v1517_v11 = vsel %vm15575_vm3, %v1371_v4, 0  ;;  %v19530_v19 = vshll.u32 %v15418_v40, 16  ;;  %v1267_v1 = vsel %vm16004_vm6, 0, %v15912_v7 }
 0x119   : > { %v16328_v32 = vsel %vm1853_vm7, %v1263_v18, %v1640_v13  ;;  %v1380_v61 = vrot.slane %v19528_v57, 1  ;;  %v1375_v0 = vor.u32 %v1374_v26, %v19529_v30  ;;  %v1266_v31 = vsel %vm16004_vm6, 0, %v15930_v52 }
 0x11a   : > { %v1638_v54 = vpop.permute.xlu0 %1637  ;;  %1819 = vrot.lane.b32.xlu1 %v1516_v28, %s14829_s28  ;;  %v1378_v53 = vrot.slane %v19530_v19, 1  ;;  %v1520_v60 = vsel %vm15575_vm3, %v1377_v56, 0  ;;  %v19531_v63 = vshrl.u32 %v15408_v44, 16  ;;  %v19533_v18 = vshll.u32 %v19532_v55, 16 }
 0x11b   : > { %v16331_v42 = vsel %vm1853_vm7, %v1262_v45, %v1638_v54  ;;  %1817 = vrot.lane.b32.xlu0 %v1515_v33, %s14829_s28  ;;  %v1519_v58 = vsel %vm15575_vm3, %v1375_v0, 0  ;;  %v19534_v7 = vshrl.u32 %v15418_v40, 16  ;;  %v19536_v23 = vshll.u32 %v19535_v20, 16  ;;  %v19537_v40 = vld [vmem:[#allocation9_spill] sm:$0xff] }
 0x11c   : > { %v1644_v16 = vpop.permute.xlu1 %1643  ;;  %v1381_v46 = vor.u32 %v1380_v61, %v19531_v63  ;;  %v1384_v45 = vrot.slane %v19533_v18, 1  ;;  %v1269_v5 = vsel %vm16004_vm6, 0, %v15946_v8  ;;  %v1268_v4 = vsel %vm16004_vm6, 0, %v19537_v40  ;;  %v19542_v61 = vld [vmem:[#allocation55_spill] sm:$0xff] }
 0x11d   : > { %v16354_v10 = vsel %vm1853_vm7, %v1265_v15, %v1644_v16  ;;  %v1379_v17 = vor.u32 %v1378_v53, %v19534_v7  ;;  %v1382_v13 = vrot.slane %v19536_v23, 1  ;;  %v19538_v26 = vshrl.u32 %v19532_v55, 16  ;;  %v19539_v15 = vld [vmem:[#allocation54_spill] sm:$0xff] }
 0x11e   : > { %v1642_v22 = vpop.permute.xlu0 %1641  ;;  %1823 = vrot.lane.b32.xlu1 %v1518_v21, %s14829_s28  ;;  %v1522_v6 = vsel %vm15575_vm3, %v1381_v46, 0  ;;  %v19541_v8 = vshrl.u32 %v19535_v20, 16  ;;  %v19543_v16 = vshll.u32 %v19542_v61, 16  ;;  %v19544_v53 = vld [vmem:[#allocation94_spill] sm:$0xff]  ;;  %v19546_v63 = vshrl.u32 %v19539_v15, 16  ;;  %v19550_v20 = vld [vmem:[#allocation59_spill] sm:$0xff] }
 0x11f   : > { %v16357_v43 = vsel %vm1853_vm7, %v1264_v36, %v1642_v22  ;;  %1821 = vrot.lane.b32.xlu0 %v1517_v11, %s14829_s28  ;;  %v1385_v54 = vor.u32 %v1384_v45, %v19538_v26  ;;  %v19540_v36 = vshll.u32 %v19539_v15, 16  ;;  %v1521_v56 = vsel %vm15575_vm3, %v1379_v17, 0  ;;  %v19547_v55 = vld [vmem:[#allocation58_spill] sm:$0xff] }
 0x120   : > { %v1648_v28 = vpop.permute.xlu1 %1647  ;;  %v1383_v57 = vor.u32 %v1382_v13, %v19541_v8  ;;  %v1386_v11 = vrot.slane %v19543_v16, 1  ;;  %v1271_v22 = vsel %vm16004_vm6, 0, %v19544_v53  ;;  %v19548_v18 = vshll.u32 %v19547_v55, 16 }
 0x121   : > { %v16380_v52 = vsel %vm1853_vm7, %v1267_v1, %v1648_v28  ;;  %v1388_v21 = vrot.slane %v19540_v36, 1  ;;  %v19545_v1 = vld [vmem:[#allocation11_spill] sm:$0xff]  ;;  %v19549_v7 = vshrl.u32 %v19542_v61, 16  ;;  %v19551_v23 = vshll.u32 %v19550_v20, 16 }
 0x122   : > { %v1646_v33 = vpop.permute.xlu0 %1645  ;;  %1827 = vrot.lane.b32.xlu1 %v1520_v60, %s14829_s28  ;;  %v1524_v60 = vsel %vm15575_vm3, %v1385_v54, 0  ;;  %v1392_v45 = vrot.slane %v19548_v18, 1  ;;  %v1272_v26 = vsel %vm16004_vm6, 0, %v16039_v35  ;;  %v19553_v15 = vshrl.u32 %v19547_v55, 16  ;;  %v19559_v35 = vld [vmem:[#allocation21_spill] sm:$0xff] }
 0x123   : > { %v16383_v44 = vsel %vm1853_vm7, %v1266_v31, %v1646_v33  ;;  %1825 = vrot.lane.b32.xlu0 %v1519_v58, %s14829_s28  ;;  %v1270_v31 = vsel %vm16004_vm6, 0, %v19545_v1  ;;  %v1389_v46 = vor.u32 %v1388_v21, %v19546_v63  ;;  %v1523_v58 = vsel %vm15575_vm3, %v1383_v57, 0  ;;  %v19554_v21 = vld [vmem:[#allocation64_spill] sm:$0xff] }
 0x124   : > { %v1652_v14 = vpop.permute.xlu1 %1651  ;;  %v1387_v17 = vor.u32 %v1386_v11, %v19549_v7  ;;  %v1390_v13 = vrot.slane %v19551_v23, 1  ;;  %v1393_v36 = vor.u32 %v1392_v45, %v19553_v15  ;;  %v19556_v61 = vshrl.u32 %v19550_v20, 16  ;;  %v19557_v11 = vld [vmem:[#allocation66_spill] sm:$0xff] }
 0x125   : > { %v16406_v30 = vsel %vm1853_vm7, %v1269_v5, %v1652_v14  ;;  %v1526_v54 = vsel %vm15575_vm3, %v1389_v46, 0  ;;  %v19555_v14 = vshll.u32 %v19554_v21, 16  ;;  %v19561_v18 = vshrl.u32 %v19554_v21, 16 }
 0x126   : > { %v1650_v0 = vpop.permute.xlu0 %1649  ;;  %1831 = vrot.lane.b32.xlu1 %v1522_v6, %s14829_s28  ;;  %v1525_v57 = vsel %vm15575_vm3, %v1387_v17, 0  ;;  %v1391_v16 = vor.u32 %v1390_v13, %v19556_v61  ;;  %v1528_v55 = vsel %vm15575_vm3, %v1393_v36, 0  ;;  %v19564_v17 = vld [vmem:[#allocation68_spill] sm:$0xff] }
 0x127   : > { %v16409_v19 = vsel %vm1853_vm7, %v1268_v4, %v1650_v0  ;;  %1829 = vrot.lane.b32.xlu0 %v1521_v56, %s14829_s28  ;;  %v19552_v4 = vld [vmem:[#allocation56_spill] sm:$0xff]  ;;  %v1396_v56 = vrot.slane %v19555_v14, 1  ;;  %v19558_v0 = vshll.u32 %v19557_v11, 16 }
 0x128   : > { %v1656_v28 = vpop.permute.xlu1 %1655  ;;  %v1273_v6 = vsel %vm16004_vm6, 0, %v19552_v4  ;;  %v1527_v13 = vsel %vm15575_vm3, %v1391_v16, 0  ;;  %v19568_v36 = vld [vmem:[#allocation20_spill] sm:$0xff] }
 0x129   : > { %v16432_v33 = vsel %vm1853_vm7, %v1271_v22, %v1656_v28  ;;  %v1394_v53 = vrot.slane %v19558_v0, 1  ;;  %v1211_v22 = vsel %vm16004_vm6, 0, %v19559_v35  ;;  %v1397_v45 = vor.u32 %v1396_v56, %v19561_v18  ;;  %v19562_v28 = vld [vmem:[#allocation70_spill] sm:$0xff] }
 0x12a   : > { %v1654_v5 = vpop.permute.xlu0 %1653  ;;  %1835 = vrot.lane.b32.xlu1 %v1524_v60, %s14829_s28  ;;  %v19560_v60 = vld [vmem:[#allocation17_spill] sm:$0xff]  ;;  %v1859_v20 = vsel %vm1853_vm7, %v1211_v22, %v19564_v17  ;;  %v1213_v21 = vsel %vm16004_vm6, 0, %v19568_v36 }
 0x12b   : > { %v16435_v40 = vsel %vm1853_vm7, %v1270_v31, %v1654_v5  ;;  %1833 = vrot.lane.b32.xlu0 %v1523_v58, %s14829_s28  ;;  %v1210_v63 = vsel %vm16004_vm6, 0, %v19560_v60  ;;  %v19563_v58 = vshll.u32 %v19562_v28, 16  ;;  %v19565_v5 = vshrl.u32 %v19557_v11, 16  ;;  %v19575_v17 = vld [vmem:[#allocation25_spill] sm:$0xff] }
 0x12c   : > { %v1660_v8 = vpop.permute.xlu1 %1659  ;;  %v1530_v16 = vsel %vm15575_vm3, %v1397_v45, 0  ;;  %v19570_v11 = vshrl.u32 %v19562_v28, 16  ;;  %v19572_v60 = vshrl.u32 %v19437_v47, 16 }
 0x12d   : > { %v16461_v1 = vsel %vm1853_vm7, %v1273_v6, %v1660_v8  ;;  %v1400_v7 = vrot.slane %v19563_v58, 1  ;;  %v1395_v4 = vor.u32 %v1394_v53, %v19565_v5  ;;  %v19566_v6 = vshll.u32 %v19437_v47, 16  ;;  %v19569_v8 = vld [vmem:[#allocation16_spill] sm:$0xff]  ;;  %v19571_v53 = vld [vmem:[#allocation67_spill] sm:$0xff] }
 0x12e   : > { %v1658_v31 = vpop.permute.xlu0 %1657  ;;  %1839 = vrot.lane.b32.xlu1 %v1526_v54, %s14829_s28  ;;  %v19567_v54 = vld [vmem:[#allocation63_spill] sm:$0xff]  ;;  %v1865_v35 = vsel %vm1853_vm7, %v1213_v21, %v19571_v53  ;;  %v19582_v53 = vld [vmem:[#allocation30_spill] sm:$0xff] }
 0x12f   : > { %v16467_v46 = vsel %vm1853_vm7, %v1272_v26, %v1658_v31  ;;  %1837 = vrot.lane.b32.xlu0 %v1525_v57, %s14829_s28  ;;  %v1398_v26 = vrot.slane %v19566_v6, 1  ;;  %v1856_v15 = vsel %vm1853_vm7, %v1210_v63, %v19567_v54  ;;  %v1212_v57 = vsel %vm16004_vm6, 0, %v19569_v8  ;;  %v19574_v58 = vld [vmem:[#allocation23_spill] sm:$0xff] }
 0x130   : > { %v1728_v23 = vpop.permute.xlu1 %1727  ;;  %v1401_v0 = vor.u32 %v1400_v7, %v19570_v11  ;;  %v1529_v31 = vsel %vm15575_vm3, %v1395_v4, 0  ;;  %v1215_v45 = vsel %vm16004_vm6, 0, %v19574_v58  ;;  %v19581_v11 = vld [vmem:[#allocation77_spill] sm:$0xff] }
 0x131   : > { %v2051_v14 = vsel %vm2046_vm8, %v1859_v20, %v1728_v23  ;;  %v1399_v63 = vor.u32 %v1398_v26, %v19572_v60  ;;  %v1214_v20 = vsel %vm16004_vm6, 0, %v19575_v17  ;;  %v19577_v26 = vld [vmem:[#allocation75_spill] sm:$0xff]  ;;  %v19586_v17 = vld [vmem:[#allocation32_spill] sm:$0xff] }
 0x132   : > { %v1726_v56 = vpop.permute.xlu0 %1725  ;;  %2242 = vst.msk [vmem:[#allocation2 + $0x130] sm:$0xff] %vm2240_vm9, %v2051_v14  ;;  %1843 = vrot.lane.b32.xlu1 %v1528_v55, %s14829_s28  ;;  %v19573_v55 = vld [vmem:[#allocation61_spill] sm:$0xff]  ;;  %v1532_v47 = vsel %vm15575_vm3, %v1401_v0, 0  ;;  %v1868_v54 = vsel %vm1853_vm7, %v1214_v20, %v19577_v26  ;;  %v19583_v60 = vld [vmem:[#allocation31_spill] sm:$0xff]  ;;  %v1221_v20 = vsel %vm16004_vm6, 0, %v19586_v17 }
 0x133   : > { %v2048_v61 = vsel %vm2046_vm8, %v1856_v15, %v1726_v56  ;;  %1841 = vrot.lane.b32.xlu0 %v1527_v13, %s14829_s28  ;;  %v1862_v18 = vsel %vm1853_vm7, %v1212_v57, %v19573_v55  ;;  %v19576_v13 = vld [vmem:[#allocation73_spill] sm:$0xff]  ;;  %v1531_v6 = vsel %vm15575_vm3, %v1399_v63, 0  ;;  %v19578_v15 = vld [vmem:[#allocation26_spill] sm:$0xff]  ;;  %v19579_v56 = vld [vmem:[#allocation28_spill] sm:$0xff]  ;;  %v1218_v63 = vsel %vm16004_vm6, 0, %v19583_v60 }
 0x134   : > { %2241 = vst.msk [vmem:[#allocation2 + $0x128] sm:$0xff] %vm2240_vm9, %v2048_v61  ;;  %v1732_v22 = vpop.permute.xlu1 %1731  ;;  %v1871_v5 = vsel %vm1853_vm7, %v1215_v45, %v19576_v13  ;;  %v1217_v36 = vsel %vm16004_vm6, 0, %v19578_v15  ;;  %v1216_v8 = vsel %vm16004_vm6, 0, %v19579_v56  ;;  %v19587_v13 = vld [vmem:[#allocation33_spill] sm:$0xff] }
 0x135   : > { %v2057_v28 = vsel %vm2046_vm8, %v1865_v35, %v1732_v22  ;;  %v1877_v61 = vsel %vm1853_vm7, %v1217_v36, %v19580_v24  ;;  %v1874_v0 = vsel %vm1853_vm7, %v1216_v8, %v19581_v11  ;;  %v1219_v35 = vsel %vm16004_vm6, 0, %v19582_v53  ;;  %v19589_v15 = vld [vmem:[#allocation81_spill] sm:$0xff]  ;;  %v19593_v53 = vld [vmem:[#allocation83_spill] sm:$0xff] }
 0x136   : > { %v1730_v7 = vpop.permute.xlu0 %1729  ;;  %2244 = vst.msk [vmem:[#allocation2 + $0x140] sm:$0xff] %vm2240_vm9, %v2057_v28  ;;  %1847 = vrot.lane.b32.xlu1 %v1530_v16, %s14829_s28  ;;  %v19585_v28 = vld [vmem:[#allocation79_spill] sm:$0xff]  ;;  %v19597_v17 = vld [vmem:[#allocation85_spill] sm:$0xff] }
 0x137   : > { %v2054_v23 = vsel %vm2046_vm8, %v1862_v18, %v1730_v7  ;;  %1845 = vrot.lane.b32.xlu0 %v1529_v31, %s14829_s28  ;;  %v19584_v18 = vld [vmem:[#allocation78_spill] sm:$0xff]  ;;  %v1880_v7 = vsel %vm1853_vm7, %v1218_v63, %v19585_v28 }
 0x138   : > { %2243 = vst.msk [vmem:[#allocation2 + $0x138] sm:$0xff] %vm2240_vm9, %v2054_v23  ;;  %v1736_v4 = vpop.permute.xlu1 %1735  ;;  %v1883_v58 = vsel %vm1853_vm7, %v1219_v35, %v19584_v18 }
 0x139   : > { %v2063_v21 = vsel %vm2046_vm8, %v1871_v5, %v1736_v4  ;;  %v1220_v5 = vsel %vm16004_vm6, 0, %v19587_v13 }
 0x13a   : > { %v1734_v14 = vpop.permute.xlu0 %1733  ;;  %2246 = vst.msk [vmem:[#allocation2 + $0x150] sm:$0xff] %vm2240_vm9, %v2063_v21  ;;  %1851 = vrot.lane.b32.xlu1 %v1532_v47, %s14829_s28  ;;  %v1886_v36 = vsel %vm1853_vm7, %v1220_v5, %v19589_v15  ;;  %v19590_v21 = vld [vmem:[#allocation34_spill] sm:$0xff] }
 0x13b   : > { %v2060_v57 = vsel %vm2046_vm8, %v1868_v54, %v1734_v14  ;;  %1849 = vrot.lane.b32.xlu0 %v1531_v6, %s14829_s28  ;;  %v19588_v6 = vld [vmem:[#allocation80_spill] sm:$0xff]  ;;  %v1223_v14 = vsel %vm16004_vm6, 0, %v19590_v21  ;;  %v19601_v21 = vld [vmem:[#allocation87_spill] sm:$0xff] }
 0x13c   : > { %2245 = vst.msk [vmem:[#allocation2 + $0x148] sm:$0xff] %vm2240_vm9, %v2060_v57  ;;  %v1740_v16 = vpop.permute.xlu1 %1739  ;;  %v1889_v26 = vsel %vm1853_vm7, %v1221_v20, %v19588_v6  ;;  %v19591_v57 = vld [vmem:[#allocation35_spill] sm:$0xff] }
 0x13d   : > { %v2069_v22 = vsel %vm2046_vm8, %v1877_v61, %v1740_v16  ;;  %v1222_v24 = vsel %vm16004_vm6, 0, %v19591_v57  ;;  %v19592_v16 = vld [vmem:[#allocation82_spill] sm:$0xff] }
 0x13e   : > { %v1738_v31 = vpop.permute.xlu0 %1737  ;;  %2248 = vst.msk [vmem:[#allocation2 + $0x160] sm:$0xff] %vm2240_vm9, %v2069_v22  ;;  %v1895_v11 = vsel %vm1853_vm7, %v1223_v14, %v19592_v16  ;;  %v1892_v35 = vsel %vm1853_vm7, %v1222_v24, %v19593_v53  ;;  %v19594_v22 = vld [vmem:[#allocation36_spill] sm:$0xff] }
 0x13f   : > { %v2066_v55 = vsel %vm2046_vm8, %v1874_v0, %v1738_v31  ;;  %v1225_v31 = vsel %vm16004_vm6, 0, %v19594_v22  ;;  %v19605_v22 = vld [vmem:[#allocation89_spill] sm:$0xff] }
 0x140   : > { %2247 = vst.msk [vmem:[#allocation2 + $0x158] sm:$0xff] %vm2240_vm9, %v2066_v55  ;;  %v1744_v45 = vpop.permute.xlu1 %1743  ;;  %v19595_v55 = vld [vmem:[#allocation37_spill] sm:$0xff] }
 0x141   : > { %v2075_v23 = vsel %vm2046_vm8, %v1883_v58, %v1744_v45  ;;  %v1224_v18 = vsel %vm16004_vm6, 0, %v19595_v55  ;;  %v19596_v45 = vld [vmem:[#allocation84_spill] sm:$0xff] }
 0x142   : > { %v1742_v47 = vpop.permute.xlu0 %1741  ;;  %2250 = vst.msk [vmem:[#allocation2 + $0x170] sm:$0xff] %vm2240_vm9, %v2075_v23  ;;  %v1901_v28 = vsel %vm1853_vm7, %v1225_v31, %v19596_v45  ;;  %v1898_v20 = vsel %vm1853_vm7, %v1224_v18, %v19597_v17  ;;  %v19598_v23 = vld [vmem:[#allocation38_spill] sm:$0xff] }
 0x143   : > { %v2072_v4 = vsel %vm2046_vm8, %v1880_v7, %v1742_v47  ;;  %v1227_v47 = vsel %vm16004_vm6, 0, %v19598_v23  ;;  %v19609_v23 = vld [vmem:[#allocation91_spill] sm:$0xff] }
 0x144   : > { %2249 = vst.msk [vmem:[#allocation2 + $0x168] sm:$0xff] %vm2240_vm9, %v2072_v4  ;;  %v1748_v54 = vpop.permute.xlu1 %1747  ;;  %v19599_v4 = vld [vmem:[#allocation39_spill] sm:$0xff] }
 0x145   : > { %v2081_v56 = vsel %vm2046_vm8, %v1889_v26, %v1748_v54  ;;  %v1226_v6 = vsel %vm16004_vm6, 0, %v19599_v4  ;;  %v19600_v54 = vld [vmem:[#allocation86_spill] sm:$0xff] }
 0x146   : > { %v1746_v8 = vpop.permute.xlu0 %1745  ;;  %2252 = vst.msk [vmem:[#allocation2 + $0x180] sm:$0xff] %vm2240_vm9, %v2081_v56  ;;  %v1907_v15 = vsel %vm1853_vm7, %v1227_v47, %v19600_v54  ;;  %v1904_v14 = vsel %vm1853_vm7, %v1226_v6, %v19601_v21  ;;  %v19602_v56 = vld [vmem:[#allocation40_spill] sm:$0xff] }
 0x147   : > { %v2078_v61 = vsel %vm2046_vm8, %v1886_v36, %v1746_v8  ;;  %v1229_v8 = vsel %vm16004_vm6, 0, %v19602_v56  ;;  %v19613_v56 = vld [vmem:[#allocation93_spill] sm:$0xff] }
 0x148   : > { %2251 = vst.msk [vmem:[#allocation2 + $0x178] sm:$0xff] %vm2240_vm9, %v2078_v61  ;;  %v1752_v0 = vpop.permute.xlu1 %1751  ;;  %v19603_v61 = vld [vmem:[#allocation41_spill] sm:$0xff] }
 0x149   : > { %v2087_v60 = vsel %vm2046_vm8, %v1895_v11, %v1752_v0  ;;  %v1228_v16 = vsel %vm16004_vm6, 0, %v19603_v61  ;;  %v19604_v0 = vld [vmem:[#allocation88_spill] sm:$0xff] }
 0x14a   : > { %v1750_v63 = vpop.permute.xlu0 %1749  ;;  %2254 = vst.msk [vmem:[#allocation2 + $0x190] sm:$0xff] %vm2240_vm9, %v2087_v60  ;;  %v1913_v53 = vsel %vm1853_vm7, %v1229_v8, %v19604_v0  ;;  %v1910_v31 = vsel %vm1853_vm7, %v1228_v16, %v19605_v22  ;;  %v19606_v60 = vld [vmem:[#allocation42_spill] sm:$0xff] }
 0x14b   : > { %v2084_v58 = vsel %vm2046_vm8, %v1892_v35, %v1750_v63  ;;  %v1231_v63 = vsel %vm16004_vm6, 0, %v19606_v60  ;;  %v19617_v60 = vld [vmem:[#allocation7_spill] sm:$0xff] }
 0x14c   : > { %2253 = vst.msk [vmem:[#allocation2 + $0x188] sm:$0xff] %vm2240_vm9, %v2084_v58  ;;  %v1756_v7 = vpop.permute.xlu1 %1755  ;;  %v19607_v58 = vld [vmem:[#allocation43_spill] sm:$0xff] }
 0x14d   : > { %v2093_v13 = vsel %vm2046_vm8, %v1901_v28, %v1756_v7  ;;  %v1230_v45 = vsel %vm16004_vm6, 0, %v19607_v58  ;;  %v19608_v7 = vld [vmem:[#allocation90_spill] sm:$0xff] }
 0x14e   : > { %v1754_v5 = vpop.permute.xlu0 %1753  ;;  %2256 = vst.msk [vmem:[#allocation2 + $0x1a0] sm:$0xff] %vm2240_vm9, %v2093_v13  ;;  %v1919_v17 = vsel %vm1853_vm7, %v1231_v63, %v19608_v7  ;;  %v1916_v47 = vsel %vm1853_vm7, %v1230_v45, %v19609_v23  ;;  %v19610_v13 = vld [vmem:[#allocation44_spill] sm:$0xff] }
 0x14f   : > { %v2090_v26 = vsel %vm2046_vm8, %v1898_v20, %v1754_v5  ;;  %v1233_v5 = vsel %vm16004_vm6, 0, %v19610_v13  ;;  %v19621_v13 = vld [vmem:[#allocation72_spill] sm:$0xff] }
 0x150   : > { %2255 = vst.msk [vmem:[#allocation2 + $0x198] sm:$0xff] %vm2240_vm9, %v2090_v26  ;;  %v1760_v36 = vpop.permute.xlu1 %1759  ;;  %v19611_v26 = vld [vmem:[#allocation45_spill] sm:$0xff] }
 0x151   : > { %v2099_v57 = vsel %vm2046_vm8, %v1907_v15, %v1760_v36  ;;  %v1232_v54 = vsel %vm16004_vm6, 0, %v19611_v26  ;;  %v19612_v36 = vld [vmem:[#allocation92_spill] sm:$0xff] }
 0x152   : > { %v1758_v24 = vpop.permute.xlu0 %1757  ;;  %2258 = vst.msk [vmem:[#allocation2 + $0x1c0] sm:$0xff] %vm2240_vm9, %v2099_v57  ;;  %v1925_v21 = vsel %vm1853_vm7, %v1233_v5, %v19612_v36  ;;  %v1922_v8 = vsel %vm1853_vm7, %v1232_v54, %v19613_v56  ;;  %v19614_v57 = vld [vmem:[#allocation46_spill] sm:$0xff] }
 0x153   : > { %v2096_v11 = vsel %vm2046_vm8, %v1904_v14, %v1758_v24  ;;  %v1235_v24 = vsel %vm16004_vm6, 0, %v19614_v57  ;;  %v19625_v57 = vld [vmem:[#allocation95_spill] sm:$0xff] }
 0x154   : > { %2257 = vst.msk [vmem:[#allocation2 + $0x1b8] sm:$0xff] %vm2240_vm9, %v2096_v11  ;;  %v1764_v35 = vpop.permute.xlu1 %1763  ;;  %v19615_v11 = vld [vmem:[#allocation47_spill] sm:$0xff] }
 0x155   : > { %v2105_v55 = vsel %vm2046_vm8, %v1913_v53, %v1764_v35  ;;  %v1234_v0 = vsel %vm16004_vm6, 0, %v19615_v11  ;;  %v19616_v35 = vld [vmem:[#allocation6_spill] sm:$0xff] }
 0x156   : > { %v1762_v18 = vpop.permute.xlu0 %1761  ;;  %2260 = vst.msk [vmem:[#allocation2 + $0x1d0] sm:$0xff] %vm2240_vm9, %v2105_v55  ;;  %v1931_v22 = vsel %vm1853_vm7, %v1235_v24, %v19616_v35  ;;  %v1928_v63 = vsel %vm1853_vm7, %v1234_v0, %v19617_v60  ;;  %v19618_v55 = vld [vmem:[#allocation48_spill] sm:$0xff]  ;;  %v19626_v35 = vld [vmem:[#allocation57_spill] sm:$0xff] }
 0x157   : > { %v2102_v28 = vsel %vm2046_vm8, %v1910_v31, %v1762_v18  ;;  %v1237_v18 = vsel %vm16004_vm6, 0, %v19618_v55  ;;  %v19627_v60 = vld [vmem:[#allocation12_spill] sm:$0xff] }
 0x158   : > { %2259 = vst.msk [vmem:[#allocation2 + $0x1c8] sm:$0xff] %vm2240_vm9, %v2102_v28  ;;  %v1768_v20 = vpop.permute.xlu1 %1767  ;;  %v19619_v28 = vld [vmem:[#allocation49_spill] sm:$0xff] }
 0x159   : > { %v2111_v4 = vsel %vm2046_vm8, %v1919_v17, %v1768_v20  ;;  %v1236_v7 = vsel %vm16004_vm6, 0, %v19619_v28  ;;  %v19620_v20 = vld [vmem:[#allocation8_spill] sm:$0xff] }
 0x15a   : > { %v1766_v6 = vpop.permute.xlu0 %1765  ;;  %2262 = vst.msk [vmem:[#allocation2 + $0x1e0] sm:$0xff] %vm2240_vm9, %v2111_v4  ;;  %v1937_v23 = vsel %vm1853_vm7, %v1237_v18, %v19620_v20  ;;  %v1934_v5 = vsel %vm1853_vm7, %v1236_v7, %v19621_v13  ;;  %v19622_v4 = vld [vmem:[#allocation52_spill] sm:$0xff]  ;;  %v19628_v18 = vld [vmem:[#allocation13_spill] sm:$0xff] }
 0x15b   : > { %v2108_v15 = vsel %vm2046_vm8, %v1916_v47, %v1766_v6  ;;  %v1239_v6 = vsel %vm16004_vm6, 0, %v19622_v4 }
 0x15c   : > { %2261 = vst.msk [vmem:[#allocation2 + $0x1d8] sm:$0xff] %vm2240_vm9, %v2108_v15  ;;  %v1772_v14 = vpop.permute.xlu1 %1771  ;;  %v19623_v15 = vld [vmem:[#allocation53_spill] sm:$0xff] }
 0x15d   : > { %v2117_v61 = vsel %vm2046_vm8, %v1925_v21, %v1772_v14  ;;  %v1238_v36 = vsel %vm16004_vm6, 0, %v19623_v15  ;;  %v19624_v14 = vld [vmem:[#allocation10_spill] sm:$0xff] }
 0x15e   : > { %v1770_v16 = vpop.permute.xlu0 %1769  ;;  %2264 = vst.msk [vmem:[#allocation2 + $0x1f0] sm:$0xff] %vm2240_vm9, %v2117_v61  ;;  %v1943_v56 = vsel %vm1853_vm7, %v1239_v6, %v19624_v14  ;;  %v1940_v24 = vsel %vm1853_vm7, %v1238_v36, %v19625_v57 }
 0x15f   : > { %v2114_v53 = vsel %vm2046_vm8, %v1922_v8, %v1770_v16 }
 0x160   : > { %2263 = vst.msk [vmem:[#allocation2 + $0x1e8] sm:$0xff] %vm2240_vm9, %v2114_v53  ;;  %v1776_v31 = vpop.permute.xlu1 %1775 }
 0x161   : > { %v2123_v58 = vsel %vm2046_vm8, %v1931_v22, %v1776_v31 }
 0x162   : > { %v1774_v45 = vpop.permute.xlu0 %1773  ;;  %2266 = vst.msk [vmem:[#allocation2 + $0x200] sm:$0xff] %vm2240_vm9, %v2123_v58 }
 0x163   : > { %v2120_v17 = vsel %vm2046_vm8, %v1928_v63, %v1774_v45  ;;  %v19629_v45 = vld [vmem:[#allocation60_spill] sm:$0xff] }
 0x164   : > { %2265 = vst.msk [vmem:[#allocation2 + $0x1f8] sm:$0xff] %vm2240_vm9, %v2120_v17  ;;  %v1780_v47 = vpop.permute.xlu1 %1779  ;;  %v19630_v17 = vld [vmem:[#allocation62_spill] sm:$0xff] }
 0x165   : > { %v2129_v26 = vsel %vm2046_vm8, %v1937_v23, %v1780_v47 }
 0x166   : > { %v1778_v54 = vpop.permute.xlu0 %1777  ;;  %2268 = vst.msk [vmem:[#allocation2 + $0x210] sm:$0xff] %vm2240_vm9, %v2129_v26 }
 0x167   : > { %v2126_v21 = vsel %vm2046_vm8, %v1934_v5, %v1778_v54 }
 0x168   : > { %2267 = vst.msk [vmem:[#allocation2 + $0x208] sm:$0xff] %vm2240_vm9, %v2126_v21  ;;  %v1784_v8 = vpop.permute.xlu1 %1783 }
 0x169   : > { %v2135_v61 = vsel %vm2046_vm8, %v1943_v56, %v1784_v8 }
 0x16a   : > { %v1782_v16 = vpop.permute.xlu0 %1781  ;;  %2270 = vst.msk [vmem:[#allocation2 + $0x220] sm:$0xff] %vm2240_vm9, %v2135_v61 }
 0x16b   : > { %v2132_v12 = vsel %vm2046_vm8, %v1940_v24, %v1782_v16 }
 0x16c   : > { %2269 = vst.msk [vmem:[#allocation2 + $0x218] sm:$0xff] %vm2240_vm9, %v2132_v12  ;;  %v1788_v11 = vpop.permute.xlu1 %1787 }
 0x16d   : > { %v2141_v0 = vsel %vm2046_vm8, %v16042_v48, %v1788_v11 }
 0x16e   : > { %v1786_v53 = vpop.permute.xlu0 %1785  ;;  %2272 = vst.msk [vmem:[#allocation2 + $0x230] sm:$0xff] %vm2240_vm9, %v2141_v0 }
 0x16f   : > { %v2138_v22 = vsel %vm2046_vm8, %v19626_v35, %v1786_v53 }
 0x170   : > { %2271 = vst.msk [vmem:[#allocation2 + $0x228] sm:$0xff] %vm2240_vm9, %v2138_v22  ;;  %v1792_v31 = vpop.permute.xlu1 %1791 }
 0x171   : > { %v2147_v63 = vsel %vm2046_vm8, %v19627_v60, %v1792_v31 }
 0x172   : > { %v1790_v55 = vpop.permute.xlu0 %1789  ;;  %2274 = vst.msk [vmem:[#allocation2 + $0x250] sm:$0xff] %vm2240_vm9, %v2147_v63 }
 0x173   : > { %v2144_v58 = vsel %vm2046_vm8, %v19628_v18, %v1790_v55 }
 0x174   : > { %2273 = vst.msk [vmem:[#allocation2 + $0x248] sm:$0xff] %vm2240_vm9, %v2144_v58  ;;  %v1796_v48 = vpop.permute.xlu1 %1795 }
 0x175   : > { %v2153_v28 = vsel %vm2046_vm8, %v19629_v45, %v1796_v48 }
 0x176   : > { %v1794_v7 = vpop.permute.xlu0 %1793  ;;  %2276 = vst.msk [vmem:[#allocation2 + $0x260] sm:$0xff] %vm2240_vm9, %v2153_v28  ;;  %v2310_v28 = vld [vmem:[#allocation2 + $0x128] sm:$0xff] (!%p11037_p7) }
 0x177   : > { %v2150_v20 = vsel %vm2046_vm8, %v19630_v17, %v1794_v7  ;;  %2328 = vst.msk [vmem:[#allocation2 + $0x8] sm:$0xff] (!%p11037_p7), %vm2240_vm9, %v2310_v28  ;;  %2347 = vst.msk [vmem:[#allocation2 + $0x98] sm:$0xff] (!%p11037_p7), %vm2240_vm9, %v2310_v28  ;;  %v2314_v7 = vld [vmem:[#allocation2 + $0x148] sm:$0xff] (!%p11037_p7)  ;;  %v2315_v17 = vld [vmem:[#allocation2 + $0x150] sm:$0xff] (!%p11037_p7) }
 0x178   : > { %2275 = vst.msk [vmem:[#allocation2 + $0x258] sm:$0xff] %vm2240_vm9, %v2150_v20  ;;  %v1800_v23 = vpop.permute.xlu1 %1799  ;;  %2332 = vst.msk [vmem:[#allocation2 + $0x28] sm:$0xff] (!%p11037_p7), %vm2240_vm9, %v2314_v7  ;;  %v2316_v20 = vld [vmem:[#allocation2 + $0x158] sm:$0xff] (!%p11037_p7) }
 0x179   : > { %v2159_v47 = vsel %vm2046_vm8, %v16120_v9, %v1800_v23  ;;  %2351 = vst.msk [vmem:[#allocation2 + $0xb8] sm:$0xff] (!%p11037_p7), %vm2240_vm9, %v2314_v7  ;;  %v2317_v23 = vld [vmem:[#allocation2 + $0x160] sm:$0xff] (!%p11037_p7)  ;;  %2333 = vst.msk [vmem:[#allocation2 + $0x30] sm:$0xff] (!%p11037_p7), %vm2240_vm9, %v2315_v17 }
 0x17a   : > { %v1798_v13 = vpop.permute.xlu0 %1797  ;;  %2278 = vst.msk [vmem:[#allocation2 + $0x270] sm:$0xff] %vm2240_vm9, %v2159_v47  ;;  %2352 = vst.msk [vmem:[#allocation2 + $0xc0] sm:$0xff] (!%p11037_p7), %vm2240_vm9, %v2315_v17  ;;  %v2318_v47 = vld [vmem:[#allocation2 + $0x168] sm:$0xff] (!%p11037_p7) }
 0x17b   : > { %v2156_v5 = vsel %vm2046_vm8, %v16123_v39, %v1798_v13  ;;  %2334 = vst.msk [vmem:[#allocation2 + $0x38] sm:$0xff] (!%p11037_p7), %vm2240_vm9, %v2316_v20  ;;  %2353 = vst.msk [vmem:[#allocation2 + $0xc8] sm:$0xff] (!%p11037_p7), %vm2240_vm9, %v2316_v20  ;;  %v2319_v13 = vld [vmem:[#allocation2 + $0x170] sm:$0xff] (!%p11037_p7) }
 0x17c   : > { %2277 = vst.msk [vmem:[#allocation2 + $0x268] sm:$0xff] %vm2240_vm9, %v2156_v5  ;;  %v1804_v4 = vpop.permute.xlu1 %1803  ;;  %2335 = vst.msk [vmem:[#allocation2 + $0x40] sm:$0xff] (!%p11037_p7), %vm2240_vm9, %v2317_v23  ;;  %v2320_v5 = vld [vmem:[#allocation2 + $0x178] sm:$0xff] (!%p11037_p7) }
 0x17d   : > { %v2165_v6 = vsel %vm2046_vm8, %v16146_v50, %v1804_v4  ;;  %2354 = vst.msk [vmem:[#allocation2 + $0xd0] sm:$0xff] (!%p11037_p7), %vm2240_vm9, %v2317_v23  ;;  %2336 = vst.msk [vmem:[#allocation2 + $0x48] sm:$0xff] (!%p11037_p7), %vm2240_vm9, %v2318_v47  ;;  %v2321_v4 = vld [vmem:[#allocation2 + $0x180] sm:$0xff] (!%p11037_p7) }
 0x17e   : > { %v1802_v26 = vpop.permute.xlu0 %1801  ;;  %2280 = vst.msk [vmem:[#allocation2 + $0x280] sm:$0xff] %vm2240_vm9, %v2165_v6  ;;  %2355 = vst.msk [vmem:[#allocation2 + $0xd8] sm:$0xff] (!%p11037_p7), %vm2240_vm9, %v2318_v47  ;;  %v2322_v6 = vld [vmem:[#allocation2 + $0x188] sm:$0xff] (!%p11037_p7) }
 0x17f   : > { %v2162_v54 = vsel %vm2046_vm8, %v16149_v49, %v1802_v26  ;;  %2337 = vst.msk [vmem:[#allocation2 + $0x50] sm:$0xff] (!%p11037_p7), %vm2240_vm9, %v2319_v13  ;;  %2356 = vst.msk [vmem:[#allocation2 + $0xe0] sm:$0xff] (!%p11037_p7), %vm2240_vm9, %v2319_v13  ;;  %v2323_v26 = vld [vmem:[#allocation2 + $0x190] sm:$0xff] (!%p11037_p7) }
 0x180   : > { %2279 = vst.msk [vmem:[#allocation2 + $0x278] sm:$0xff] %vm2240_vm9, %v2162_v54  ;;  %v1808_v9 = vpop.permute.xlu1 %1807  ;;  %2338 = vst.msk [vmem:[#allocation2 + $0x58] sm:$0xff] (!%p11037_p7), %vm2240_vm9, %v2320_v5  ;;  %v2324_v54 = vld [vmem:[#allocation2 + $0x198] sm:$0xff] (!%p11037_p7) }
 0x181   : > { %v2171_v15 = vsel %vm2046_vm8, %v16172_v27, %v1808_v9  ;;  %2357 = vst.msk [vmem:[#allocation2 + $0xe8] sm:$0xff] (!%p11037_p7), %vm2240_vm9, %v2320_v5  ;;  %2339 = vst.msk [vmem:[#allocation2 + $0x60] sm:$0xff] (!%p11037_p7), %vm2240_vm9, %v2321_v4  ;;  %v2325_v9 = vld [vmem:[#allocation2 + $0x1a0] sm:$0xff] (!%p11037_p7) }
 0x182   : > { %v1806_v36 = vpop.permute.xlu0 %1805  ;;  %2282 = vst.msk [vmem:[#allocation2 + $0x290] sm:$0xff] %vm2240_vm9, %v2171_v15  ;;  %2358 = vst.msk [vmem:[#allocation2 + $0xf0] sm:$0xff] (!%p11037_p7), %vm2240_vm9, %v2321_v4  ;;  %v2326_v15 = vld [vmem:[#allocation2 + $0x1a8] sm:$0xff] (!%p11037_p7) }
 0x183   : > { %v2168_v39 = vsel %vm2046_vm8, %v16175_v41, %v1806_v36  ;;  %2340 = vst.msk [vmem:[#allocation2 + $0x68] sm:$0xff] (!%p11037_p7), %vm2240_vm9, %v2322_v6  ;;  %2359 = vst.msk [vmem:[#allocation2 + $0xf8] sm:$0xff] (!%p11037_p7), %vm2240_vm9, %v2322_v6 }
 0x184   : > { %2281 = vst.msk [vmem:[#allocation2 + $0x288] sm:$0xff] %vm2240_vm9, %v2168_v39  ;;  %v1812_v50 = vpop.permute.xlu1 %1811  ;;  %2341 = vst.msk [vmem:[#allocation2 + $0x70] sm:$0xff] (!%p11037_p7), %vm2240_vm9, %v2323_v26 }
 0x185   : > { %v2177_v21 = vsel %vm2046_vm8, %v16198_v3, %v1812_v50  ;;  %2360 = vst.msk [vmem:[#allocation2 + $0x100] sm:$0xff] (!%p11037_p7), %vm2240_vm9, %v2323_v26  ;;  %2342 = vst.msk [vmem:[#allocation2 + $0x78] sm:$0xff] (!%p11037_p7), %vm2240_vm9, %v2324_v54 }
 0x186   : > { %v1810_v14 = vpop.permute.xlu0 %1809  ;;  %2284 = vst.msk [vmem:[#allocation2 + $0x2a0] sm:$0xff] %vm2240_vm9, %v2177_v21  ;;  %2361 = vst.msk [vmem:[#allocation2 + $0x108] sm:$0xff] (!%p11037_p7), %vm2240_vm9, %v2324_v54 }
 0x187   : > { %v2174_v49 = vsel %vm2046_vm8, %v16201_v59, %v1810_v14  ;;  %2343 = vst.msk [vmem:[#allocation2 + $0x80] sm:$0xff] (!%p11037_p7), %vm2240_vm9, %v2325_v9  ;;  %2362 = vst.msk [vmem:[#allocation2 + $0x110] sm:$0xff] (!%p11037_p7), %vm2240_vm9, %v2325_v9 }
 0x188   : > { %2283 = vst.msk [vmem:[#allocation2 + $0x298] sm:$0xff] %vm2240_vm9, %v2174_v49  ;;  %v1816_v27 = vpop.permute.xlu1 %1815  ;;  %2344 = vst.msk [vmem:[#allocation2 + $0x88] sm:$0xff] (!%p11037_p7), %vm2240_vm9, %v2326_v15 }
 0x189   : > { %v2183_v56 = vsel %vm2046_vm8, %v16224_v2, %v1816_v27  ;;  %2363 = vst.msk [vmem:[#allocation2 + $0x118] sm:$0xff] (!%p11037_p7), %vm2240_vm9, %v2326_v15 }
 0x18a   : > { %v1814_v8 = vpop.permute.xlu0 %1813  ;;  %2286 = vst.msk [vmem:[#allocation2 + $0x2b0] sm:$0xff] %vm2240_vm9, %v2183_v56 }
 0x18b   : > { %v2180_v41 = vsel %vm2046_vm8, %v16227_v34, %v1814_v8 }
 0x18c   : > { %2285 = vst.msk [vmem:[#allocation2 + $0x2a8] sm:$0xff] %vm2240_vm9, %v2180_v41  ;;  %v1820_v3 = vpop.permute.xlu1 %1819 }
 0x18d   : > { %v2189_v57 = vsel %vm2046_vm8, %v16250_v25, %v1820_v3 }
 0x18e   : > { %v1818_v24 = vpop.permute.xlu0 %1817  ;;  %2288 = vst.msk [vmem:[#allocation2 + $0x2c0] sm:$0xff] %vm2240_vm9, %v2189_v57 }
 0x18f   : > { %v2186_v59 = vsel %vm2046_vm8, %v16253_v38, %v1818_v24 }
 0x190   : > { %2287 = vst.msk [vmem:[#allocation2 + $0x2b8] sm:$0xff] %vm2240_vm9, %v2186_v59  ;;  %v1824_v2 = vpop.permute.xlu1 %1823 }
 0x191   : > { %v2195_v61 = vsel %vm2046_vm8, %v16276_v51, %v1824_v2 }
 0x192   : > { %v1822_v16 = vpop.permute.xlu0 %1821  ;;  %2290 = vst.msk [vmem:[#allocation2 + $0x2e0] sm:$0xff] %vm2240_vm9, %v2195_v61 }
 0x193   : > { %v2192_v34 = vsel %vm2046_vm8, %v16279_v29, %v1822_v16 }
 0x194   : > { %2289 = vst.msk [vmem:[#allocation2 + $0x2d8] sm:$0xff] %vm2240_vm9, %v2192_v34  ;;  %v1828_v25 = vpop.permute.xlu1 %1827 }
 0x195   : > { %v2201_v12 = vsel %vm2046_vm8, %v16302_v37, %v1828_v25 }
 0x196   : > { %v1826_v11 = vpop.permute.xlu0 %1825  ;;  %2292 = vst.msk [vmem:[#allocation2 + $0x2f0] sm:$0xff] %vm2240_vm9, %v2201_v12 }
 0x197   : > { %v2198_v38 = vsel %vm2046_vm8, %v16305_v62, %v1826_v11 }
 0x198   : > { %2291 = vst.msk [vmem:[#allocation2 + $0x2e8] sm:$0xff] %vm2240_vm9, %v2198_v38  ;;  %v1832_v51 = vpop.permute.xlu1 %1831 }
 0x199   : > { %v2207_v0 = vsel %vm2046_vm8, %v16328_v32, %v1832_v51 }
 0x19a   : > { %v1830_v53 = vpop.permute.xlu0 %1829  ;;  %2294 = vst.msk [vmem:[#allocation2 + $0x300] sm:$0xff] %vm2240_vm9, %v2207_v0 }
 0x19b   : > { %v2204_v29 = vsel %vm2046_vm8, %v16331_v42, %v1830_v53 }
 0x19c   : > { %2293 = vst.msk [vmem:[#allocation2 + $0x2f8] sm:$0xff] %vm2240_vm9, %v2204_v29  ;;  %v1836_v37 = vpop.permute.xlu1 %1835 }
 0x19d   : > { %v2213_v35 = vsel %vm2046_vm8, %v16354_v10, %v1836_v37 }
 0x19e   : > { %v1834_v22 = vpop.permute.xlu0 %1833  ;;  %2296 = vst.msk [vmem:[#allocation2 + $0x310] sm:$0xff] %vm2240_vm9, %v2213_v35 }
 0x19f   : > { %v2210_v62 = vsel %vm2046_vm8, %v16357_v43, %v1834_v22 }
 0x1a0   : > { %2295 = vst.msk [vmem:[#allocation2 + $0x308] sm:$0xff] %vm2240_vm9, %v2210_v62  ;;  %v1840_v32 = vpop.permute.xlu1 %1839 }
 0x1a1   : > { %v2219_v31 = vsel %vm2046_vm8, %v16380_v52, %v1840_v32 }
 0x1a2   : > { %v1838_v60 = vpop.permute.xlu0 %1837  ;;  %2298 = vst.msk [vmem:[#allocation2 + $0x320] sm:$0xff] %vm2240_vm9, %v2219_v31 }
 0x1a3   : > { %v2216_v42 = vsel %vm2046_vm8, %v16383_v44, %v1838_v60 }
 0x1a4   : > { %2297 = vst.msk [vmem:[#allocation2 + $0x318] sm:$0xff] %vm2240_vm9, %v2216_v42  ;;  %v1844_v10 = vpop.permute.xlu1 %1843 }
 0x1a5   : > { %v2225_v63 = vsel %vm2046_vm8, %v16406_v30, %v1844_v10 }
 0x1a6   : > { %v1842_v55 = vpop.permute.xlu0 %1841  ;;  %2300 = vst.msk [vmem:[#allocation2 + $0x330] sm:$0xff] %vm2240_vm9, %v2225_v63 }
 0x1a7   : > { %v2222_v43 = vsel %vm2046_vm8, %v16409_v19, %v1842_v55 }
 0x1a8   : > { %2299 = vst.msk [vmem:[#allocation2 + $0x328] sm:$0xff] %vm2240_vm9, %v2222_v43  ;;  %v1848_v52 = vpop.permute.xlu1 %1847 }
 0x1a9   : > { %v2231_v18 = vsel %vm2046_vm8, %v16432_v33, %v1848_v52  ;;  %v2309_v33 = vld [vmem:[#allocation2 + $0x120] sm:$0xff] (!%p11037_p7) }
 0x1aa   : > { %v1846_v58 = vpop.permute.xlu0 %1845  ;;  %2302 = vst.msk [vmem:[#allocation2 + $0x340] sm:$0xff] %vm2240_vm9, %v2231_v18  ;;  %2307 = sbr.rel (%p11037_p7) target bundleno = 434 (0x1b2), region = 44  ;;  %2327 = vst.msk [vmem:[#allocation2] sm:$0xff] (!%p11037_p7), %vm2240_vm9, %v2309_v33 }
 0x1ab   : > { %v2228_v44 = vsel %vm2046_vm8, %v16435_v40, %v1846_v58  ;;  %v2311_v40 = vld [vmem:[#allocation2 + $0x130] sm:$0xff] (!%p11037_p7)  ;;  %2346 = vst.msk [vmem:[#allocation2 + $0x90] sm:$0xff] (!%p11037_p7), %vm2240_vm9, %v2309_v33 }
 0x1ac   : > { %2301 = vst.msk [vmem:[#allocation2 + $0x338] sm:$0xff] %vm2240_vm9, %v2228_v44  ;;  %v1852_v30 = vpop.permute.xlu1 %1851  ;;  %2329 = vst.msk [vmem:[#allocation2 + $0x10] sm:$0xff] (!%p11037_p7), %vm2240_vm9, %v2311_v40 }
 0x1ad   : > { %v2237_v48 = vsel %vm2046_vm8, %v16461_v1, %v1852_v30  ;;  %2348 = vst.msk [vmem:[#allocation2 + $0xa0] sm:$0xff] (!%p11037_p7), %vm2240_vm9, %v2311_v40  ;;  %v2312_v1 = vld [vmem:[#allocation2 + $0x138] sm:$0xff] (!%p11037_p7) }
 0x1ae   : > { %v1850_v45 = vpop.permute.xlu0 %1849  ;;  %2304 = vst.msk [vmem:[#allocation2 + $0x350] sm:$0xff] %vm2240_vm9, %v2237_v48  ;;  %2330 = vst.msk [vmem:[#allocation2 + $0x18] sm:$0xff] (!%p11037_p7), %vm2240_vm9, %v2312_v1 }
 0x1af   : > { %v2234_v19 = vsel %vm2046_vm8, %v16467_v46, %v1850_v45  ;;  %v2313_v46 = vld [vmem:[#allocation2 + $0x140] sm:$0xff] (!%p11037_p7)  ;;  %2349 = vst.msk [vmem:[#allocation2 + $0xa8] sm:$0xff] (!%p11037_p7), %vm2240_vm9, %v2312_v1 }
 0x1b0   : > { %2303 = vst.msk [vmem:[#allocation2 + $0x348] sm:$0xff] %vm2240_vm9, %v2234_v19  ;;  %2331 = vst.msk [vmem:[#allocation2 + $0x20] sm:$0xff] (!%p11037_p7), %vm2240_vm9, %v2313_v46 }
 0x1b1   : > { %2350 = vst.msk [vmem:[#allocation2 + $0xb0] sm:$0xff] %vm2240_vm9, %v2313_v46 }
 0x1b2 PF: > { %v14744_v36 = vld [vmem:[%s19073_s1] sm:$0x3f]   ;;  %vm2634_vm10 = vcmask 1045504   ;;  %v16856_v49 = vld [vmem:[#allocation2 + $0x98] sm:$0xff]  ;;  %v16861_v27 = vld [vmem:[#allocation2 + $0x8] sm:$0xff] }
 0x1b3   : > { %v2364_v39 = vld [vmem:[#allocation2] sm:$0xff]  ;;  %14616 = vmatprep.subr.msk.bf16.mxu1 %vm2634_vm10, %v14744_v36  ;;  %v2636_v21 = vsel %vm2634_vm10, %v14744_v36, 0  ;;  %12814 = vmatprep.mubr.msk.bf16.mxu0 %vm2240_vm9, %v16856_v49  ;;  %v14746_v8 = vld [vmem:[%s19073_s1 + $0x8] sm:$0x3f]   ;;  %v16902_v25 = vld [vmem:[#allocation2 + $0xb8] sm:$0xff] }
 0x1b4   : > { %v16852_v50 = vld [vmem:[%s19073_s1 + $0x20] sm:$0x3f]   ;;  %12294 = vmatprep.mubr.msk.bf16.mxu1 %vm2240_vm9, %v2364_v39  ;;  %12293 = vmatpush3.bf16.msra.mxu1 %v2636_v21  ;;  %v14747_v3 = vld [vmem:[%s19073_s1 + $0x28] sm:$0x3f]   ;;  %v16878_v57 = vld [vmem:[#allocation2 + $0x10] sm:$0xff]  ;;  %v3449_v24 = vsel %vm2634_vm10, %v14746_v8, 0 }
 0x1b5   : > { %19631 = vst [vmem:[#allocation14_spill] sm:$0xff] %v16852_v50  ;;  %v10839_v14 = vld [vmem:[#allocation2 + $0x240] sm:$0xff]  ;;  %14620 = vmatprep.subr.msk.bf16.mxu0 %vm2634_vm10, %v16852_v50  ;;  %v16867_v56 = vsel %vm2634_vm10, %v16852_v50, 0  ;;  %14617 = vmatprep.subr.msk.bf16.mxu1 %vm2634_vm10, %v14746_v8  ;;  %v7213_v2 = vsel %vm2634_vm10, %v14747_v3, 0  ;;  %v16910_v12 = vld [vmem:[#allocation2 + $0x28] sm:$0xff]  ;;  %v16914_v38 = vld [vmem:[#allocation2 + $0x30] sm:$0xff] }
 0x1b6   : > { %10875 = vst.msk [vmem:[#allocation2] sm:$0xff] %vm2240_vm9, %v10839_v14  ;;  %19632 = vst [vmem:[#allocation15_spill] sm:$0xff] %v16867_v56  ;;  %v16872_v41 = vld [vmem:[#allocation2 + $0xa0] sm:$0xff]  ;;  %12813 = vmatpush3.bf16.msra.mxu0 %v16867_v56  ;;  %v16894_v61 = vld [vmem:[#allocation2 + $0x18] sm:$0xff] }
 0x1b7   : > { %12295 = vmatmul.mubr.msk.bf16.vlgmr.msra.gmra.mrb[0].mxu1 %vm2240_vm9, %v16861_v27  ;;  %v16884_v59 = vld [vmem:[#allocation2 + $0xa8] sm:$0xff]  ;;  %14622 = vmatprep.subr.msk.bf16.mxu0 %vm2634_vm10, %v14747_v3  ;;  %v16912_v11 = vld [vmem:[#allocation2 + $0xc0] sm:$0xff]  ;;  %v16921_v0 = vld [vmem:[%s19073_s1 + $0x30] sm:$0x3f]  }
 0x1b8   : > { %12423 = vmatpush3.bf16.msra.mxu1 %v3449_v24  ;;  %12298 = vmatprep.mubr.msk.bf16.mxu1 %vm2240_vm9, %v16878_v57  ;;  %v16896_v16 = vld [vmem:[#allocation2 + $0x20] sm:$0xff]  ;;  %v16898_v34 = vld [vmem:[#allocation2 + $0xb0] sm:$0xff]  ;;  %v16916_v51 = vld [vmem:[#allocation2 + $0xc8] sm:$0xff]  ;;  %v8154_v54 = vsel %vm2634_vm10, %v16921_v0, 0 }
 0x1b9   : > { %12815 = vmatmul.mubr.msk.bf16.vlgmr.msra.gmra.mrb[0].mxu0 %vm2240_vm9, %v16872_v41  ;;  %v16933_v53 = vld [vmem:[#allocation2 + $0x38] sm:$0xff]  ;;  %v16935_v29 = vld [vmem:[#allocation2 + $0x40] sm:$0xff]  ;;  %v16937_v37 = vld [vmem:[#allocation2 + $0xd0] sm:$0xff] }
 0x1ba   : > { %12943 = vmatpush3.bf16.msra.mxu0 %v7213_v2  ;;  %12818 = vmatprep.mubr.msk.bf16.mxu0 %vm2240_vm9, %v16884_v59  ;;  %v16941_v35 = vld [vmem:[#allocation2 + $0xd8] sm:$0xff]  ;;  %v16949_v22 = vld [vmem:[#allocation2 + $0x48] sm:$0xff]  ;;  %v16951_v62 = vld [vmem:[#allocation2 + $0x50] sm:$0xff] }
 0x1bb   : > { %14623 = vmatprep.subr.msk.bf16.mxu0 %vm2634_vm10, %v16921_v0  ;;  %v16953_v32 = vld [vmem:[#allocation2 + $0xe0] sm:$0xff]  ;;  %v16957_v31 = vld [vmem:[#allocation2 + $0xe8] sm:$0xff]  ;;  %v16965_v60 = vld [vmem:[#allocation2 + $0x58] sm:$0xff] }
 0x1bc   : > { %v16967_v42 = vld [vmem:[#allocation2 + $0x60] sm:$0xff]  ;;  %v16969_v10 = vld [vmem:[#allocation2 + $0xf0] sm:$0xff]  ;;  %v16973_v63 = vld [vmem:[#allocation2 + $0xf8] sm:$0xff] }
 0x1bd   : > { %v16981_v55 = vld [vmem:[#allocation2 + $0x68] sm:$0xff]  ;;  %v16983_v43 = vld [vmem:[#allocation2 + $0x70] sm:$0xff]  ;;  %v16985_v52 = vld [vmem:[#allocation2 + $0x100] sm:$0xff] }
 0x1be   : > { %v16989_v18 = vld [vmem:[#allocation2 + $0x108] sm:$0xff]  ;;  %v16997_v58 = vld [vmem:[#allocation2 + $0x78] sm:$0xff]  ;;  %v2380_v44 = vld [vmem:[#allocation2 + $0x90] sm:$0xff] }
 0x1bf   : > { %12299 = vmatmul.mubr.msk.bf16.gmra.mrb[4].mxu1 %vm2240_vm9, %v16894_v61  ;;  %v16999_v30 = vld [vmem:[#allocation2 + $0x110] sm:$0xff]  ;;  %v17003_v48 = vld [vmem:[#allocation2 + $0x128] sm:$0xff]  ;;  %v17014_v19 = vld [vmem:[#allocation2 + $0x138] sm:$0xff] }
 0x1c0   : > { %12302 = vmatprep.mubr.msk.bf16.mxu1 %vm2240_vm9, %v16896_v16  ;;  %v17010_v45 = vld [vmem:[#allocation2 + $0x130] sm:$0xff]  ;;  %v17022_v33 = vld [vmem:[#allocation2 + $0x140] sm:$0xff]  ;;  %v17026_v28 = vld [vmem:[#allocation2 + $0x148] sm:$0xff] }
 0x1c1   : > { %12819 = vmatmul.mubr.msk.bf16.gmra.mrb[4].mxu0 %vm2240_vm9, %v16898_v34  ;;  %v17034_v40 = vld [vmem:[#allocation2 + $0x150] sm:$0xff]  ;;  %v17038_v1 = vld [vmem:[#allocation2 + $0x158] sm:$0xff]  ;;  %v17046_v46 = vld [vmem:[#allocation2 + $0x160] sm:$0xff] }
 0x1c2   : > { %12822 = vmatprep.mubr.msk.bf16.mxu0 %vm2240_vm9, %v16902_v25  ;;  %v17050_v7 = vld [vmem:[#allocation2 + $0x168] sm:$0xff]  ;;  %v17058_v17 = vld [vmem:[#allocation2 + $0x170] sm:$0xff]  ;;  %v17062_v20 = vld [vmem:[#allocation2 + $0x178] sm:$0xff] }
 0x1c3   : > { %v17070_v23 = vld [vmem:[#allocation2 + $0x180] sm:$0xff]  ;;  %v17074_v47 = vld [vmem:[#allocation2 + $0x188] sm:$0xff]  ;;  %v17082_v13 = vld [vmem:[#allocation2 + $0x190] sm:$0xff] }
 0x1c4   : > { %19633 = vst [vmem:[#allocation65_spill] sm:$0xff] %v17070_v23  ;;  %19634 = vst [vmem:[#allocation69_spill] sm:$0xff] %v17074_v47  ;;  %v17086_v5 = vld [vmem:[#allocation2 + $0x198] sm:$0xff]  ;;  %v17094_v4 = vld [vmem:[#allocation2 + $0x120] sm:$0xff] }
 0x1c5   : > { %19635 = vst [vmem:[#allocation18_spill] sm:$0xff] %v17082_v13  ;;  %v17096_v6 = vld [vmem:[#allocation2 + $0x1a0] sm:$0xff]  ;;  %v17104_v26 = vld [vmem:[#allocation2 + $0x248] sm:$0xff]  ;;  %v17117_v9 = vld [vmem:[%s19073_s1 + $0x10] sm:$0x3f]  }
 0x1c6   : > { %19636 = vst [vmem:[#allocation19_spill] sm:$0xff] %v17096_v6  ;;  %19637 = vst [vmem:[#allocation71_spill] sm:$0xff] %v17104_v26  ;;  %14618 = vmatprep.subr.msk.bf16.mxu1 %vm2634_vm10, %v17117_v9  ;;  %v17125_v15 = vld [vmem:[#allocation2 + $0x258] sm:$0xff]  ;;  %v17179_v36 = vld [vmem:[#allocation2 + $0x1b0] sm:$0xff] }
 0x1c7   : > { %12303 = vmatmul.mubr.msk.bf16.gmra.mrb[8].mxu1 %vm2240_vm9, %v16910_v12  ;;  %10876 = vst.msk [vmem:[#allocation2 + $0x8] sm:$0xff] %vm2240_vm9, %v17104_v26  ;;  %10878 = vst.msk [vmem:[#allocation2 + $0x18] sm:$0xff] %vm2240_vm9, %v17125_v15  ;;  %v17181_v39 = vld [vmem:[#allocation2 + $0x118] sm:$0xff]  ;;  %v17193_v14 = vld [vmem:[#allocation2 + $0x1c0] sm:$0xff] }
 0x1c8   : > { %12306 = vmatprep.mubr.msk.bf16.mxu1 %vm2240_vm9, %v16914_v38  ;;  %19638 = vst [vmem:[#allocation74_spill] sm:$0xff] %v17179_v36  ;;  %19639 = vst [vmem:[#allocation22_spill] sm:$0xff] %v17181_v39  ;;  %v17191_v21 = vld [vmem:[#allocation2 + $0x1b8] sm:$0xff]  ;;  %v17203_v8 = vld [vmem:[#allocation2 + $0x1c8] sm:$0xff] }
 0x1c9   : > { %12823 = vmatmul.mubr.msk.bf16.gmra.mrb[8].mxu0 %vm2240_vm9, %v16912_v11  ;;  %19640 = vst [vmem:[#allocation24_spill] sm:$0xff] %v17191_v21  ;;  %v17205_v3 = vld [vmem:[#allocation2 + $0x1d0] sm:$0xff]  ;;  %v17215_v24 = vld [vmem:[#allocation2 + $0x1d8] sm:$0xff]  ;;  %v17217_v2 = vld [vmem:[#allocation2 + $0x1e0] sm:$0xff] }
 0x1ca   : > { %12826 = vmatprep.mubr.msk.bf16.mxu0 %vm2240_vm9, %v16916_v51  ;;  %v17227_v0 = vld [vmem:[#allocation2 + $0x1e8] sm:$0xff]  ;;  %v17241_v56 = vld [vmem:[#allocation2 + $0x200] sm:$0xff]  ;;  %v17253_v50 = vld [vmem:[#allocation2 + $0x210] sm:$0xff] }
 0x1cb   : > { %v17263_v26 = vld [vmem:[#allocation2 + $0x218] sm:$0xff] }
 0x1cf   : > { %12307 = vmatmul.mubr.msk.bf16.gmra.mrb[12].mxu1 %vm2240_vm9, %v16933_v53 }
 0x1d0   : > { %12310 = vmatprep.mubr.msk.bf16.mxu1 %vm2240_vm9, %v16935_v29 }
 0x1d1   : > { %12827 = vmatmul.mubr.msk.bf16.gmra.mrb[12].mxu0 %vm2240_vm9, %v16937_v37 }
 0x1d2   : > { %12830 = vmatprep.mubr.msk.bf16.mxu0 %vm2240_vm9, %v16941_v35 }
 0x1d7   : > { %12311 = vmatmul.mubr.msk.bf16.gmra.mrb[16].mxu1 %vm2240_vm9, %v16949_v22 }
 0x1d8   : > { %12314 = vmatprep.mubr.msk.bf16.mxu1 %vm2240_vm9, %v16951_v62 }
 0x1d9   : > { %12831 = vmatmul.mubr.msk.bf16.gmra.mrb[16].mxu0 %vm2240_vm9, %v16953_v32 }
 0x1da   : > { %12834 = vmatprep.mubr.msk.bf16.mxu0 %vm2240_vm9, %v16957_v31 }
 0x1df   : > { %12315 = vmatmul.mubr.msk.bf16.gmra.mrb[20].mxu1 %vm2240_vm9, %v16965_v60 }
 0x1e0   : > { %12318 = vmatprep.mubr.msk.bf16.mxu1 %vm2240_vm9, %v16967_v42 }
 0x1e1   : > { %12835 = vmatmul.mubr.msk.bf16.gmra.mrb[20].mxu0 %vm2240_vm9, %v16969_v10 }
 0x1e2   : > { %12838 = vmatprep.mubr.msk.bf16.mxu0 %vm2240_vm9, %v16973_v63 }
 0x1e7   : > { %12319 = vmatmul.mubr.msk.bf16.gmra.mrb[24].mxu1 %vm2240_vm9, %v16981_v55 }
 0x1e8   : > { %12322 = vmatprep.mubr.msk.bf16.mxu1 %vm2240_vm9, %v16983_v43 }
 0x1e9   : > { %12839 = vmatmul.mubr.msk.bf16.gmra.mrb[24].mxu0 %vm2240_vm9, %v16985_v52 }
 0x1ea   : > { %12842 = vmatprep.mubr.msk.bf16.mxu0 %vm2240_vm9, %v16989_v18 }
 0x1ef   : > { %12323 = vmatmul.mubr.msk.bf16.gmra.mrb[28].mxu1 %vm2240_vm9, %v16997_v58 }
 0x1f0   : > { %12326 = vmatprep.mubr.msk.bf16.mxu1 %vm2240_vm9, %v2380_v44  ;;  %v17229_v44 = vld [vmem:[#allocation2 + $0x1f0] sm:$0xff] }
 0x1f1   : > { %12843 = vmatmul.mubr.msk.bf16.gmra.mrb[28].mxu0 %vm2240_vm9, %v16999_v30 }
 0x1f2   : > { %12846 = vmatprep.mubr.msk.bf16.mxu0 %vm2240_vm9, %v17003_v48 }
 0x1f7   : > { %12327 = vmatmul.mubr.msk.bf16.gmra.mrb[32].mxu1 %vm2240_vm9, %v16856_v49 }
 0x1f8   : > { %12330 = vmatprep.mubr.msk.bf16.mxu1 %vm2240_vm9, %v16872_v41 }
 0x1f9   : > { %12847 = vmatmul.mubr.msk.bf16.gmra.mrb[32].mxu0 %vm2240_vm9, %v17010_v45 }
 0x1fa   : > { %12850 = vmatprep.mubr.msk.bf16.mxu0 %vm2240_vm9, %v17014_v19 }
 0x1ff   : > { %12331 = vmatmul.mubr.msk.bf16.gmra.mrb[36].mxu1 %vm2240_vm9, %v16884_v59 }
 0x200   : > { %12334 = vmatprep.mubr.msk.bf16.mxu1 %vm2240_vm9, %v16898_v34 }
 0x201   : > { %12851 = vmatmul.mubr.msk.bf16.gmra.mrb[36].mxu0 %vm2240_vm9, %v17022_v33 }
 0x202   : > { %12854 = vmatprep.mubr.msk.bf16.mxu0 %vm2240_vm9, %v17026_v28 }
 0x207   : > { %12335 = vmatmul.mubr.msk.bf16.gmra.mrb[40].mxu1 %vm2240_vm9, %v16902_v25 }
 0x208   : > { %12338 = vmatprep.mubr.msk.bf16.mxu1 %vm2240_vm9, %v16912_v11 }
 0x209   : > { %12855 = vmatmul.mubr.msk.bf16.gmra.mrb[40].mxu0 %vm2240_vm9, %v17034_v40 }
 0x20a   : > { %12858 = vmatprep.mubr.msk.bf16.mxu0 %vm2240_vm9, %v17038_v1 }
 0x20f   : > { %12339 = vmatmul.mubr.msk.bf16.gmra.mrb[44].mxu1 %vm2240_vm9, %v16916_v51 }
 0x210   : > { %12342 = vmatprep.mubr.msk.bf16.mxu1 %vm2240_vm9, %v16937_v37 }
 0x211   : > { %12859 = vmatmul.mubr.msk.bf16.gmra.mrb[44].mxu0 %vm2240_vm9, %v17046_v46 }
 0x212   : > { %12862 = vmatprep.mubr.msk.bf16.mxu0 %vm2240_vm9, %v17050_v7 }
 0x217   : > { %12343 = vmatmul.mubr.msk.bf16.gmra.mrb[48].mxu1 %vm2240_vm9, %v16941_v35 }
 0x218   : > { %12346 = vmatprep.mubr.msk.bf16.mxu1 %vm2240_vm9, %v16953_v32 }
 0x219   : > { %12863 = vmatmul.mubr.msk.bf16.gmra.mrb[48].mxu0 %vm2240_vm9, %v17058_v17 }
 0x21a   : > { %12866 = vmatprep.mubr.msk.bf16.mxu0 %vm2240_vm9, %v17062_v20 }
 0x21f   : > { %12347 = vmatmul.mubr.msk.bf16.gmra.mrb[52].mxu1 %vm2240_vm9, %v16957_v31 }
 0x220   : > { %12350 = vmatprep.mubr.msk.bf16.mxu1 %vm2240_vm9, %v16969_v10 }
 0x221   : > { %12867 = vmatmul.mubr.msk.bf16.gmra.mrb[52].mxu0 %vm2240_vm9, %v17070_v23 }
 0x222   : > { %12870 = vmatprep.mubr.msk.bf16.mxu0 %vm2240_vm9, %v17074_v47 }
 0x227   : > { %12351 = vmatmul.mubr.msk.bf16.gmra.mrb[56].mxu1 %vm2240_vm9, %v16973_v63 }
 0x228   : > { %12354 = vmatprep.mubr.msk.bf16.mxu1 %vm2240_vm9, %v16985_v52 }
 0x229   : > { %12871 = vmatmul.mubr.msk.bf16.gmra.mrb[56].mxu0 %vm2240_vm9, %v17082_v13 }
 0x22a   : > { %12874 = vmatprep.mubr.msk.bf16.mxu0 %vm2240_vm9, %v17086_v5 }
 0x22f   : > { %12355 = vmatmul.mubr.msk.bf16.gmra.mrb[60].mxu1 %vm2240_vm9, %v16989_v18 }
 0x230   : > { %12358 = vmatprep.mubr.msk.bf16.mxu1 %vm2240_vm9, %v17094_v4 }
 0x231   : > { %12875 = vmatmul.mubr.msk.bf16.gmra.mrb[60].mxu0 %vm2240_vm9, %v17096_v6 }
 0x232   : > { %12944 = vmatprep.mubr.msk.bf16.mxu0 %vm2240_vm9, %v16872_v41 }
 0x237   : > { %12359 = vmatmul.mubr.msk.bf16.gmra.mrb[64].mxu1 %vm2240_vm9, %v17003_v48 }
 0x238   : > { %12362 = vmatprep.mubr.msk.bf16.mxu1 %vm2240_vm9, %v17010_v45 }
 0x239   : > { %12945 = vmatmul.mubr.msk.bf16.vlgmr.msra.gmra.mrb[0].mxu0 %vm2240_vm9, %v16884_v59 }
 0x23a   : > { %13073 = vmatpush3.bf16.msra.mxu0 %v8154_v54  ;;  %12948 = vmatprep.mubr.msk.bf16.mxu0 %vm2240_vm9, %v16898_v34  ;;  %v17239_v54 = vld [vmem:[#allocation2 + $0x1f8] sm:$0xff] }
 0x23f   : > { %12363 = vmatmul.mubr.msk.bf16.gmra.mrb[68].mxu1 %vm2240_vm9, %v17014_v19 }
 0x240   : > { %12366 = vmatprep.mubr.msk.bf16.mxu1 %vm2240_vm9, %v17022_v33 }
 0x241   : > { %12949 = vmatmul.mubr.msk.bf16.gmra.mrb[4].mxu0 %vm2240_vm9, %v16902_v25 }
 0x242   : > { %12952 = vmatprep.mubr.msk.bf16.mxu0 %vm2240_vm9, %v16912_v11 }
 0x247   : > { %12367 = vmatmul.mubr.msk.bf16.gmra.mrb[72].mxu1 %vm2240_vm9, %v17026_v28 }
 0x248   : > { %12370 = vmatprep.mubr.msk.bf16.mxu1 %vm2240_vm9, %v17034_v40 }
 0x249   : > { %12953 = vmatmul.mubr.msk.bf16.gmra.mrb[8].mxu0 %vm2240_vm9, %v16916_v51 }
 0x24a   : > { %12956 = vmatprep.mubr.msk.bf16.mxu0 %vm2240_vm9, %v16937_v37 }
 0x24f   : > { %12371 = vmatmul.mubr.msk.bf16.gmra.mrb[76].mxu1 %vm2240_vm9, %v17038_v1 }
 0x250   : > { %12374 = vmatprep.mubr.msk.bf16.mxu1 %vm2240_vm9, %v17046_v46 }
 0x251   : > { %12957 = vmatmul.mubr.msk.bf16.gmra.mrb[12].mxu0 %vm2240_vm9, %v16941_v35 }
 0x252   : > { %12960 = vmatprep.mubr.msk.bf16.mxu0 %vm2240_vm9, %v16953_v32 }
 0x257   : > { %12375 = vmatmul.mubr.msk.bf16.gmra.mrb[80].mxu1 %vm2240_vm9, %v17050_v7 }
 0x258   : > { %12378 = vmatprep.mubr.msk.bf16.mxu1 %vm2240_vm9, %v17058_v17 }
 0x259   : > { %12961 = vmatmul.mubr.msk.bf16.gmra.mrb[16].mxu0 %vm2240_vm9, %v16957_v31 }
 0x25a   : > { %12964 = vmatprep.mubr.msk.bf16.mxu0 %vm2240_vm9, %v16969_v10 }
 0x25f   : > { %12379 = vmatmul.mubr.msk.bf16.gmra.mrb[84].mxu1 %vm2240_vm9, %v17062_v20 }
 0x260   : > { %12382 = vmatprep.mubr.msk.bf16.mxu1 %vm2240_vm9, %v17070_v23 }
 0x261   : > { %12965 = vmatmul.mubr.msk.bf16.gmra.mrb[20].mxu0 %vm2240_vm9, %v16973_v63 }
 0x262   : > { %12968 = vmatprep.mubr.msk.bf16.mxu0 %vm2240_vm9, %v16985_v52 }
 0x267   : > { %12383 = vmatmul.mubr.msk.bf16.gmra.mrb[88].mxu1 %vm2240_vm9, %v17074_v47 }
 0x268   : > { %12386 = vmatprep.mubr.msk.bf16.mxu1 %vm2240_vm9, %v17082_v13 }
 0x269   : > { %12969 = vmatmul.mubr.msk.bf16.gmra.mrb[24].mxu0 %vm2240_vm9, %v16989_v18 }
 0x26a   : > { %12972 = vmatprep.mubr.msk.bf16.mxu0 %vm2240_vm9, %v16999_v30 }
 0x26f   : > { %12387 = vmatmul.mubr.msk.bf16.gmra.mrb[92].mxu1 %vm2240_vm9, %v17086_v5 }
 0x270   : > { %12390 = vmatprep.mubr.msk.bf16.mxu1 %vm2240_vm9, %v17179_v36  ;;  %v17265_v36 = vld [vmem:[#allocation2 + $0x220] sm:$0xff] }
 0x271   : > { %12973 = vmatmul.mubr.msk.bf16.gmra.mrb[28].mxu0 %vm2240_vm9, %v17181_v39  ;;  %v17251_v39 = vld [vmem:[#allocation2 + $0x208] sm:$0xff] }
 0x272   : > { %12976 = vmatprep.mubr.msk.bf16.mxu0 %vm2240_vm9, %v17010_v45 }
 0x277   : > { %12391 = vmatmul.mubr.msk.bf16.gmra.mrb[96].mxu1 %vm2240_vm9, %v17191_v21  ;;  %v17273_v21 = vld [vmem:[#allocation2 + $0x80] sm:$0xff] }
 0x278   : > { %12394 = vmatprep.mubr.msk.bf16.mxu1 %vm2240_vm9, %v17193_v14 }
 0x279   : > { %12977 = vmatmul.mubr.msk.bf16.gmra.mrb[32].mxu0 %vm2240_vm9, %v17014_v19 }
 0x27a   : > { %12980 = vmatprep.mubr.msk.bf16.mxu0 %vm2240_vm9, %v17022_v33 }
 0x27f   : > { %12395 = vmatmul.mubr.msk.bf16.gmra.mrb[100].mxu1 %vm2240_vm9, %v17203_v8 }
 0x280   : > { %12398 = vmatprep.mubr.msk.bf16.mxu1 %vm2240_vm9, %v17205_v3 }
 0x281   : > { %12981 = vmatmul.mubr.msk.bf16.gmra.mrb[36].mxu0 %vm2240_vm9, %v17026_v28 }
 0x282   : > { %12984 = vmatprep.mubr.msk.bf16.mxu0 %vm2240_vm9, %v17034_v40 }
 0x287   : > { %12399 = vmatmul.mubr.msk.bf16.gmra.mrb[104].mxu1 %vm2240_vm9, %v17215_v24 }
 0x288   : > { %12402 = vmatprep.mubr.msk.bf16.mxu1 %vm2240_vm9, %v17217_v2 }
 0x289   : > { %12985 = vmatmul.mubr.msk.bf16.gmra.mrb[40].mxu0 %vm2240_vm9, %v17038_v1 }
 0x28a   : > { %12988 = vmatprep.mubr.msk.bf16.mxu0 %vm2240_vm9, %v17046_v46 }
 0x28f   : > { %12403 = vmatmul.mubr.msk.bf16.gmra.mrb[108].mxu1 %vm2240_vm9, %v17227_v0 }
 0x290   : > { %12406 = vmatprep.mubr.msk.bf16.mxu1 %vm2240_vm9, %v17229_v44 }
 0x291   : > { %12989 = vmatmul.mubr.msk.bf16.gmra.mrb[44].mxu0 %vm2240_vm9, %v17050_v7 }
 0x292   : > { %12992 = vmatprep.mubr.msk.bf16.mxu0 %vm2240_vm9, %v17058_v17 }
 0x297   : > { %12407 = vmatmul.mubr.msk.bf16.gmra.mrb[112].mxu1 %vm2240_vm9, %v17239_v54 }
 0x298   : > { %12410 = vmatprep.mubr.msk.bf16.mxu1 %vm2240_vm9, %v17241_v56 }
 0x299   : > { %12993 = vmatmul.mubr.msk.bf16.gmra.mrb[48].mxu0 %vm2240_vm9, %v17062_v20 }
 0x29a   : > { %12996 = vmatprep.mubr.msk.bf16.mxu0 %vm2240_vm9, %v17070_v23  ;;  %v17275_v23 = vld [vmem:[#allocation2 + $0x2c0] sm:$0xff] }
 0x29b   : > { %10891 = vst.msk [vmem:[#allocation2 + $0x80] sm:$0xff] %vm2240_vm9, %v17275_v23 }
 0x29f   : > { %12411 = vmatmul.mubr.msk.bf16.gmra.mrb[116].mxu1 %vm2240_vm9, %v17251_v39 }
 0x2a0   : > { %12414 = vmatprep.mubr.msk.bf16.mxu1 %vm2240_vm9, %v17253_v50 }
 0x2a1   : > { %12997 = vmatmul.mubr.msk.bf16.gmra.mrb[52].mxu0 %vm2240_vm9, %v17074_v47  ;;  %v17283_v47 = vld [vmem:[#allocation2 + $0x1a8] sm:$0xff] }
 0x2a2   : > { %13000 = vmatprep.mubr.msk.bf16.mxu0 %vm2240_vm9, %v17082_v13  ;;  %v17281_v13 = vld [vmem:[#allocation2 + $0x228] sm:$0xff]  ;;  %19641 = vst [vmem:[#allocation27_spill] sm:$0xff] %v17283_v47 }
 0x2a7   : > { %12415 = vmatmul.mubr.msk.bf16.gmra.mrb[120].mxu1 %vm2240_vm9, %v17263_v26 }
 0x2a8   : > { %12418 = vmatprep.mubr.msk.bf16.mxu1 %vm2240_vm9, %v17265_v36 }
 0x2a9   : > { %13001 = vmatmul.mubr.msk.bf16.gmra.mrb[56].mxu0 %vm2240_vm9, %v17086_v5 }
 0x2aa   : > { %13004 = vmatprep.mubr.msk.bf16.mxu0 %vm2240_vm9, %v17096_v6  ;;  %v4390_v6 = vsel %vm2634_vm10, %v17117_v9, 0  ;;  %v17627_v9 = vld [vmem:[#allocation2 + $0xb8] sm:$0xff] }
 0x2af   : > { %12419 = vmatmul.mubr.msk.bf16.gmra.mrb[124].mxu1 %vm2240_vm9, %v17281_v13 }
 0x2b0   : > { %12424 = vmatprep.mubr.msk.bf16.mxu1 %vm2240_vm9, %v16861_v27  ;;  %v17304_v27 = vld [vmem:[%s19073_s1 + $0x38] sm:$0x3f]  }
 0x2b1   : > { %13005 = vmatmul.mubr.msk.bf16.gmra.mrb[60].mxu0 %vm2240_vm9, %v17283_v47  ;;  %14624 = vmatprep.subr.msk.bf16.mxu0 %vm2634_vm10, %v17304_v27  ;;  %v7921_v47 = vld [vmem:[#allocation2 + $0x240] sm:$0xff] }
 0x2b2   : > { %13008 = vmatprep.mubr.msk.bf16.mxu0 %vm2240_vm9, %v17193_v14 }
 0x2b7   : > { %12425 = vmatmul.mubr.msk.bf16.vlgmr.msra.gmra.mrb[0].mxu1 %vm2240_vm9, %v16878_v57  ;;  %v17352_v57 = vld [vmem:[#allocation2 + $0x230] sm:$0xff] }
 0x2b8   : > { %12553 = vmatpush3.bf16.msra.mxu1 %v4390_v6  ;;  %12428 = vmatprep.mubr.msk.bf16.mxu1 %vm2240_vm9, %v16894_v61  ;;  %v17619_v6 = vld [vmem:[#allocation2 + $0x2f0] sm:$0xff] }
 0x2b9   : > { %13009 = vmatmul.mubr.msk.bf16.gmra.mrb[64].mxu0 %vm2240_vm9, %v17203_v8 }
 0x2ba   : > { %13012 = vmatprep.mubr.msk.bf16.mxu0 %vm2240_vm9, %v17205_v3 }
 0x2bf   : > { %12429 = vmatmul.mubr.msk.bf16.gmra.mrb[4].mxu1 %vm2240_vm9, %v16896_v16  ;;  %v17360_v16 = vld [vmem:[#allocation2 + $0x238] sm:$0xff] }
 0x2c0   : > { %12432 = vmatprep.mubr.msk.bf16.mxu1 %vm2240_vm9, %v16910_v12  ;;  %19642 = vst [vmem:[#allocation29_spill] sm:$0xff] %v17360_v16  ;;  %v17364_v12 = vld [vmem:[#allocation2 + $0x250] sm:$0xff] }
 0x2c1   : > { %13013 = vmatmul.mubr.msk.bf16.gmra.mrb[68].mxu0 %vm2240_vm9, %v17215_v24 }
 0x2c2   : > { %13016 = vmatprep.mubr.msk.bf16.mxu0 %vm2240_vm9, %v17217_v2 }
 0x2c7   : > { %12433 = vmatmul.mubr.msk.bf16.gmra.mrb[8].mxu1 %vm2240_vm9, %v16914_v38  ;;  %v17374_v38 = vld [vmem:[#allocation2 + $0x260] sm:$0xff] }
 0x2c8   : > { %12436 = vmatprep.mubr.msk.bf16.mxu1 %vm2240_vm9, %v16933_v53  ;;  %v17386_v53 = vld [vmem:[#allocation2 + $0x270] sm:$0xff] }
 0x2c9   : > { %13017 = vmatmul.mubr.msk.bf16.gmra.mrb[72].mxu0 %vm2240_vm9, %v17227_v0 }
 0x2ca   : > { %13020 = vmatprep.mubr.msk.bf16.mxu0 %vm2240_vm9, %v17229_v44 }
 0x2cf   : > { %12437 = vmatmul.mubr.msk.bf16.gmra.mrb[12].mxu1 %vm2240_vm9, %v16935_v29  ;;  %v17430_v29 = vld [vmem:[#allocation2 + $0x2a8] sm:$0xff] }
 0x2d0   : > { %12440 = vmatprep.mubr.msk.bf16.mxu1 %vm2240_vm9, %v16949_v22  ;;  %v17452_v22 = vld [vmem:[#allocation2 + $0x2c8] sm:$0xff] }
 0x2d1   : > { %13021 = vmatmul.mubr.msk.bf16.gmra.mrb[76].mxu0 %vm2240_vm9, %v17239_v54 }
 0x2d2   : > { %13024 = vmatprep.mubr.msk.bf16.mxu0 %vm2240_vm9, %v17241_v56 }
 0x2d7   : > { %12441 = vmatmul.mubr.msk.bf16.gmra.mrb[16].mxu1 %vm2240_vm9, %v16951_v62  ;;  %v17460_v62 = vld [vmem:[#allocation2 + $0x10] sm:$0xff] }
 0x2d8   : > { %12444 = vmatprep.mubr.msk.bf16.mxu1 %vm2240_vm9, %v16965_v60  ;;  %10877 = vst.msk [vmem:[#allocation2 + $0x10] sm:$0xff] %vm2240_vm9, %v17364_v12  ;;  %v17481_v60 = vld [vmem:[#allocation2 + $0x20] sm:$0xff] }
 0x2d9   : > { %13025 = vmatmul.mubr.msk.bf16.gmra.mrb[80].mxu0 %vm2240_vm9, %v17251_v39  ;;  %10879 = vst.msk [vmem:[#allocation2 + $0x20] sm:$0xff] %vm2240_vm9, %v17374_v38 }
 0x2da   : > { %13028 = vmatprep.mubr.msk.bf16.mxu0 %vm2240_vm9, %v17253_v50 }
 0x2df   : > { %12445 = vmatmul.mubr.msk.bf16.gmra.mrb[20].mxu1 %vm2240_vm9, %v16967_v42  ;;  %v17487_v42 = vld [vmem:[#allocation2 + $0x28] sm:$0xff] }
 0x2e0   : > { %12448 = vmatprep.mubr.msk.bf16.mxu1 %vm2240_vm9, %v16981_v55  ;;  %v17513_v55 = vld [vmem:[#allocation2 + $0x40] sm:$0xff] }
 0x2e1   : > { %13029 = vmatmul.mubr.msk.bf16.gmra.mrb[84].mxu0 %vm2240_vm9, %v17263_v26 }
 0x2e2   : > { %13032 = vmatprep.mubr.msk.bf16.mxu0 %vm2240_vm9, %v17265_v36 }
 0x2e7   : > { %12449 = vmatmul.mubr.msk.bf16.gmra.mrb[24].mxu1 %vm2240_vm9, %v16983_v43  ;;  %v17519_v43 = vld [vmem:[#allocation2 + $0x48] sm:$0xff] }
 0x2e8   : > { %12452 = vmatprep.mubr.msk.bf16.mxu1 %vm2240_vm9, %v16997_v58  ;;  %v17545_v58 = vld [vmem:[#allocation2 + $0x60] sm:$0xff] }
 0x2e9   : > { %13033 = vmatmul.mubr.msk.bf16.gmra.mrb[88].mxu0 %vm2240_vm9, %v17281_v13 }
 0x2ea   : > { %13036 = vmatprep.mubr.msk.bf16.mxu0 %vm2240_vm9, %v17352_v57 }
 0x2ef   : > { %12453 = vmatmul.mubr.msk.bf16.gmra.mrb[28].mxu1 %vm2240_vm9, %v17273_v21 }
 0x2f0   : > { %12456 = vmatprep.mubr.msk.bf16.mxu1 %vm2240_vm9, %v16856_v49  ;;  %v17382_v49 = vld [vmem:[#allocation2 + $0x268] sm:$0xff] }
 0x2f1   : > { %13037 = vmatmul.mubr.msk.bf16.gmra.mrb[92].mxu0 %vm2240_vm9, %v17360_v16  ;;  %10880 = vst.msk [vmem:[#allocation2 + $0x28] sm:$0xff] %vm2240_vm9, %v17382_v49  ;;  %v17723_v16 = vld [vmem:[#allocation2 + $0x340] sm:$0xff] }
 0x2f2   : > { %13040 = vmatprep.mubr.msk.bf16.mxu0 %vm2240_vm9, %v17364_v12 }
 0x2f7   : > { %12457 = vmatmul.mubr.msk.bf16.gmra.mrb[32].mxu1 %vm2240_vm9, %v16872_v41  ;;  %v17394_v41 = vld [vmem:[#allocation2 + $0x278] sm:$0xff] }
 0x2f8   : > { %12460 = vmatprep.mubr.msk.bf16.mxu1 %vm2240_vm9, %v16884_v59  ;;  %v17398_v59 = vld [vmem:[#allocation2 + $0x280] sm:$0xff] }
 0x2f9   : > { %13041 = vmatmul.mubr.msk.bf16.gmra.mrb[96].mxu0 %vm2240_vm9, %v17125_v15  ;;  %10883 = vst.msk [vmem:[#allocation2 + $0x40] sm:$0xff] %vm2240_vm9, %v17398_v59 }
 0x2fa   : > { %13044 = vmatprep.mubr.msk.bf16.mxu0 %vm2240_vm9, %v17374_v38 }
 0x2ff   : > { %12461 = vmatmul.mubr.msk.bf16.gmra.mrb[36].mxu1 %vm2240_vm9, %v16898_v34  ;;  %v17406_v34 = vld [vmem:[#allocation2 + $0x288] sm:$0xff] }
 0x300   : > { %12464 = vmatprep.mubr.msk.bf16.mxu1 %vm2240_vm9, %v16902_v25  ;;  %v17410_v25 = vld [vmem:[#allocation2 + $0x290] sm:$0xff]  ;;  %10884 = vst.msk [vmem:[#allocation2 + $0x48] sm:$0xff] %vm2240_vm9, %v17406_v34 }
 0x301   : > { %13045 = vmatmul.mubr.msk.bf16.gmra.mrb[100].mxu0 %vm2240_vm9, %v17382_v49 }
 0x302   : > { %13048 = vmatprep.mubr.msk.bf16.mxu0 %vm2240_vm9, %v17386_v53 }
 0x307   : > { %12465 = vmatmul.mubr.msk.bf16.gmra.mrb[40].mxu1 %vm2240_vm9, %v16912_v11  ;;  %v17418_v11 = vld [vmem:[#allocation2 + $0x298] sm:$0xff] }
 0x308   : > { %12468 = vmatprep.mubr.msk.bf16.mxu1 %vm2240_vm9, %v16916_v51  ;;  %v17422_v51 = vld [vmem:[#allocation2 + $0x2a0] sm:$0xff] }
 0x309   : > { %13049 = vmatmul.mubr.msk.bf16.gmra.mrb[104].mxu0 %vm2240_vm9, %v17394_v41  ;;  %10887 = vst.msk [vmem:[#allocation2 + $0x60] sm:$0xff] %vm2240_vm9, %v17422_v51 }
 0x30a   : > { %13052 = vmatprep.mubr.msk.bf16.mxu0 %vm2240_vm9, %v17398_v59 }
 0x30f   : > { %12469 = vmatmul.mubr.msk.bf16.gmra.mrb[44].mxu1 %vm2240_vm9, %v16937_v37  ;;  %v17434_v37 = vld [vmem:[#allocation2 + $0x2b0] sm:$0xff] }
 0x310   : > { %12472 = vmatprep.mubr.msk.bf16.mxu1 %vm2240_vm9, %v16941_v35  ;;  %v17442_v35 = vld [vmem:[#allocation2 + $0x2b8] sm:$0xff] }
 0x311   : > { %13053 = vmatmul.mubr.msk.bf16.gmra.mrb[108].mxu0 %vm2240_vm9, %v17406_v34 }
 0x312   : > { %13056 = vmatprep.mubr.msk.bf16.mxu0 %vm2240_vm9, %v17410_v25 }
 0x317   : > { %12473 = vmatmul.mubr.msk.bf16.gmra.mrb[48].mxu1 %vm2240_vm9, %v16953_v32  ;;  %v9094_v32 = vsel %vm2634_vm10, %v17304_v27, 0  ;;  %v17647_v27 = vld [vmem:[#allocation2 + $0xc8] sm:$0xff] }
 0x318   : > { %12476 = vmatprep.mubr.msk.bf16.mxu1 %vm2240_vm9, %v16957_v31  ;;  %v17473_v31 = vld [vmem:[%s19073_s1 + $0x18] sm:$0x3f]  }
 0x319   : > { %13057 = vmatmul.mubr.msk.bf16.gmra.mrb[112].mxu0 %vm2240_vm9, %v17418_v11  ;;  %14619 = vmatprep.subr.msk.bf16.mxu1 %vm2634_vm10, %v17473_v31 }
 0x31a   : > { %13060 = vmatprep.mubr.msk.bf16.mxu0 %vm2240_vm9, %v17422_v51 }
 0x31f   : > { %12477 = vmatmul.mubr.msk.bf16.gmra.mrb[52].mxu1 %vm2240_vm9, %v16969_v10  ;;  %v17497_v10 = vld [vmem:[#allocation2 + $0x30] sm:$0xff] }
 0x320   : > { %12480 = vmatprep.mubr.msk.bf16.mxu1 %vm2240_vm9, %v16973_v63  ;;  %10881 = vst.msk [vmem:[#allocation2 + $0x30] sm:$0xff] %vm2240_vm9, %v17386_v53  ;;  %v17503_v63 = vld [vmem:[#allocation2 + $0x38] sm:$0xff] }
 0x321   : > { %13061 = vmatmul.mubr.msk.bf16.gmra.mrb[116].mxu0 %vm2240_vm9, %v17430_v29  ;;  %10882 = vst.msk [vmem:[#allocation2 + $0x38] sm:$0xff] %vm2240_vm9, %v17394_v41 }
 0x322   : > { %13064 = vmatprep.mubr.msk.bf16.mxu0 %vm2240_vm9, %v17434_v37 }
 0x327   : > { %12481 = vmatmul.mubr.msk.bf16.gmra.mrb[56].mxu1 %vm2240_vm9, %v16985_v52  ;;  %v17529_v52 = vld [vmem:[#allocation2 + $0x50] sm:$0xff] }
 0x328   : > { %12484 = vmatprep.mubr.msk.bf16.mxu1 %vm2240_vm9, %v16989_v18  ;;  %10885 = vst.msk [vmem:[#allocation2 + $0x50] sm:$0xff] %vm2240_vm9, %v17410_v25  ;;  %v17535_v18 = vld [vmem:[#allocation2 + $0x58] sm:$0xff] }
 0x329   : > { %13065 = vmatmul.mubr.msk.bf16.gmra.mrb[120].mxu0 %vm2240_vm9, %v17442_v35  ;;  %10886 = vst.msk [vmem:[#allocation2 + $0x58] sm:$0xff] %vm2240_vm9, %v17418_v11 }
 0x32a   : > { %13068 = vmatprep.mubr.msk.bf16.mxu0 %vm2240_vm9, %v17275_v23  ;;  %v17607_v23 = vld [vmem:[#allocation2 + $0xa8] sm:$0xff] }
 0x32f   : > { %12485 = vmatmul.mubr.msk.bf16.gmra.mrb[60].mxu1 %vm2240_vm9, %v16999_v30  ;;  %v17551_v30 = vld [vmem:[#allocation2 + $0x68] sm:$0xff] }
 0x330   : > { %12488 = vmatprep.mubr.msk.bf16.mxu1 %vm2240_vm9, %v17003_v48  ;;  %10888 = vst.msk [vmem:[#allocation2 + $0x68] sm:$0xff] %vm2240_vm9, %v17430_v29 }
 0x331   : > { %13069 = vmatmul.mubr.msk.bf16.gmra.mrb[124].mxu0 %vm2240_vm9, %v17452_v22 }
 0x332   : > { %13074 = vmatprep.mubr.msk.bf16.mxu0 %vm2240_vm9, %v17094_v4  ;;  %v17617_v4 = vld [vmem:[#allocation2 + $0xb0] sm:$0xff] }
 0x333   : > { %10897 = vst.msk [vmem:[#allocation2 + $0xb0] sm:$0xff] %vm2240_vm9, %v17619_v6 }
 0x337   : > { %12489 = vmatmul.mubr.msk.bf16.gmra.mrb[64].mxu1 %vm2240_vm9, %v17010_v45 }
 0x338   : > { %12492 = vmatprep.mubr.msk.bf16.mxu1 %vm2240_vm9, %v17014_v19 }
 0x339   : > { %13075 = vmatmul.mubr.msk.bf16.vlgmr.msra.gmra.mrb[0].mxu0 %vm2240_vm9, %v17003_v48  ;;  %v19643_v48 = vld [vmem:[#allocation65_spill] sm:$0xff] }
 0x33a   : > { %13203 = vmatpush3.bf16.msra.mxu0 %v9094_v32  ;;  %13078 = vmatprep.mubr.msk.bf16.mxu0 %vm2240_vm9, %v17010_v45  ;;  %v19644_v45 = vld [vmem:[#allocation69_spill] sm:$0xff] }
 0x33b   : > { %v17667_v32 = vld [vmem:[#allocation2 + $0xd8] sm:$0xff] }
 0x33f   : > { %12493 = vmatmul.mubr.msk.bf16.gmra.mrb[68].mxu1 %vm2240_vm9, %v17022_v33 }
 0x340   : > { %12496 = vmatprep.mubr.msk.bf16.mxu1 %vm2240_vm9, %v17026_v28 }
 0x341   : > { %13079 = vmatmul.mubr.msk.bf16.gmra.mrb[4].mxu0 %vm2240_vm9, %v17014_v19  ;;  %v17561_v19 = vld [vmem:[#allocation2 + $0x70] sm:$0xff] }
 0x342   : > { %13082 = vmatprep.mubr.msk.bf16.mxu0 %vm2240_vm9, %v17022_v33  ;;  %10889 = vst.msk [vmem:[#allocation2 + $0x70] sm:$0xff] %vm2240_vm9, %v17434_v37  ;;  %v17567_v33 = vld [vmem:[#allocation2 + $0x78] sm:$0xff] }
 0x343   : > { %10890 = vst.msk [vmem:[#allocation2 + $0x78] sm:$0xff] %vm2240_vm9, %v17442_v35 }
 0x347   : > { %12497 = vmatmul.mubr.msk.bf16.gmra.mrb[72].mxu1 %vm2240_vm9, %v17034_v40 }
 0x348   : > { %12500 = vmatprep.mubr.msk.bf16.mxu1 %vm2240_vm9, %v17038_v1 }
 0x349   : > { %13083 = vmatmul.mubr.msk.bf16.gmra.mrb[8].mxu0 %vm2240_vm9, %v17026_v28  ;;  %v19645_v28 = vld [vmem:[#allocation18_spill] sm:$0xff] }
 0x34a   : > { %13086 = vmatprep.mubr.msk.bf16.mxu0 %vm2240_vm9, %v17034_v40  ;;  %v17579_v40 = vld [vmem:[#allocation2 + $0x88] sm:$0xff] }
 0x34b   : > { %10892 = vst.msk [vmem:[#allocation2 + $0x88] sm:$0xff] %vm2240_vm9, %v17452_v22  ;;  %v17649_v22 = vld [vmem:[#allocation2 + $0x308] sm:$0xff] }
 0x34c   : > { %10900 = vst.msk [vmem:[#allocation2 + $0xc8] sm:$0xff] %vm2240_vm9, %v17649_v22 }
 0x34f   : > { %12501 = vmatmul.mubr.msk.bf16.gmra.mrb[76].mxu1 %vm2240_vm9, %v17046_v46 }
 0x350   : > { %12504 = vmatprep.mubr.msk.bf16.mxu1 %vm2240_vm9, %v17050_v7 }
 0x351   : > { %13087 = vmatmul.mubr.msk.bf16.gmra.mrb[12].mxu0 %vm2240_vm9, %v17038_v1  ;;  %v19646_v1 = vld [vmem:[#allocation19_spill] sm:$0xff] }
 0x352   : > { %13090 = vmatprep.mubr.msk.bf16.mxu0 %vm2240_vm9, %v17046_v46  ;;  %v19647_v46 = vld [vmem:[#allocation24_spill] sm:$0xff] }
 0x357   : > { %12505 = vmatmul.mubr.msk.bf16.gmra.mrb[80].mxu1 %vm2240_vm9, %v17058_v17 }
 0x358   : > { %12508 = vmatprep.mubr.msk.bf16.mxu1 %vm2240_vm9, %v17062_v20 }
 0x359   : > { %13091 = vmatmul.mubr.msk.bf16.gmra.mrb[16].mxu0 %vm2240_vm9, %v17050_v7  ;;  %v19648_v7 = vld [vmem:[#allocation74_spill] sm:$0xff] }
 0x35a   : > { %13094 = vmatprep.mubr.msk.bf16.mxu0 %vm2240_vm9, %v17058_v17  ;;  %v17597_v17 = vld [vmem:[#allocation2 + $0xa0] sm:$0xff] }
 0x35f   : > { %12509 = vmatmul.mubr.msk.bf16.gmra.mrb[84].mxu1 %vm2240_vm9, %v19643_v48 }
 0x360   : > { %12512 = vmatprep.mubr.msk.bf16.mxu1 %vm2240_vm9, %v19644_v45 }
 0x361   : > { %13095 = vmatmul.mubr.msk.bf16.gmra.mrb[20].mxu0 %vm2240_vm9, %v17062_v20  ;;  %v17599_v20 = vld [vmem:[#allocation2 + $0x2e0] sm:$0xff] }
 0x362   : > { %13098 = vmatprep.mubr.msk.bf16.mxu0 %vm2240_vm9, %v19643_v48  ;;  %10895 = vst.msk [vmem:[#allocation2 + $0xa0] sm:$0xff] %vm2240_vm9, %v17599_v20  ;;  %v17669_v48 = vld [vmem:[#allocation2 + $0x318] sm:$0xff] }
 0x363   : > { %10902 = vst.msk [vmem:[#allocation2 + $0xd8] sm:$0xff] %vm2240_vm9, %v17669_v48 }
 0x367   : > { %12513 = vmatmul.mubr.msk.bf16.gmra.mrb[88].mxu1 %vm2240_vm9, %v19645_v28 }
 0x368   : > { %12516 = vmatprep.mubr.msk.bf16.mxu1 %vm2240_vm9, %v17086_v5 }
 0x369   : > { %13099 = vmatmul.mubr.msk.bf16.gmra.mrb[24].mxu0 %vm2240_vm9, %v19644_v45  ;;  %v17687_v45 = vld [vmem:[#allocation2 + $0xe8] sm:$0xff] }
 0x36a   : > { %13102 = vmatprep.mubr.msk.bf16.mxu0 %vm2240_vm9, %v19645_v28  ;;  %v17689_v28 = vld [vmem:[#allocation2 + $0x328] sm:$0xff] }
 0x36b   : > { %10904 = vst.msk [vmem:[#allocation2 + $0xe8] sm:$0xff] %vm2240_vm9, %v17689_v28 }
 0x36f   : > { %12517 = vmatmul.mubr.msk.bf16.gmra.mrb[92].mxu1 %vm2240_vm9, %v19646_v1  ;;  %v17707_v1 = vld [vmem:[#allocation2 + $0xf8] sm:$0xff] }
 0x370   : > { %12520 = vmatprep.mubr.msk.bf16.mxu1 %vm2240_vm9, %v19647_v46 }
 0x371   : > { %13103 = vmatmul.mubr.msk.bf16.gmra.mrb[28].mxu0 %vm2240_vm9, %v17086_v5  ;;  %v17609_v5 = vld [vmem:[#allocation2 + $0x2e8] sm:$0xff] }
 0x372   : > { %13106 = vmatprep.mubr.msk.bf16.mxu0 %vm2240_vm9, %v19648_v7  ;;  %10896 = vst.msk [vmem:[#allocation2 + $0xa8] sm:$0xff] %vm2240_vm9, %v17609_v5  ;;  %v17721_v7 = vld [vmem:[#allocation2 + $0x350] sm:$0xff] }
 0x377   : > { %12521 = vmatmul.mubr.msk.bf16.gmra.mrb[96].mxu1 %vm2240_vm9, %v17193_v14 }
 0x378   : > { %12524 = vmatprep.mubr.msk.bf16.mxu1 %vm2240_vm9, %v17203_v8 }
 0x379   : > { %13107 = vmatmul.mubr.msk.bf16.gmra.mrb[32].mxu0 %vm2240_vm9, %v19647_v46  ;;  %v17709_v46 = vld [vmem:[#allocation2 + $0x338] sm:$0xff] }
 0x37a   : > { %13110 = vmatprep.mubr.msk.bf16.mxu0 %vm2240_vm9, %v17193_v14  ;;  %v17629_v14 = vld [vmem:[#allocation2 + $0x2f8] sm:$0xff]  ;;  %19649 = vst [vmem:[#allocation50_spill] sm:$0xff] %v17709_v46  ;;  %10906 = vst.msk [vmem:[#allocation2 + $0xf8] sm:$0xff] %vm2240_vm9, %v17709_v46 }
 0x37b   : > { %10898 = vst.msk [vmem:[#allocation2 + $0xb8] sm:$0xff] %vm2240_vm9, %v17629_v14  ;;  %v10874_v46 = vld [vmem:[#allocation2 + $0x358] sm:$0xff] }
 0x37c   : > { %10910 = vst.msk [vmem:[#allocation2 + $0x118] sm:$0xff] %vm2240_vm9, %v10874_v46  ;;  %v17756_v46 = vld [vmem:[%s19073_s1 + $0x40] sm:$0x3f]  }
 0x37d   : > { %14625 = vmatprep.subr.msk.bf16.mxu0 %vm2634_vm10, %v17756_v46 }
 0x37f   : > { %12525 = vmatmul.mubr.msk.bf16.gmra.mrb[100].mxu1 %vm2240_vm9, %v17205_v3 }
 0x380   : > { %12528 = vmatprep.mubr.msk.bf16.mxu1 %vm2240_vm9, %v17215_v24 }
 0x381   : > { %13111 = vmatmul.mubr.msk.bf16.gmra.mrb[36].mxu0 %vm2240_vm9, %v17203_v8  ;;  %v17637_v8 = vld [vmem:[#allocation2 + $0xc0] sm:$0xff] }
 0x382   : > { %13114 = vmatprep.mubr.msk.bf16.mxu0 %vm2240_vm9, %v17205_v3  ;;  %v17639_v3 = vld [vmem:[#allocation2 + $0x300] sm:$0xff] }
 0x383   : > { %10899 = vst.msk [vmem:[#allocation2 + $0xc0] sm:$0xff] %vm2240_vm9, %v17639_v3 }
 0x387   : > { %12529 = vmatmul.mubr.msk.bf16.gmra.mrb[104].mxu1 %vm2240_vm9, %v17217_v2 }
 0x388   : > { %12532 = vmatprep.mubr.msk.bf16.mxu1 %vm2240_vm9, %v17227_v0 }
 0x389   : > { %13115 = vmatmul.mubr.msk.bf16.gmra.mrb[40].mxu0 %vm2240_vm9, %v17215_v24  ;;  %v17657_v24 = vld [vmem:[#allocation2 + $0xd0] sm:$0xff] }
 0x38a   : > { %13118 = vmatprep.mubr.msk.bf16.mxu0 %vm2240_vm9, %v17217_v2  ;;  %v17659_v2 = vld [vmem:[#allocation2 + $0x310] sm:$0xff] }
 0x38b   : > { %10901 = vst.msk [vmem:[#allocation2 + $0xd0] sm:$0xff] %vm2240_vm9, %v17659_v2 }
 0x38f   : > { %12533 = vmatmul.mubr.msk.bf16.gmra.mrb[108].mxu1 %vm2240_vm9, %v17229_v44 }
 0x390   : > { %12536 = vmatprep.mubr.msk.bf16.mxu1 %vm2240_vm9, %v17239_v54 }
 0x391   : > { %13119 = vmatmul.mubr.msk.bf16.gmra.mrb[44].mxu0 %vm2240_vm9, %v17227_v0  ;;  %v17677_v0 = vld [vmem:[#allocation2 + $0xe0] sm:$0xff] }
 0x392   : > { %13122 = vmatprep.mubr.msk.bf16.mxu0 %vm2240_vm9, %v17229_v44  ;;  %v17679_v44 = vld [vmem:[#allocation2 + $0x320] sm:$0xff] }
 0x393   : > { %10903 = vst.msk [vmem:[#allocation2 + $0xe0] sm:$0xff] %vm2240_vm9, %v17679_v44 }
 0x397   : > { %12537 = vmatmul.mubr.msk.bf16.gmra.mrb[112].mxu1 %vm2240_vm9, %v17241_v56 }
 0x398   : > { %12540 = vmatprep.mubr.msk.bf16.mxu1 %vm2240_vm9, %v17251_v39 }
 0x399   : > { %13123 = vmatmul.mubr.msk.bf16.gmra.mrb[48].mxu0 %vm2240_vm9, %v17239_v54  ;;  %v17699_v54 = vld [vmem:[#allocation2 + $0x330] sm:$0xff] }
 0x39a   : > { %13126 = vmatprep.mubr.msk.bf16.mxu0 %vm2240_vm9, %v17241_v56  ;;  %v17697_v56 = vld [vmem:[#allocation2 + $0xf0] sm:$0xff] }
 0x39b   : > { %10905 = vst.msk [vmem:[#allocation2 + $0xf0] sm:$0xff] %vm2240_vm9, %v17699_v54 }
 0x39f   : > { %12541 = vmatmul.mubr.msk.bf16.gmra.mrb[116].mxu1 %vm2240_vm9, %v17253_v50 }
 0x3a0   : > { %12544 = vmatprep.mubr.msk.bf16.mxu1 %vm2240_vm9, %v17263_v26 }
 0x3a1   : > { %13127 = vmatmul.mubr.msk.bf16.gmra.mrb[52].mxu0 %vm2240_vm9, %v17251_v39  ;;  %v17713_v39 = vld [vmem:[#allocation2 + $0x100] sm:$0xff] }
 0x3a2   : > { %13130 = vmatprep.mubr.msk.bf16.mxu0 %vm2240_vm9, %v17253_v50  ;;  %v17719_v50 = vld [vmem:[#allocation2 + $0x110] sm:$0xff]  ;;  %10907 = vst.msk [vmem:[#allocation2 + $0x100] sm:$0xff] %vm2240_vm9, %v17723_v16 }
 0x3a3   : > { %19650 = vst [vmem:[#allocation51_spill] sm:$0xff] %v17719_v50  ;;  %10909 = vst.msk [vmem:[#allocation2 + $0x110] sm:$0xff] %vm2240_vm9, %v17721_v7  ;;  %v17735_v50 = vld [vmem:[#allocation2 + $0x348] sm:$0xff] }
 0x3a7   : > { %12545 = vmatmul.mubr.msk.bf16.gmra.mrb[120].mxu1 %vm2240_vm9, %v17265_v36 }
 0x3a8   : > { %12548 = vmatprep.mubr.msk.bf16.mxu1 %vm2240_vm9, %v17281_v13 }
 0x3a9   : > { %13131 = vmatmul.mubr.msk.bf16.gmra.mrb[56].mxu0 %vm2240_vm9, %v17263_v26  ;;  %v17733_v26 = vld [vmem:[#allocation2 + $0x108] sm:$0xff] }
 0x3aa   : > { %13134 = vmatprep.mubr.msk.bf16.mxu0 %vm2240_vm9, %v17265_v36  ;;  %10908 = vst.msk [vmem:[#allocation2 + $0x108] sm:$0xff] %vm2240_vm9, %v17735_v50  ;;  %v5331_v36 = vsel %vm2634_vm10, %v17473_v31, 0  ;;  %v17934_v31 = vld [vmem:[#allocation2 + $0x168] sm:$0xff] }
 0x3af   : > { %12549 = vmatmul.mubr.msk.bf16.gmra.mrb[124].mxu1 %vm2240_vm9, %v17352_v57 }
 0x3b0   : > { %12554 = vmatprep.mubr.msk.bf16.mxu1 %vm2240_vm9, %v17460_v62  ;;  %v19651_v62 = vld [vmem:[#allocation71_spill] sm:$0xff] }
 0x3b1   : > { %13135 = vmatmul.mubr.msk.bf16.gmra.mrb[60].mxu0 %vm2240_vm9, %v17281_v13  ;;  %v19652_v13 = vld [vmem:[#allocation14_spill] sm:$0xff] }
 0x3b2   : > { %13138 = vmatprep.mubr.msk.bf16.mxu0 %vm2240_vm9, %v7921_v47  ;;  %v17819_v47 = vld [vmem:[#allocation2 + $0x2d8] sm:$0xff] }
 0x3b7   : > { %12555 = vmatmul.mubr.msk.bf16.vlgmr.msra.gmra.mrb[0].mxu1 %vm2240_vm9, %v16894_v61  ;;  %v7937_v61 = vld [vmem:[#allocation2 + $0x2d0] sm:$0xff] }
 0x3b8   : > { %12683 = vmatpush3.bf16.msra.mxu1 %v5331_v36  ;;  %12558 = vmatprep.mubr.msk.bf16.mxu1 %vm2240_vm9, %v17481_v60  ;;  %v17936_v60 = vld [vmem:[#allocation2 + $0x170] sm:$0xff]  ;;  %v18008_v36 = vld [vmem:[#allocation2 + $0x1e0] sm:$0xff] }
 0x3b9   : > { %13139 = vmatmul.mubr.msk.bf16.gmra.mrb[64].mxu0 %vm2240_vm9, %v19651_v62  ;;  %14621 = vmatprep.subr.msk.bf16.mxu1 %vm2634_vm10, %v19652_v13  ;;  %v18018_v62 = vld [vmem:[#allocation2 + $0x1e8] sm:$0xff]  ;;  %v18030_v13 = vld [vmem:[#allocation2 + $0x1f8] sm:$0xff] }
 0x3ba   : > { %13142 = vmatprep.mubr.msk.bf16.mxu0 %vm2240_vm9, %v17364_v12 }
 0x3bf   : > { %12559 = vmatmul.mubr.msk.bf16.gmra.mrb[4].mxu1 %vm2240_vm9, %v17487_v42  ;;  %v17946_v42 = vld [vmem:[#allocation2 + $0x178] sm:$0xff] }
 0x3c0   : > { %12562 = vmatprep.mubr.msk.bf16.mxu1 %vm2240_vm9, %v17497_v10  ;;  %v17948_v10 = vld [vmem:[#allocation2 + $0x180] sm:$0xff] }
 0x3c1   : > { %13143 = vmatmul.mubr.msk.bf16.gmra.mrb[68].mxu0 %vm2240_vm9, %v17125_v15  ;;  %v19653_v15 = vld [vmem:[#allocation51_spill] sm:$0xff] }
 0x3c2   : > { %13146 = vmatprep.mubr.msk.bf16.mxu0 %vm2240_vm9, %v17374_v38  ;;  %v17877_v38 = vld [vmem:[#allocation2 + $0x130] sm:$0xff] }
 0x3c7   : > { %12563 = vmatmul.mubr.msk.bf16.gmra.mrb[8].mxu1 %vm2240_vm9, %v17503_v63  ;;  %v17958_v63 = vld [vmem:[#allocation2 + $0x188] sm:$0xff] }
 0x3c8   : > { %12566 = vmatprep.mubr.msk.bf16.mxu1 %vm2240_vm9, %v17513_v55  ;;  %v17960_v55 = vld [vmem:[#allocation2 + $0x190] sm:$0xff] }
 0x3c9   : > { %13147 = vmatmul.mubr.msk.bf16.gmra.mrb[72].mxu0 %vm2240_vm9, %v17382_v49  ;;  %v19655_v49 = vld [vmem:[#allocation22_spill] sm:$0xff] }
 0x3ca   : > { %13150 = vmatprep.mubr.msk.bf16.mxu0 %vm2240_vm9, %v17386_v53  ;;  %v17881_v53 = vld [vmem:[#allocation2 + $0x128] sm:$0xff] }
 0x3cf   : > { %12567 = vmatmul.mubr.msk.bf16.gmra.mrb[12].mxu1 %vm2240_vm9, %v17519_v43  ;;  %v17970_v43 = vld [vmem:[#allocation2 + $0x198] sm:$0xff] }
 0x3d0   : > { %12570 = vmatprep.mubr.msk.bf16.mxu1 %vm2240_vm9, %v17529_v52  ;;  %v17972_v52 = vld [vmem:[#allocation2 + $0x1a0] sm:$0xff] }
 0x3d1   : > { %13151 = vmatmul.mubr.msk.bf16.gmra.mrb[76].mxu0 %vm2240_vm9, %v17394_v41  ;;  %v17887_v41 = vld [vmem:[#allocation2 + $0x90] sm:$0xff]  ;;  %19656 = vst [vmem:[#allocation9_spill] sm:$0xff] %v17972_v52 }
 0x3d2   : > { %13154 = vmatprep.mubr.msk.bf16.mxu0 %vm2240_vm9, %v17398_v59  ;;  %10893 = vst.msk [vmem:[#allocation2 + $0x90] sm:$0xff] %vm2240_vm9, %v7937_v61  ;;  %v17892_v59 = vld [vmem:[#allocation2 + $0x98] sm:$0xff] }
 0x3d3   : > { %10894 = vst.msk [vmem:[#allocation2 + $0x98] sm:$0xff] %vm2240_vm9, %v17819_v47 }
 0x3d7   : > { %12571 = vmatmul.mubr.msk.bf16.gmra.mrb[16].mxu1 %vm2240_vm9, %v17535_v18  ;;  %v17982_v18 = vld [vmem:[#allocation2 + $0x1c0] sm:$0xff] }
 0x3d8   : > { %12574 = vmatprep.mubr.msk.bf16.mxu1 %vm2240_vm9, %v17545_v58  ;;  %v19657_v58 = vld [vmem:[#allocation27_spill] sm:$0xff] }
 0x3d9   : > { %13155 = vmatmul.mubr.msk.bf16.gmra.mrb[80].mxu0 %vm2240_vm9, %v17406_v34  ;;  %v17896_v34 = vld [vmem:[#allocation2 + $0x138] sm:$0xff] }
 0x3da   : > { %13158 = vmatprep.mubr.msk.bf16.mxu0 %vm2240_vm9, %v17410_v25  ;;  %v17898_v25 = vld [vmem:[#allocation2 + $0x140] sm:$0xff] }
 0x3df   : > { %12575 = vmatmul.mubr.msk.bf16.gmra.mrb[20].mxu1 %vm2240_vm9, %v17551_v30  ;;  %v17986_v30 = vld [vmem:[#allocation2 + $0x1b8] sm:$0xff] }
 0x3e0   : > { %12578 = vmatprep.mubr.msk.bf16.mxu1 %vm2240_vm9, %v17561_v19  ;;  %v17994_v19 = vld [vmem:[#allocation2 + $0x1c8] sm:$0xff] }
 0x3e1   : > { %13159 = vmatmul.mubr.msk.bf16.gmra.mrb[84].mxu0 %vm2240_vm9, %v17418_v11  ;;  %v10035_v11 = vsel %vm2634_vm10, %v17756_v46, 0  ;;  %v18020_v46 = vld [vmem:[#allocation2 + $0x1f0] sm:$0xff] }
 0x3e2   : > { %13162 = vmatprep.mubr.msk.bf16.mxu0 %vm2240_vm9, %v17422_v51  ;;  %v17910_v51 = vld [vmem:[#allocation2 + $0x148] sm:$0xff] }
 0x3e7   : > { %12579 = vmatmul.mubr.msk.bf16.gmra.mrb[24].mxu1 %vm2240_vm9, %v17567_v33  ;;  %v17996_v33 = vld [vmem:[#allocation2 + $0x1d0] sm:$0xff] }
 0x3e8   : > { %12582 = vmatprep.mubr.msk.bf16.mxu1 %vm2240_vm9, %v17273_v21  ;;  %v19654_v21 = vld [vmem:[#allocation50_spill] sm:$0xff] }
 0x3e9   : > { %13163 = vmatmul.mubr.msk.bf16.gmra.mrb[88].mxu0 %vm2240_vm9, %v17430_v29  ;;  %v17912_v29 = vld [vmem:[#allocation2 + $0x150] sm:$0xff] }
 0x3ea   : > { %13166 = vmatprep.mubr.msk.bf16.mxu0 %vm2240_vm9, %v17434_v37  ;;  %v17922_v37 = vld [vmem:[#allocation2 + $0x158] sm:$0xff] }
 0x3ef   : > { %12583 = vmatmul.mubr.msk.bf16.gmra.mrb[28].mxu1 %vm2240_vm9, %v17579_v40  ;;  %v18006_v40 = vld [vmem:[#allocation2 + $0x1d8] sm:$0xff] }
 0x3f0   : > { %12586 = vmatprep.mubr.msk.bf16.mxu1 %vm2240_vm9, %v17597_v17 }
 0x3f1   : > { %13167 = vmatmul.mubr.msk.bf16.gmra.mrb[92].mxu0 %vm2240_vm9, %v17442_v35  ;;  %v17924_v35 = vld [vmem:[#allocation2 + $0x160] sm:$0xff] }
 0x3f2   : > { %13170 = vmatprep.mubr.msk.bf16.mxu0 %vm2240_vm9, %v7937_v61  ;;  %v18032_v61 = vld [vmem:[#allocation2 + $0x200] sm:$0xff] }
 0x3f7   : > { %12587 = vmatmul.mubr.msk.bf16.gmra.mrb[32].mxu1 %vm2240_vm9, %v17607_v23 }
 0x3f8   : > { %12590 = vmatprep.mubr.msk.bf16.mxu1 %vm2240_vm9, %v17617_v4 }
 0x3f9   : > { %13171 = vmatmul.mubr.msk.bf16.gmra.mrb[96].mxu0 %vm2240_vm9, %v17819_v47 }
 0x3fa   : > { %13174 = vmatprep.mubr.msk.bf16.mxu0 %vm2240_vm9, %v17599_v20 }
 0x3ff   : > { %12591 = vmatmul.mubr.msk.bf16.gmra.mrb[36].mxu1 %vm2240_vm9, %v17627_v9 }
 0x400   : > { %12594 = vmatprep.mubr.msk.bf16.mxu1 %vm2240_vm9, %v17637_v8 }
 0x401   : > { %13175 = vmatmul.mubr.msk.bf16.gmra.mrb[100].mxu0 %vm2240_vm9, %v17609_v5 }
 0x402   : > { %13178 = vmatprep.mubr.msk.bf16.mxu0 %vm2240_vm9, %v17619_v6 }
 0x407   : > { %12595 = vmatmul.mubr.msk.bf16.gmra.mrb[40].mxu1 %vm2240_vm9, %v17647_v27 }
 0x408   : > { %12598 = vmatprep.mubr.msk.bf16.mxu1 %vm2240_vm9, %v17657_v24 }
 0x409   : > { %13179 = vmatmul.mubr.msk.bf16.gmra.mrb[104].mxu0 %vm2240_vm9, %v17629_v14 }
 0x40a   : > { %13182 = vmatprep.mubr.msk.bf16.mxu0 %vm2240_vm9, %v17639_v3 }
 0x40f   : > { %12599 = vmatmul.mubr.msk.bf16.gmra.mrb[44].mxu1 %vm2240_vm9, %v17667_v32 }
 0x410   : > { %12602 = vmatprep.mubr.msk.bf16.mxu1 %vm2240_vm9, %v17677_v0 }
 0x411   : > { %13183 = vmatmul.mubr.msk.bf16.gmra.mrb[108].mxu0 %vm2240_vm9, %v17649_v22 }
 0x412   : > { %13186 = vmatprep.mubr.msk.bf16.mxu0 %vm2240_vm9, %v17659_v2 }
 0x417   : > { %12603 = vmatmul.mubr.msk.bf16.gmra.mrb[48].mxu1 %vm2240_vm9, %v17687_v45 }
 0x418   : > { %12606 = vmatprep.mubr.msk.bf16.mxu1 %vm2240_vm9, %v17697_v56 }
 0x419   : > { %13187 = vmatmul.mubr.msk.bf16.gmra.mrb[112].mxu0 %vm2240_vm9, %v17669_v48 }
 0x41a   : > { %13190 = vmatprep.mubr.msk.bf16.mxu0 %vm2240_vm9, %v17679_v44 }
 0x41f   : > { %12607 = vmatmul.mubr.msk.bf16.gmra.mrb[52].mxu1 %vm2240_vm9, %v17707_v1 }
 0x420   : > { %12610 = vmatprep.mubr.msk.bf16.mxu1 %vm2240_vm9, %v17713_v39 }
 0x421   : > { %13191 = vmatmul.mubr.msk.bf16.gmra.mrb[116].mxu0 %vm2240_vm9, %v17689_v28 }
 0x422   : > { %13194 = vmatprep.mubr.msk.bf16.mxu0 %vm2240_vm9, %v17699_v54 }
 0x427   : > { %12611 = vmatmul.mubr.msk.bf16.gmra.mrb[56].mxu1 %vm2240_vm9, %v17733_v26 }
 0x428   : > { %12614 = vmatprep.mubr.msk.bf16.mxu1 %vm2240_vm9, %v19653_v15  ;;  %v18042_v15 = vld [vmem:[#allocation2 + $0x208] sm:$0xff] }
 0x429   : > { %13195 = vmatmul.mubr.msk.bf16.gmra.mrb[120].mxu0 %vm2240_vm9, %v19654_v21  ;;  %19658 = vst [vmem:[#allocation54_spill] sm:$0xff] %v18042_v15 }
 0x42a   : > { %13198 = vmatprep.mubr.msk.bf16.mxu0 %vm2240_vm9, %v17723_v16 }
 0x42f   : > { %12615 = vmatmul.mubr.msk.bf16.gmra.mrb[60].mxu1 %vm2240_vm9, %v19655_v49  ;;  %v18044_v49 = vld [vmem:[#allocation2 + $0x210] sm:$0xff] }
 0x430   : > { %12618 = vmatprep.mubr.msk.bf16.mxu1 %vm2240_vm9, %v17877_v38  ;;  %19659 = vst [vmem:[#allocation55_spill] sm:$0xff] %v18044_v49 }
 0x431   : > { %13199 = vmatmul.mubr.msk.bf16.gmra.mrb[124].mxu0 %vm2240_vm9, %v17735_v50 }
 0x432   : > { %13204 = vmatprep.mubr.msk.bf16.mxu0 %vm2240_vm9, %v17881_v53 }
 0x437   : > { %12619 = vmatmul.mubr.msk.bf16.gmra.mrb[64].mxu1 %vm2240_vm9, %v17896_v34 }
 0x438   : > { %12622 = vmatprep.mubr.msk.bf16.mxu1 %vm2240_vm9, %v17898_v25 }
 0x439   : > { %13205 = vmatmul.mubr.msk.bf16.vlgmr.msra.gmra.mrb[0].mxu0 %vm2240_vm9, %v17877_v38 }
 0x43a   : > { %13333 = vmatpush3.bf16.msra.mxu0 %v10035_v11  ;;  %13208 = vmatprep.mubr.msk.bf16.mxu0 %vm2240_vm9, %v17896_v34  ;;  %v18054_v11 = vld [vmem:[#allocation2 + $0x218] sm:$0xff] }
 0x43f   : > { %12623 = vmatmul.mubr.msk.bf16.gmra.mrb[68].mxu1 %vm2240_vm9, %v17910_v51 }
 0x440   : > { %12626 = vmatprep.mubr.msk.bf16.mxu1 %vm2240_vm9, %v17912_v29 }
 0x441   : > { %13209 = vmatmul.mubr.msk.bf16.gmra.mrb[4].mxu0 %vm2240_vm9, %v17898_v25 }
 0x442   : > { %13212 = vmatprep.mubr.msk.bf16.mxu0 %vm2240_vm9, %v17910_v51 }
 0x447   : > { %12627 = vmatmul.mubr.msk.bf16.gmra.mrb[72].mxu1 %vm2240_vm9, %v17922_v37 }
 0x448   : > { %12630 = vmatprep.mubr.msk.bf16.mxu1 %vm2240_vm9, %v17924_v35 }
 0x449   : > { %13213 = vmatmul.mubr.msk.bf16.gmra.mrb[8].mxu0 %vm2240_vm9, %v17912_v29 }
 0x44a   : > { %13216 = vmatprep.mubr.msk.bf16.mxu0 %vm2240_vm9, %v17922_v37 }
 0x44f   : > { %12631 = vmatmul.mubr.msk.bf16.gmra.mrb[76].mxu1 %vm2240_vm9, %v17934_v31 }
 0x450   : > { %12634 = vmatprep.mubr.msk.bf16.mxu1 %vm2240_vm9, %v17936_v60 }
 0x451   : > { %13217 = vmatmul.mubr.msk.bf16.gmra.mrb[12].mxu0 %vm2240_vm9, %v17924_v35 }
 0x452   : > { %13220 = vmatprep.mubr.msk.bf16.mxu0 %vm2240_vm9, %v17934_v31 }
 0x457   : > { %12635 = vmatmul.mubr.msk.bf16.gmra.mrb[80].mxu1 %vm2240_vm9, %v17946_v42 }
 0x458   : > { %12638 = vmatprep.mubr.msk.bf16.mxu1 %vm2240_vm9, %v17948_v10 }
 0x459   : > { %13221 = vmatmul.mubr.msk.bf16.gmra.mrb[16].mxu0 %vm2240_vm9, %v17936_v60 }
 0x45a   : > { %13224 = vmatprep.mubr.msk.bf16.mxu0 %vm2240_vm9, %v17946_v42 }
 0x45f   : > { %12639 = vmatmul.mubr.msk.bf16.gmra.mrb[84].mxu1 %vm2240_vm9, %v17958_v63 }
 0x460   : > { %12642 = vmatprep.mubr.msk.bf16.mxu1 %vm2240_vm9, %v17960_v55 }
 0x461   : > { %13225 = vmatmul.mubr.msk.bf16.gmra.mrb[20].mxu0 %vm2240_vm9, %v17948_v10 }
 0x462   : > { %13228 = vmatprep.mubr.msk.bf16.mxu0 %vm2240_vm9, %v17958_v63 }
 0x467   : > { %12643 = vmatmul.mubr.msk.bf16.gmra.mrb[88].mxu1 %vm2240_vm9, %v17970_v43 }
 0x468   : > { %12646 = vmatprep.mubr.msk.bf16.mxu1 %vm2240_vm9, %v17972_v52 }
 0x469   : > { %13229 = vmatmul.mubr.msk.bf16.gmra.mrb[24].mxu0 %vm2240_vm9, %v17960_v55 }
 0x46a   : > { %13232 = vmatprep.mubr.msk.bf16.mxu0 %vm2240_vm9, %v17970_v43 }
 0x46f   : > { %12647 = vmatmul.mubr.msk.bf16.gmra.mrb[92].mxu1 %vm2240_vm9, %v19657_v58  ;;  %v18056_v58 = vld [vmem:[#allocation2 + $0x220] sm:$0xff] }
 0x470   : > { %12650 = vmatprep.mubr.msk.bf16.mxu1 %vm2240_vm9, %v17982_v18  ;;  %19660 = vst [vmem:[#allocation94_spill] sm:$0xff] %v18056_v58 }
 0x471   : > { %13233 = vmatmul.mubr.msk.bf16.gmra.mrb[28].mxu0 %vm2240_vm9, %v17972_v52  ;;  %v18066_v52 = vld [vmem:[#allocation2 + $0x228] sm:$0xff] }
 0x472   : > { %13236 = vmatprep.mubr.msk.bf16.mxu0 %vm2240_vm9, %v17986_v30  ;;  %19661 = vst [vmem:[#allocation11_spill] sm:$0xff] %v18066_v52 }
 0x477   : > { %12651 = vmatmul.mubr.msk.bf16.gmra.mrb[96].mxu1 %vm2240_vm9, %v17994_v19 }
 0x478   : > { %12654 = vmatprep.mubr.msk.bf16.mxu1 %vm2240_vm9, %v17996_v33 }
 0x479   : > { %13237 = vmatmul.mubr.msk.bf16.gmra.mrb[32].mxu0 %vm2240_vm9, %v17982_v18 }
 0x47a   : > { %13240 = vmatprep.mubr.msk.bf16.mxu0 %vm2240_vm9, %v17994_v19 }
 0x47f   : > { %12655 = vmatmul.mubr.msk.bf16.gmra.mrb[100].mxu1 %vm2240_vm9, %v18006_v40 }
 0x480   : > { %12658 = vmatprep.mubr.msk.bf16.mxu1 %vm2240_vm9, %v18008_v36 }
 0x481   : > { %13241 = vmatmul.mubr.msk.bf16.gmra.mrb[36].mxu0 %vm2240_vm9, %v17996_v33 }
 0x482   : > { %13244 = vmatprep.mubr.msk.bf16.mxu0 %vm2240_vm9, %v18006_v40 }
 0x487   : > { %12659 = vmatmul.mubr.msk.bf16.gmra.mrb[104].mxu1 %vm2240_vm9, %v18018_v62 }
 0x488   : > { %12662 = vmatprep.mubr.msk.bf16.mxu1 %vm2240_vm9, %v18020_v46 }
 0x489   : > { %13245 = vmatmul.mubr.msk.bf16.gmra.mrb[40].mxu0 %vm2240_vm9, %v18008_v36 }
 0x48a   : > { %13248 = vmatprep.mubr.msk.bf16.mxu0 %vm2240_vm9, %v18018_v62 }
 0x48f   : > { %12663 = vmatmul.mubr.msk.bf16.gmra.mrb[108].mxu1 %vm2240_vm9, %v18030_v13 }
 0x490   : > { %12666 = vmatprep.mubr.msk.bf16.mxu1 %vm2240_vm9, %v18032_v61 }
 0x491   : > { %13249 = vmatmul.mubr.msk.bf16.gmra.mrb[44].mxu0 %vm2240_vm9, %v18020_v46 }
 0x492   : > { %13252 = vmatprep.mubr.msk.bf16.mxu0 %vm2240_vm9, %v18030_v13 }
 0x497   : > { %12667 = vmatmul.mubr.msk.bf16.gmra.mrb[112].mxu1 %vm2240_vm9, %v18042_v15 }
 0x498   : > { %12670 = vmatprep.mubr.msk.bf16.mxu1 %vm2240_vm9, %v18044_v49 }
 0x499   : > { %13253 = vmatmul.mubr.msk.bf16.gmra.mrb[48].mxu0 %vm2240_vm9, %v18032_v61 }
 0x49a   : > { %13256 = vmatprep.mubr.msk.bf16.mxu0 %vm2240_vm9, %v18042_v15  ;;  %v19662_v15 = vld [vmem:[#allocation29_spill] sm:$0xff] }
 0x49f   : > { %12671 = vmatmul.mubr.msk.bf16.gmra.mrb[116].mxu1 %vm2240_vm9, %v18054_v11 }
 0x4a0   : > { %12674 = vmatprep.mubr.msk.bf16.mxu1 %vm2240_vm9, %v18056_v58 }
 0x4a1   : > { %13257 = vmatmul.mubr.msk.bf16.gmra.mrb[52].mxu0 %vm2240_vm9, %v18044_v49  ;;  %v18078_v49 = vld [vmem:[#allocation2 + $0x248] sm:$0xff] }
 0x4a2   : > { %13260 = vmatprep.mubr.msk.bf16.mxu0 %vm2240_vm9, %v18054_v11 }
 0x4a7   : > { %12675 = vmatmul.mubr.msk.bf16.gmra.mrb[120].mxu1 %vm2240_vm9, %v18066_v52 }
 0x4a8   : > { %12678 = vmatprep.mubr.msk.bf16.mxu1 %vm2240_vm9, %v17352_v57 }
 0x4a9   : > { %13261 = vmatmul.mubr.msk.bf16.gmra.mrb[56].mxu0 %vm2240_vm9, %v18056_v58  ;;  %v18088_v58 = vld [vmem:[#allocation2 + $0x258] sm:$0xff] }
 0x4aa   : > { %13264 = vmatprep.mubr.msk.bf16.mxu0 %vm2240_vm9, %v18066_v52  ;;  %v19663_v52 = vld [vmem:[#allocation15_spill] sm:$0xff] }
 0x4af   : > { %12679 = vmatmul.mubr.msk.bf16.gmra.mrb[124].mxu1 %vm2240_vm9, %v19662_v15 }
 0x4b0   : > { %12684 = vmatprep.mubr.msk.bf16.mxu1 %vm2240_vm9, %v17887_v41  ;;  %v18101_v41 = vld [vmem:[#allocation2 + $0x268] sm:$0xff] }
 0x4b1   : > { %13265 = vmatmul.mubr.msk.bf16.gmra.mrb[60].mxu0 %vm2240_vm9, %v17352_v57  ;;  %v18097_v57 = vld [vmem:[#allocation2 + $0x260] sm:$0xff] }
 0x4b2   : > { %13268 = vmatprep.mubr.msk.bf16.mxu0 %vm2240_vm9, %v18078_v49 }
 0x4b7   : > { %12685 = vmatmul.mubr.msk.bf16.vlgmr.msra.gmra.mrb[0].mxu1 %vm2240_vm9, %v17892_v59 }
 0x4b8   : > { %13463 = vmatpush3.bf16.msra.mxu1 %v19663_v52  ;;  %12688 = vmatprep.mubr.msk.bf16.mxu1 %vm2240_vm9, %v17597_v17  ;;  %v18113_v17 = vld [vmem:[#allocation2 + $0x278] sm:$0xff] }
 0x4b9   : > { %13269 = vmatmul.mubr.msk.bf16.gmra.mrb[64].mxu0 %vm2240_vm9, %v17364_v12  ;;  %v18109_v12 = vld [vmem:[#allocation2 + $0x270] sm:$0xff] }
 0x4ba   : > { %13272 = vmatprep.mubr.msk.bf16.mxu0 %vm2240_vm9, %v18088_v58 }
 0x4bf   : > { %12689 = vmatmul.mubr.msk.bf16.gmra.mrb[4].mxu1 %vm2240_vm9, %v17607_v23  ;;  %v18121_v23 = vld [vmem:[#allocation2 + $0x280] sm:$0xff] }
 0x4c0   : > { %12692 = vmatprep.mubr.msk.bf16.mxu1 %vm2240_vm9, %v17617_v4  ;;  %v18125_v4 = vld [vmem:[#allocation2 + $0x288] sm:$0xff] }
 0x4c1   : > { %13273 = vmatmul.mubr.msk.bf16.gmra.mrb[68].mxu0 %vm2240_vm9, %v18097_v57 }
 0x4c2   : > { %13276 = vmatprep.mubr.msk.bf16.mxu0 %vm2240_vm9, %v18101_v41 }
 0x4c7   : > { %12693 = vmatmul.mubr.msk.bf16.gmra.mrb[8].mxu1 %vm2240_vm9, %v17627_v9  ;;  %v18133_v9 = vld [vmem:[#allocation2 + $0x290] sm:$0xff] }
 0x4c8   : > { %12696 = vmatprep.mubr.msk.bf16.mxu1 %vm2240_vm9, %v17637_v8  ;;  %v18137_v8 = vld [vmem:[#allocation2 + $0x298] sm:$0xff] }
 0x4c9   : > { %13277 = vmatmul.mubr.msk.bf16.gmra.mrb[72].mxu0 %vm2240_vm9, %v18109_v12 }
 0x4ca   : > { %13280 = vmatprep.mubr.msk.bf16.mxu0 %vm2240_vm9, %v18113_v17 }
 0x4cf   : > { %12697 = vmatmul.mubr.msk.bf16.gmra.mrb[12].mxu1 %vm2240_vm9, %v17647_v27  ;;  %v18145_v27 = vld [vmem:[#allocation2 + $0x2a0] sm:$0xff] }
 0x4d0   : > { %12700 = vmatprep.mubr.msk.bf16.mxu1 %vm2240_vm9, %v17657_v24  ;;  %v18149_v24 = vld [vmem:[#allocation2 + $0x2a8] sm:$0xff] }
 0x4d1   : > { %13281 = vmatmul.mubr.msk.bf16.gmra.mrb[76].mxu0 %vm2240_vm9, %v18121_v23 }
 0x4d2   : > { %13284 = vmatprep.mubr.msk.bf16.mxu0 %vm2240_vm9, %v18125_v4 }
 0x4d7   : > { %12701 = vmatmul.mubr.msk.bf16.gmra.mrb[16].mxu1 %vm2240_vm9, %v17667_v32  ;;  %v18157_v32 = vld [vmem:[#allocation2 + $0x2b0] sm:$0xff] }
 0x4d8   : > { %12704 = vmatprep.mubr.msk.bf16.mxu1 %vm2240_vm9, %v17677_v0  ;;  %v18161_v0 = vld [vmem:[#allocation2 + $0x2b8] sm:$0xff] }
 0x4d9   : > { %13285 = vmatmul.mubr.msk.bf16.gmra.mrb[80].mxu0 %vm2240_vm9, %v18133_v9 }
 0x4da   : > { %13288 = vmatprep.mubr.msk.bf16.mxu0 %vm2240_vm9, %v18137_v8 }
 0x4df   : > { %12705 = vmatmul.mubr.msk.bf16.gmra.mrb[20].mxu1 %vm2240_vm9, %v17687_v45  ;;  %v5082_v45 = vld [vmem:[#allocation2 + $0x120] sm:$0xff] }
 0x4e0   : > { %12708 = vmatprep.mubr.msk.bf16.mxu1 %vm2240_vm9, %v17697_v56  ;;  %v18169_v56 = vld [vmem:[#allocation2 + $0x2c0] sm:$0xff] }
 0x4e1   : > { %13289 = vmatmul.mubr.msk.bf16.gmra.mrb[84].mxu0 %vm2240_vm9, %v18145_v27 }
 0x4e2   : > { %13292 = vmatprep.mubr.msk.bf16.mxu0 %vm2240_vm9, %v18149_v24 }
 0x4e7   : > { %12709 = vmatmul.mubr.msk.bf16.gmra.mrb[24].mxu1 %vm2240_vm9, %v17707_v1 }
 0x4e8   : > { %12712 = vmatprep.mubr.msk.bf16.mxu1 %vm2240_vm9, %v17713_v39 }
 0x4e9   : > { %13293 = vmatmul.mubr.msk.bf16.gmra.mrb[88].mxu0 %vm2240_vm9, %v18157_v32 }
 0x4ea   : > { %13296 = vmatprep.mubr.msk.bf16.mxu0 %vm2240_vm9, %v18161_v0 }
 0x4ef   : > { %12713 = vmatmul.mubr.msk.bf16.gmra.mrb[28].mxu1 %vm2240_vm9, %v17733_v26 }
 0x4f0   : > { %12716 = vmatprep.mubr.msk.bf16.mxu1 %vm2240_vm9, %v5082_v45 }
 0x4f1   : > { %13297 = vmatmul.mubr.msk.bf16.gmra.mrb[92].mxu0 %vm2240_vm9, %v18169_v56 }
 0x4f2   : > { %13300 = vmatprep.mubr.msk.bf16.mxu0 %vm2240_vm9, %v17819_v47 }
 0x4f7   : > { %12717 = vmatmul.mubr.msk.bf16.gmra.mrb[32].mxu1 %vm2240_vm9, %v17881_v53 }
 0x4f8   : > { %12720 = vmatprep.mubr.msk.bf16.mxu1 %vm2240_vm9, %v17877_v38 }
 0x4f9   : > { %13301 = vmatmul.mubr.msk.bf16.gmra.mrb[96].mxu0 %vm2240_vm9, %v17599_v20  ;;  %v5098_v20 = vld [vmem:[#allocation2 + $0x1b0] sm:$0xff] }
 0x4fa   : > { %13304 = vmatprep.mubr.msk.bf16.mxu0 %vm2240_vm9, %v17609_v5  ;;  %v19665_v5 = vld [vmem:[#allocation55_spill] sm:$0xff] }
 0x4ff   : > { %12721 = vmatmul.mubr.msk.bf16.gmra.mrb[36].mxu1 %vm2240_vm9, %v17896_v34 }
 0x500   : > { %12724 = vmatprep.mubr.msk.bf16.mxu1 %vm2240_vm9, %v17898_v25 }
 0x501   : > { %13305 = vmatmul.mubr.msk.bf16.gmra.mrb[100].mxu0 %vm2240_vm9, %v17619_v6  ;;  %v19666_v6 = vld [vmem:[#allocation94_spill] sm:$0xff] }
 0x502   : > { %13308 = vmatprep.mubr.msk.bf16.mxu0 %vm2240_vm9, %v17629_v14  ;;  %v19667_v14 = vld [vmem:[#allocation9_spill] sm:$0xff] }
 0x507   : > { %12725 = vmatmul.mubr.msk.bf16.gmra.mrb[40].mxu1 %vm2240_vm9, %v17910_v51 }
 0x508   : > { %12728 = vmatprep.mubr.msk.bf16.mxu1 %vm2240_vm9, %v17912_v29 }
 0x509   : > { %13309 = vmatmul.mubr.msk.bf16.gmra.mrb[104].mxu0 %vm2240_vm9, %v17639_v3  ;;  %v5114_v3 = vld [vmem:[#allocation2 + $0x240] sm:$0xff] }
 0x50a   : > { %13312 = vmatprep.mubr.msk.bf16.mxu0 %vm2240_vm9, %v17649_v22  ;;  %v9785_v22 = vld [vmem:[#allocation2 + $0x1a8] sm:$0xff] }
 0x50f   : > { %12729 = vmatmul.mubr.msk.bf16.gmra.mrb[44].mxu1 %vm2240_vm9, %v17922_v37 }
 0x510   : > { %12732 = vmatprep.mubr.msk.bf16.mxu1 %vm2240_vm9, %v17924_v35 }
 0x511   : > { %13313 = vmatmul.mubr.msk.bf16.gmra.mrb[108].mxu0 %vm2240_vm9, %v17659_v2  ;;  %v19668_v2 = vld [vmem:[#allocation11_spill] sm:$0xff] }
 0x512   : > { %13316 = vmatprep.mubr.msk.bf16.mxu0 %vm2240_vm9, %v17669_v48  ;;  %v18303_v48 = vld [vmem:[#allocation2 + $0x250] sm:$0xff] }
 0x517   : > { %12733 = vmatmul.mubr.msk.bf16.gmra.mrb[48].mxu1 %vm2240_vm9, %v17934_v31 }
 0x518   : > { %12736 = vmatprep.mubr.msk.bf16.mxu1 %vm2240_vm9, %v17936_v60 }
 0x519   : > { %13317 = vmatmul.mubr.msk.bf16.gmra.mrb[112].mxu0 %vm2240_vm9, %v17679_v44 }
 0x51a   : > { %13320 = vmatprep.mubr.msk.bf16.mxu0 %vm2240_vm9, %v17689_v28 }
 0x51f   : > { %12737 = vmatmul.mubr.msk.bf16.gmra.mrb[52].mxu1 %vm2240_vm9, %v17946_v42 }
 0x520   : > { %12740 = vmatprep.mubr.msk.bf16.mxu1 %vm2240_vm9, %v17948_v10 }
 0x521   : > { %13321 = vmatmul.mubr.msk.bf16.gmra.mrb[116].mxu0 %vm2240_vm9, %v17699_v54 }
 0x522   : > { %13324 = vmatprep.mubr.msk.bf16.mxu0 %vm2240_vm9, %v19654_v21 }
 0x527   : > { %12741 = vmatmul.mubr.msk.bf16.gmra.mrb[56].mxu1 %vm2240_vm9, %v17958_v63 }
 0x528   : > { %12744 = vmatprep.mubr.msk.bf16.mxu1 %vm2240_vm9, %v17960_v55 }
 0x529   : > { %13325 = vmatmul.mubr.msk.bf16.gmra.mrb[120].mxu0 %vm2240_vm9, %v17723_v16  ;;  %v19664_v16 = vld [vmem:[#allocation54_spill] sm:$0xff] }
 0x52a   : > { %13328 = vmatprep.mubr.msk.bf16.mxu0 %vm2240_vm9, %v17735_v50 }
 0x52f   : > { %12745 = vmatmul.mubr.msk.bf16.gmra.mrb[60].mxu1 %vm2240_vm9, %v17970_v43 }
 0x530   : > { %12748 = vmatprep.mubr.msk.bf16.mxu1 %vm2240_vm9, %v5098_v20 }
 0x531   : > { %13329 = vmatmul.mubr.msk.bf16.gmra.mrb[124].mxu0 %vm2240_vm9, %v17721_v7 }
 0x532   : > { %13334 = vmatprep.mubr.msk.bf16.mxu0 %vm2240_vm9, %v17877_v38 }
 0x537   : > { %12749 = vmatmul.mubr.msk.bf16.gmra.mrb[64].mxu1 %vm2240_vm9, %v17986_v30 }
 0x538   : > { %12752 = vmatprep.mubr.msk.bf16.mxu1 %vm2240_vm9, %v17982_v18 }
 0x539   : > { %13335 = vmatmul.mubr.msk.bf16.vlgmr.msra.gmra.mrb[0].mxu0 %vm2240_vm9, %v17896_v34 }
 0x53a   : > { %13338 = vmatprep.mubr.msk.bf16.mxu0 %vm2240_vm9, %v17898_v25 }
 0x53f   : > { %12753 = vmatmul.mubr.msk.bf16.gmra.mrb[68].mxu1 %vm2240_vm9, %v17994_v19 }
 0x540   : > { %12756 = vmatprep.mubr.msk.bf16.mxu1 %vm2240_vm9, %v17996_v33 }
 0x541   : > { %13339 = vmatmul.mubr.msk.bf16.gmra.mrb[4].mxu0 %vm2240_vm9, %v17910_v51 }
 0x542   : > { %13342 = vmatprep.mubr.msk.bf16.mxu0 %vm2240_vm9, %v17912_v29  ;;  %v18387_v29 = vld [vmem:[#allocation2 + $0x230] sm:$0xff] }
 0x547   : > { %12757 = vmatmul.mubr.msk.bf16.gmra.mrb[72].mxu1 %vm2240_vm9, %v18006_v40 }
 0x548   : > { %12760 = vmatprep.mubr.msk.bf16.mxu1 %vm2240_vm9, %v18008_v36 }
 0x549   : > { %13343 = vmatmul.mubr.msk.bf16.gmra.mrb[8].mxu0 %vm2240_vm9, %v17922_v37 }
 0x54a   : > { %13346 = vmatprep.mubr.msk.bf16.mxu0 %vm2240_vm9, %v17924_v35 }
 0x54f   : > { %12761 = vmatmul.mubr.msk.bf16.gmra.mrb[76].mxu1 %vm2240_vm9, %v18018_v62 }
 0x550   : > { %12764 = vmatprep.mubr.msk.bf16.mxu1 %vm2240_vm9, %v18020_v46 }
 0x551   : > { %13347 = vmatmul.mubr.msk.bf16.gmra.mrb[12].mxu0 %vm2240_vm9, %v17934_v31 }
 0x552   : > { %13350 = vmatprep.mubr.msk.bf16.mxu0 %vm2240_vm9, %v17936_v60 }
 0x557   : > { %12765 = vmatmul.mubr.msk.bf16.gmra.mrb[80].mxu1 %vm2240_vm9, %v18030_v13 }
 0x558   : > { %12768 = vmatprep.mubr.msk.bf16.mxu1 %vm2240_vm9, %v18032_v61 }
 0x559   : > { %13351 = vmatmul.mubr.msk.bf16.gmra.mrb[16].mxu0 %vm2240_vm9, %v17946_v42  ;;  %v9801_v42 = vld [vmem:[#allocation2 + $0x238] sm:$0xff] }
 0x55a   : > { %13354 = vmatprep.mubr.msk.bf16.mxu0 %vm2240_vm9, %v17948_v10 }
 0x55f   : > { %12769 = vmatmul.mubr.msk.bf16.gmra.mrb[84].mxu1 %vm2240_vm9, %v19664_v16 }
 0x560   : > { %12772 = vmatprep.mubr.msk.bf16.mxu1 %vm2240_vm9, %v19665_v5 }
 0x561   : > { %13355 = vmatmul.mubr.msk.bf16.gmra.mrb[20].mxu0 %vm2240_vm9, %v17958_v63 }
 0x562   : > { %13358 = vmatprep.mubr.msk.bf16.mxu0 %vm2240_vm9, %v17960_v55 }
 0x567   : > { %12773 = vmatmul.mubr.msk.bf16.gmra.mrb[88].mxu1 %vm2240_vm9, %v18054_v11 }
 0x568   : > { %12776 = vmatprep.mubr.msk.bf16.mxu1 %vm2240_vm9, %v19666_v6 }
 0x569   : > { %13359 = vmatmul.mubr.msk.bf16.gmra.mrb[24].mxu0 %vm2240_vm9, %v17970_v43 }
 0x56a   : > { %13362 = vmatprep.mubr.msk.bf16.mxu0 %vm2240_vm9, %v19667_v14 }
 0x56f   : > { %12777 = vmatmul.mubr.msk.bf16.gmra.mrb[92].mxu1 %vm2240_vm9, %v19668_v2 }
 0x570   : > { %12780 = vmatprep.mubr.msk.bf16.mxu1 %vm2240_vm9, %v5114_v3 }
 0x571   : > { %13363 = vmatmul.mubr.msk.bf16.gmra.mrb[28].mxu0 %vm2240_vm9, %v9785_v22 }
 0x572   : > { %13366 = vmatprep.mubr.msk.bf16.mxu0 %vm2240_vm9, %v17982_v18 }
 0x577   : > { %12781 = vmatmul.mubr.msk.bf16.gmra.mrb[96].mxu1 %vm2240_vm9, %v18078_v49 }
 0x578   : > { %12784 = vmatprep.mubr.msk.bf16.mxu1 %vm2240_vm9, %v18303_v48 }
 0x579   : > { %13367 = vmatmul.mubr.msk.bf16.gmra.mrb[32].mxu0 %vm2240_vm9, %v17994_v19 }
 0x57a   : > { %13370 = vmatprep.mubr.msk.bf16.mxu0 %vm2240_vm9, %v17996_v33 }
 0x57f   : > { %12785 = vmatmul.mubr.msk.bf16.gmra.mrb[100].mxu1 %vm2240_vm9, %v18088_v58 }
 0x580   : > { %12788 = vmatprep.mubr.msk.bf16.mxu1 %vm2240_vm9, %v18097_v57 }
 0x581   : > { %13371 = vmatmul.mubr.msk.bf16.gmra.mrb[36].mxu0 %vm2240_vm9, %v18006_v40 }
 0x582   : > { %13374 = vmatprep.mubr.msk.bf16.mxu0 %vm2240_vm9, %v18008_v36 }
 0x587   : > { %12789 = vmatmul.mubr.msk.bf16.gmra.mrb[104].mxu1 %vm2240_vm9, %v18101_v41 }
 0x588   : > { %12792 = vmatprep.mubr.msk.bf16.mxu1 %vm2240_vm9, %v18109_v12 }
 0x589   : > { %13375 = vmatmul.mubr.msk.bf16.gmra.mrb[40].mxu0 %vm2240_vm9, %v18018_v62 }
 0x58a   : > { %v18327_v44 = vpop.f32.mrb[0].mxu1  ;;  %13378 = vmatprep.mubr.msk.bf16.mxu0 %vm2240_vm9, %v18020_v46 }
 0x58b   : > { %v18331_v28 = vpop.f32.mrb[1].mxu1 }
 0x58c   : > { %v18333_v54 = vpop.f32.mrb[2].mxu1 }
 0x58d   : > { %v18335_v1 = vpop.f32.mrb[3].mxu1 }
 0x58f   : > { %12793 = vmatmul.mubr.msk.bf16.gmra.mrb[108].mxu1 %vm2240_vm9, %v18113_v17 }
 0x590   : > { %12796 = vmatprep.mubr.msk.bf16.mxu1 %vm2240_vm9, %v18121_v23 }
 0x591   : > { %13379 = vmatmul.mubr.msk.bf16.gmra.mrb[44].mxu0 %vm2240_vm9, %v18030_v13 }
 0x592   : > { %v18343_v39 = vpop.f32.mrb[4].mxu1  ;;  %13382 = vmatprep.mubr.msk.bf16.mxu0 %vm2240_vm9, %v18032_v61 }
 0x593   : > { %v18347_v50 = vpop.f32.mrb[5].mxu1 }
 0x594   : > { %v18349_v7 = vpop.f32.mrb[6].mxu1 }
 0x595   : > { %v18351_v26 = vpop.f32.mrb[7].mxu1 }
 0x597   : > { %12797 = vmatmul.mubr.msk.bf16.gmra.mrb[112].mxu1 %vm2240_vm9, %v18125_v4 }
 0x598   : > { %12800 = vmatprep.mubr.msk.bf16.mxu1 %vm2240_vm9, %v18133_v9 }
 0x599   : > { %13383 = vmatmul.mubr.msk.bf16.gmra.mrb[48].mxu0 %vm2240_vm9, %v19664_v16 }
 0x59a   : > { %v18359_v47 = vpop.f32.mrb[8].mxu1  ;;  %13386 = vmatprep.mubr.msk.bf16.mxu0 %vm2240_vm9, %v19665_v5 }
 0x59b   : > { %v18363_v21 = vpop.f32.mrb[9].mxu1 }
 0x59c   : > { %v18365_v38 = vpop.f32.mrb[10].mxu1 }
 0x59d   : > { %v18367_v53 = vpop.f32.mrb[11].mxu1 }
 0x59f   : > { %12801 = vmatmul.mubr.msk.bf16.gmra.mrb[116].mxu1 %vm2240_vm9, %v18137_v8 }
 0x5a0   : > { %12804 = vmatprep.mubr.msk.bf16.mxu1 %vm2240_vm9, %v18145_v27 }
 0x5a1   : > { %13387 = vmatmul.mubr.msk.bf16.gmra.mrb[52].mxu0 %vm2240_vm9, %v18054_v11 }
 0x5a2   : > { %v18375_v59 = vpop.f32.mrb[12].mxu1  ;;  %13390 = vmatprep.mubr.msk.bf16.mxu0 %vm2240_vm9, %v19666_v6 }
 0x5a3   : > { %v18379_v34 = vpop.f32.mrb[13].mxu1 }
 0x5a4   : > { %v18381_v25 = vpop.f32.mrb[14].mxu1 }
 0x5a5   : > { %v18383_v51 = vpop.f32.mrb[15].mxu1 }
 0x5a7   : > { %12805 = vmatmul.mubr.msk.bf16.gmra.mrb[120].mxu1 %vm2240_vm9, %v18149_v24 }
 0x5a8   : > { %12808 = vmatprep.mubr.msk.bf16.mxu1 %vm2240_vm9, %v18157_v32 }
 0x5a9   : > { %13391 = vmatmul.mubr.msk.bf16.gmra.mrb[56].mxu0 %vm2240_vm9, %v19668_v2 }
 0x5aa   : > { %v18393_v37 = vpop.f32.mrb[16].mxu1  ;;  %13394 = vmatprep.mubr.msk.bf16.mxu0 %vm2240_vm9, %v18387_v29 }
 0x5ab   : > { %v18397_v35 = vpop.f32.mrb[17].mxu1 }
 0x5ac   : > { %v18399_v31 = vpop.f32.mrb[18].mxu1 }
 0x5ad   : > { %v18401_v60 = vpop.f32.mrb[19].mxu1 }
 0x5af   : > { %12809 = vmatmul.mubr.msk.bf16.gmra.mrb[124].mxu1 %vm2240_vm9, %v18161_v0 }
 0x5b0   : > { %12878 = vmatprep.mubr.msk.bf16.mxu1 %vm2240_vm9, %v17986_v30 }
 0x5b1   : > { %13395 = vmatmul.mubr.msk.bf16.gmra.mrb[60].mxu0 %vm2240_vm9, %v9801_v42 }
 0x5b2   : > { %v18408_v10 = vpop.f32.mrb[20].mxu1  ;;  %13398 = vmatprep.mubr.msk.bf16.mxu0 %vm2240_vm9, %v18303_v48 }
 0x5b3   : > { %v18412_v63 = vpop.f32.mrb[21].mxu1 }
 0x5b4   : > { %v18414_v55 = vpop.f32.mrb[22].mxu1 }
 0x5b5   : > { %v18416_v43 = vpop.f32.mrb[23].mxu1 }
 0x5b7   : > { %12879 = vmatmul.mubr.msk.bf16.vlgmr.msra.gmra.mrb[64].mxu1 %vm2240_vm9, %v17982_v18 }
 0x5b8   : > { %12882 = vmatprep.mubr.msk.bf16.mxu1 %vm2240_vm9, %v17994_v19 }
 0x5b9   : > { %13399 = vmatmul.mubr.msk.bf16.gmra.mrb[64].mxu0 %vm2240_vm9, %v18088_v58 }
 0x5ba   : > { %v18424_v52 = vpop.f32.mrb[24].mxu1  ;;  %13402 = vmatprep.mubr.msk.bf16.mxu0 %vm2240_vm9, %v18097_v57 }
 0x5bb   : > { %v18428_v30 = vpop.f32.mrb[25].mxu1 }
 0x5bc   : > { %v18430_v15 = vpop.f32.mrb[26].mxu1 }
 0x5bd   : > { %v18432_v45 = vpop.f32.mrb[27].mxu1 }
 0x5bf   : > { %12883 = vmatmul.mubr.msk.bf16.gmra.mrb[68].mxu1 %vm2240_vm9, %v17996_v33 }
 0x5c0   : > { %12886 = vmatprep.mubr.msk.bf16.mxu1 %vm2240_vm9, %v18006_v40 }
 0x5c1   : > { %13403 = vmatmul.mubr.msk.bf16.gmra.mrb[68].mxu0 %vm2240_vm9, %v18101_v41 }
 0x5c2   : > { %v18440_v18 = vpop.f32.mrb[28].mxu1  ;;  %13406 = vmatprep.mubr.msk.bf16.mxu0 %vm2240_vm9, %v18109_v12 }
 0x5c3   : > { %v18444_v19 = vpop.f32.mrb[29].mxu1 }
 0x5c4   : > { %v18446_v20 = vpop.f32.mrb[30].mxu1 }
 0x5c5   : > { %v18448_v14 = vpop.f32.mrb[31].mxu1 }
 0x5c7   : > { %12887 = vmatmul.mubr.msk.bf16.gmra.mrb[72].mxu1 %vm2240_vm9, %v18008_v36 }
 0x5c8   : > { %12890 = vmatprep.mubr.msk.bf16.mxu1 %vm2240_vm9, %v18018_v62 }
 0x5c9   : > { %13407 = vmatmul.mubr.msk.bf16.gmra.mrb[72].mxu0 %vm2240_vm9, %v18113_v17 }
 0x5ca   : > { %v18456_v33 = vpop.f32.mrb[32].mxu1  ;;  %13410 = vmatprep.mubr.msk.bf16.mxu0 %vm2240_vm9, %v18121_v23 }
 0x5cb   : > { %v18460_v40 = vpop.f32.mrb[33].mxu1 }
 0x5cc   : > { %v18462_v3 = vpop.f32.mrb[34].mxu1 }
 0x5cd   : > { %19669 = vst [vmem:[#allocation58_spill] sm:$0xff] %v18462_v3  ;;  %v18464_v22 = vpop.f32.mrb[35].mxu1 }
 0x5cf   : > { %12891 = vmatmul.mubr.msk.bf16.gmra.mrb[76].mxu1 %vm2240_vm9, %v18020_v46 }
 0x5d0   : > { %12894 = vmatprep.mubr.msk.bf16.mxu1 %vm2240_vm9, %v18030_v13 }
 0x5d1   : > { %13411 = vmatmul.mubr.msk.bf16.gmra.mrb[76].mxu0 %vm2240_vm9, %v18125_v4 }
 0x5d2   : > { %v18472_v36 = vpop.f32.mrb[36].mxu1  ;;  %13414 = vmatprep.mubr.msk.bf16.mxu0 %vm2240_vm9, %v18133_v9 }
 0x5d3   : > { %v18476_v62 = vpop.f32.mrb[37].mxu1 }
 0x5d4   : > { %19670 = vst [vmem:[#allocation59_spill] sm:$0xff] %v18476_v62  ;;  %v18478_v42 = vpop.f32.mrb[38].mxu1 }
 0x5d5   : > { %19671 = vst [vmem:[#allocation56_spill] sm:$0xff] %v18478_v42  ;;  %v18480_v3 = vpop.f32.mrb[39].mxu1 }
 0x5d7   : > { %12895 = vmatmul.mubr.msk.bf16.gmra.mrb[80].mxu1 %vm2240_vm9, %v18032_v61 }
 0x5d8   : > { %12898 = vmatprep.mubr.msk.bf16.mxu1 %vm2240_vm9, %v19664_v16 }
 0x5d9   : > { %13415 = vmatmul.mubr.msk.bf16.gmra.mrb[80].mxu0 %vm2240_vm9, %v18137_v8 }
 0x5da   : > { %v18488_v46 = vpop.f32.mrb[40].mxu1  ;;  %13418 = vmatprep.mubr.msk.bf16.mxu0 %vm2240_vm9, %v18145_v27 }
 0x5db   : > { %v18492_v13 = vpop.f32.mrb[41].mxu1 }
 0x5dc   : > { %19672 = vst [vmem:[#allocation64_spill] sm:$0xff] %v18492_v13  ;;  %v18494_v62 = vpop.f32.mrb[42].mxu1 }
 0x5dd   : > { %19673 = vst [vmem:[#allocation66_spill] sm:$0xff] %v18494_v62  ;;  %v18496_v42 = vpop.f32.mrb[43].mxu1 }
 0x5df   : > { %12899 = vmatmul.mubr.msk.bf16.gmra.mrb[84].mxu1 %vm2240_vm9, %v19665_v5 }
 0x5e0   : > { %12902 = vmatprep.mubr.msk.bf16.mxu1 %vm2240_vm9, %v18054_v11 }
 0x5e1   : > { %13419 = vmatmul.mubr.msk.bf16.gmra.mrb[84].mxu0 %vm2240_vm9, %v18149_v24 }
 0x5e2   : > { %v18504_v61 = vpop.f32.mrb[44].mxu1  ;;  %13422 = vmatprep.mubr.msk.bf16.mxu0 %vm2240_vm9, %v18157_v32 }
 0x5e3   : > { %v18508_v16 = vpop.f32.mrb[45].mxu1 }
 0x5e4   : > { %19674 = vst [vmem:[#allocation21_spill] sm:$0xff] %v18508_v16  ;;  %v18510_v13 = vpop.f32.mrb[46].mxu1 }
 0x5e5   : > { %19675 = vst [vmem:[#allocation17_spill] sm:$0xff] %v18510_v13  ;;  %v18512_v62 = vpop.f32.mrb[47].mxu1 }
 0x5e6   : > { %19676 = vst [vmem:[#allocation70_spill] sm:$0xff] %v18512_v62  ;;  %v9817_v62 = vld [vmem:[#allocation2 + $0x2c8] sm:$0xff] }
 0x5e7   : > { %12903 = vmatmul.mubr.msk.bf16.gmra.mrb[88].mxu1 %vm2240_vm9, %v19666_v6  ;;  %v9818_v6 = vld [vmem:[#allocation2 + $0x2e0] sm:$0xff] }
 0x5e8   : > { %12906 = vmatprep.mubr.msk.bf16.mxu1 %vm2240_vm9, %v19668_v2 }
 0x5e9   : > { %13423 = vmatmul.mubr.msk.bf16.gmra.mrb[88].mxu0 %vm2240_vm9, %v18161_v0 }
 0x5ea   : > { %v18520_v11 = vpop.f32.mrb[48].mxu1  ;;  %13426 = vmatprep.mubr.msk.bf16.mxu0 %vm2240_vm9, %v18169_v56 }
 0x5eb   : > { %19677 = vst [vmem:[#allocation68_spill] sm:$0xff] %v18520_v11  ;;  %v18524_v5 = vpop.f32.mrb[49].mxu1 }
 0x5ec   : > { %19678 = vst [vmem:[#allocation63_spill] sm:$0xff] %v18524_v5  ;;  %v18526_v16 = vpop.f32.mrb[50].mxu1 }
 0x5ed   : > { %19679 = vst [vmem:[#allocation20_spill] sm:$0xff] %v18526_v16  ;;  %v18528_v13 = vpop.f32.mrb[51].mxu1 }
 0x5ee   : > { %19680 = vst [vmem:[#allocation16_spill] sm:$0xff] %v18528_v13  ;;  %v9819_v13 = vld [vmem:[#allocation2 + $0x2e8] sm:$0xff] }
 0x5ef   : > { %12907 = vmatmul.mubr.msk.bf16.gmra.mrb[92].mxu1 %vm2240_vm9, %v18387_v29  ;;  %v9820_v29 = vld [vmem:[#allocation2 + $0x2f0] sm:$0xff] }
 0x5f0   : > { %12910 = vmatprep.mubr.msk.bf16.mxu1 %vm2240_vm9, %v18078_v49 }
 0x5f1   : > { %13427 = vmatmul.mubr.msk.bf16.gmra.mrb[92].mxu0 %vm2240_vm9, %v9817_v62 }
 0x5f2   : > { %v18535_v2 = vpop.f32.mrb[52].mxu1  ;;  %13430 = vmatprep.mubr.msk.bf16.mxu0 %vm2240_vm9, %v9818_v6 }
 0x5f3   : > { %v18538_v11 = vpop.f32.mrb[53].mxu1 }
 0x5f4   : > { %v18540_v5 = vpop.f32.mrb[54].mxu1 }
 0x5f5   : > { %19681 = vst [vmem:[#allocation67_spill] sm:$0xff] %v18540_v5  ;;  %v18542_v16 = vpop.f32.mrb[55].mxu1 }
 0x5f6   : > { %19682 = vst [vmem:[#allocation61_spill] sm:$0xff] %v18542_v16  ;;  %v9821_v16 = vld [vmem:[#allocation2 + $0x2f8] sm:$0xff] }
 0x5f7   : > { %12911 = vmatmul.mubr.msk.bf16.gmra.mrb[96].mxu1 %vm2240_vm9, %v18303_v48  ;;  %v9822_v48 = vld [vmem:[#allocation2 + $0x300] sm:$0xff] }
 0x5f8   : > { %12914 = vmatprep.mubr.msk.bf16.mxu1 %vm2240_vm9, %v18088_v58 }
 0x5f9   : > { %13431 = vmatmul.mubr.msk.bf16.gmra.mrb[96].mxu0 %vm2240_vm9, %v9819_v13 }
 0x5fa   : > { %v18549_v49 = vpop.f32.mrb[56].mxu1  ;;  %13434 = vmatprep.mubr.msk.bf16.mxu0 %vm2240_vm9, %v9820_v29 }
 0x5fb   : > { %v18552_v62 = vpop.f32.mrb[57].mxu1 }
 0x5fc   : > { %19683 = vst [vmem:[#allocation23_spill] sm:$0xff] %v18552_v62  ;;  %v18554_v6 = vpop.f32.mrb[58].mxu1  ;;  %v18574_v62 = vld [vmem:[#allocation3] ss:$0 sm:$0xff] }
 0x5fd   : > { %19684 = vst [vmem:[#allocation25_spill] sm:$0xff] %v18554_v6  ;;  %v18556_v5 = vpop.f32.mrb[59].mxu1 }
 0x5fe   : > { %19685 = vst [vmem:[#allocation73_spill] sm:$0xff] %v18556_v5  ;;  %v9823_v5 = vld [vmem:[#allocation2 + $0x308] sm:$0xff] }
 0x5ff   : > { %12915 = vmatmul.mubr.msk.bf16.gmra.mrb[100].mxu1 %vm2240_vm9, %v18097_v57  ;;  %v9824_v57 = vld [vmem:[#allocation2 + $0x310] sm:$0xff] }
 0x600   : > { %12918 = vmatprep.mubr.msk.bf16.mxu1 %vm2240_vm9, %v18101_v41  ;;  %v13464_v41 = vadd.f32 %v18327_v44, %v18574_v62 }
 0x601   : > { %13435 = vmatmul.mubr.msk.bf16.gmra.mrb[100].mxu0 %vm2240_vm9, %v9821_v16  ;;  %v13466_v16 = vadd.f32 %v18574_v62, %v18331_v28  ;;  %v9826_v28 = vld [vmem:[#allocation2 + $0x320] sm:$0xff] }
 0x602   : > { %v18563_v58 = vpop.f32.mrb[60].mxu1  ;;  %13438 = vmatprep.mubr.msk.bf16.mxu0 %vm2240_vm9, %v9822_v48 }
 0x603   : > { %19686 = vst [vmem:[#allocation75_spill] sm:$0xff] %v18563_v58  ;;  %v18566_v13 = vpop.f32.mrb[61].mxu1 }
 0x604   : > { %19687 = vst [vmem:[#allocation26_spill] sm:$0xff] %v18566_v13  ;;  %v18568_v29 = vpop.f32.mrb[62].mxu1  ;;  %v9825_v13 = vld [vmem:[#allocation2 + $0x318] sm:$0xff] }
 0x605   : > { %19688 = vst [vmem:[#allocation28_spill] sm:$0xff] %v18568_v29  ;;  %v18570_v6 = vpop.f32.mrb[63].mxu1 }
 0x606   : > { %19689 = vst [vmem:[#allocation76_spill] sm:$0xff] %v18570_v6 }
 0x607   : > { %12919 = vmatmul.mubr.msk.bf16.gmra.mrb[104].mxu1 %vm2240_vm9, %v18109_v12  ;;  %v13468_v12 = vadd.f32 %v18333_v54, %v18574_v62 }
 0x608   : > { %12922 = vmatprep.mubr.msk.bf16.mxu1 %vm2240_vm9, %v18113_v17  ;;  %v13470_v17 = vadd.f32 %v18574_v62, %v18335_v1  ;;  %v13474_v1 = vadd.f32 %v18574_v62, %v18347_v50  ;;  %v9828_v50 = vld [vmem:[#allocation2 + $0x330] sm:$0xff] }
 0x609   : > { %13439 = vmatmul.mubr.msk.bf16.gmra.mrb[104].mxu0 %vm2240_vm9, %v9823_v5 }
 0x60a   : > { %13442 = vmatprep.mubr.msk.bf16.mxu0 %vm2240_vm9, %v9824_v57 }
 0x60c   : > { %v13336_v48 = vpop.f32.mrb[0].mxu0 }
 0x60d   : > { %v13465_v6 = vadd.f32 %v13464_v41, %v13336_v48  ;;  %v10071_v29 = vpop.f32.mrb[1].mxu0  ;;  %v9827_v48 = vld [vmem:[#allocation2 + $0x328] sm:$0xff] }
 0x60e   : > { %v13467_v5 = vadd.f32 %v13466_v16, %v10071_v29  ;;  %v13337_v57 = vpop.f32.mrb[2].mxu0 }
 0x60f   : > { %10712 = vst.msk [vmem:[%s14934_s27 + $0x10] sm:$0xff] %vm2046_vm8, %v13465_v6  ;;  %v13469_v44 = vadd.f32 %v13468_v12, %v13337_v57  ;;  %v10074_v58 = vpop.f32.mrb[3].mxu0  ;;  %12923 = vmatmul.mubr.msk.bf16.gmra.mrb[108].mxu1 %vm2240_vm9, %v18121_v23  ;;  %v13472_v23 = vadd.f32 %v18343_v39, %v18574_v62 }
 0x610   : > { %10710 = vst.msk [vmem:[%s14934_s27] sm:$0xff] %vm2046_vm8, %v13467_v5  ;;  %v13471_v54 = vadd.f32 %v13470_v17, %v10074_v58  ;;  %12926 = vmatprep.mubr.msk.bf16.mxu1 %vm2240_vm9, %v18125_v4  ;;  %v13476_v4 = vadd.f32 %v18349_v7, %v18574_v62 }
 0x611   : > { %10713 = vst.msk [vmem:[%s14934_s27 + $0x18] sm:$0xff] %vm2046_vm8, %v13469_v44  ;;  %13443 = vmatmul.mubr.msk.bf16.gmra.mrb[108].mxu0 %vm2240_vm9, %v9825_v13  ;;  %v13478_v13 = vadd.f32 %v18574_v62, %v18351_v26  ;;  %v13482_v26 = vadd.f32 %v18574_v62, %v18363_v21  ;;  %v13486_v44 = vadd.f32 %v18574_v62, %v18367_v53  ;;  %v9830_v21 = vld [vmem:[#allocation2 + $0x340] sm:$0xff] }
 0x612   : > { %10711 = vst.msk [vmem:[%s14934_s27 + $0x8] sm:$0xff] %vm2046_vm8, %v13471_v54  ;;  %13446 = vmatprep.mubr.msk.bf16.mxu0 %vm2240_vm9, %v9826_v28  ;;  %v13490_v53 = vadd.f32 %v18574_v62, %v18379_v34  ;;  %v9832_v34 = vld [vmem:[#allocation2 + $0x350] sm:$0xff] }
 0x614   : > { %v13340_v6 = vpop.f32.mrb[4].mxu0 }
 0x615   : > { %v13473_v58 = vadd.f32 %v13472_v23, %v13340_v6  ;;  %v10087_v29 = vpop.f32.mrb[5].mxu0  ;;  %v9829_v23 = vld [vmem:[#allocation2 + $0x338] sm:$0xff] }
 0x616   : > { %v13475_v41 = vadd.f32 %v13474_v1, %v10087_v29  ;;  %v13341_v16 = vpop.f32.mrb[6].mxu0  ;;  %v13494_v29 = vadd.f32 %v18574_v62, %v18383_v51  ;;  %v13498_v51 = vadd.f32 %v18574_v62, %v18397_v35 }
 0x617   : > { %10716 = vst.msk [vmem:[%s14934_s27 + $0x30] sm:$0xff] %vm2046_vm8, %v13473_v58  ;;  %v13477_v39 = vadd.f32 %v13476_v4, %v13341_v16  ;;  %v10090_v12 = vpop.f32.mrb[7].mxu0  ;;  %12927 = vmatmul.mubr.msk.bf16.gmra.mrb[112].mxu1 %vm2240_vm9, %v18133_v9  ;;  %v13480_v9 = vadd.f32 %v18359_v47, %v18574_v62  ;;  %v9831_v16 = vld [vmem:[#allocation2 + $0x348] sm:$0xff] }
 0x618   : > { %10714 = vst.msk [vmem:[%s14934_s27 + $0x20] sm:$0xff] %vm2046_vm8, %v13475_v41  ;;  %v13479_v7 = vadd.f32 %v13478_v13, %v10090_v12  ;;  %12930 = vmatprep.mubr.msk.bf16.mxu1 %vm2240_vm9, %v18137_v8  ;;  %v13484_v8 = vadd.f32 %v18365_v38, %v18574_v62 }
 0x619   : > { %10717 = vst.msk [vmem:[%s14934_s27 + $0x38] sm:$0xff] %vm2046_vm8, %v13477_v39  ;;  %13447 = vmatmul.mubr.msk.bf16.gmra.mrb[112].mxu0 %vm2240_vm9, %v9827_v48 }
 0x61a   : > { %10715 = vst.msk [vmem:[%s14934_s27 + $0x28] sm:$0xff] %vm2046_vm8, %v13479_v7  ;;  %13450 = vmatprep.mubr.msk.bf16.mxu0 %vm2240_vm9, %v9828_v50  ;;  %v13502_v7 = vadd.f32 %v18574_v62, %v18401_v60  ;;  %v13506_v60 = vadd.f32 %v18574_v62, %v18412_v63  ;;  %v13512_v63 = vadd.f32 %v18424_v52, %v18574_v62 }
 0x61c   : > { %v13344_v17 = vpop.f32.mrb[8].mxu0 }
 0x61d   : > { %v13481_v5 = vadd.f32 %v13480_v9, %v13344_v17  ;;  %v10103_v57 = vpop.f32.mrb[9].mxu0  ;;  %v9833_v17 = vld [vmem:[#allocation2 + $0x358] sm:$0xff] }
 0x61e   : > { %v13483_v28 = vadd.f32 %v13482_v26, %v10103_v57  ;;  %v13345_v54 = vpop.f32.mrb[10].mxu0 }
 0x61f   : > { %10720 = vst.msk [vmem:[%s14934_s27 + $0x50] sm:$0xff] %vm2046_vm8, %v13481_v5  ;;  %v13485_v47 = vadd.f32 %v13484_v8, %v13345_v54  ;;  %v10106_v1 = vpop.f32.mrb[11].mxu0  ;;  %12931 = vmatmul.mubr.msk.bf16.gmra.mrb[116].mxu1 %vm2240_vm9, %v18145_v27  ;;  %v13488_v27 = vadd.f32 %v18375_v59, %v18574_v62 }
 0x620   : > { %10718 = vst.msk [vmem:[%s14934_s27 + $0x40] sm:$0xff] %vm2046_vm8, %v13483_v28  ;;  %v13487_v38 = vadd.f32 %v13486_v44, %v10106_v1  ;;  %12934 = vmatprep.mubr.msk.bf16.mxu1 %vm2240_vm9, %v18149_v24  ;;  %v13492_v24 = vadd.f32 %v18381_v25, %v18574_v62  ;;  %v13510_v28 = vadd.f32 %v18574_v62, %v18416_v43 }
 0x621   : > { %10721 = vst.msk [vmem:[%s14934_s27 + $0x58] sm:$0xff] %vm2046_vm8, %v13485_v47  ;;  %13451 = vmatmul.mubr.msk.bf16.gmra.mrb[116].mxu0 %vm2240_vm9, %v9829_v23 }
 0x622   : > { %10719 = vst.msk [vmem:[%s14934_s27 + $0x48] sm:$0xff] %vm2046_vm8, %v13487_v38  ;;  %13454 = vmatprep.mubr.msk.bf16.mxu0 %vm2240_vm9, %v9830_v21  ;;  %v13516_v21 = vadd.f32 %v18430_v15, %v18574_v62  ;;  %v13522_v15 = vadd.f32 %v18574_v62, %v18444_v19  ;;  %v13528_v19 = vadd.f32 %v18456_v33, %v18574_v62 }
 0x624   : > { %v13348_v6 = vpop.f32.mrb[12].mxu0 }
 0x625   : > { %v13489_v4 = vadd.f32 %v13488_v27, %v13348_v6  ;;  %v10119_v58 = vpop.f32.mrb[13].mxu0 }
 0x626   : > { %v13491_v13 = vadd.f32 %v13490_v53, %v10119_v58  ;;  %v13349_v41 = vpop.f32.mrb[14].mxu0  ;;  %v13518_v53 = vadd.f32 %v18574_v62, %v18432_v45 }
 0x627   : > { %10724 = vst.msk [vmem:[%s14934_s27 + $0x70] sm:$0xff] %vm2046_vm8, %v13489_v4  ;;  %v13493_v59 = vadd.f32 %v13492_v24, %v13349_v41  ;;  %v10122_v48 = vpop.f32.mrb[15].mxu0  ;;  %12935 = vmatmul.mubr.msk.bf16.gmra.mrb[120].mxu1 %vm2240_vm9, %v18157_v32  ;;  %v13496_v32 = vadd.f32 %v18393_v37, %v18574_v62 }
 0x628   : > { %10722 = vst.msk [vmem:[%s14934_s27 + $0x60] sm:$0xff] %vm2046_vm8, %v13491_v13  ;;  %v13495_v25 = vadd.f32 %v13494_v29, %v10122_v48  ;;  %12938 = vmatprep.mubr.msk.bf16.mxu1 %vm2240_vm9, %v18161_v0  ;;  %v13500_v0 = vadd.f32 %v18399_v31, %v18574_v62  ;;  %v13504_v31 = vadd.f32 %v18408_v10, %v18574_v62 }
 0x629   : > { %10725 = vst.msk [vmem:[%s14934_s27 + $0x78] sm:$0xff] %vm2046_vm8, %v13493_v59  ;;  %13455 = vmatmul.mubr.msk.bf16.gmra.mrb[120].mxu0 %vm2240_vm9, %v9831_v16  ;;  %v13524_v29 = vadd.f32 %v18446_v20, %v18574_v62  ;;  %v13526_v16 = vadd.f32 %v18574_v62, %v18448_v14  ;;  %v13530_v20 = vadd.f32 %v18574_v62, %v18460_v40 }
 0x62a   : > { %10723 = vst.msk [vmem:[%s14934_s27 + $0x68] sm:$0xff] %vm2046_vm8, %v13495_v25  ;;  %13458 = vmatprep.mubr.msk.bf16.mxu0 %vm2240_vm9, %v9832_v34  ;;  %v13536_v40 = vadd.f32 %v18472_v36, %v18574_v62 }
 0x62c   : > { %v13352_v39 = vpop.f32.mrb[16].mxu0 }
 0x62d   : > { %v13497_v12 = vadd.f32 %v13496_v32, %v13352_v39  ;;  %v10135_v50 = vpop.f32.mrb[17].mxu0  ;;  %v19690_v32 = vld [vmem:[#allocation58_spill] sm:$0xff] }
 0x62e   : > { %v13499_v9 = vadd.f32 %v13498_v51, %v10135_v50  ;;  %v13353_v26 = vpop.f32.mrb[18].mxu0  ;;  %v13532_v51 = vadd.f32 %v19690_v32, %v18574_v62 }
 0x62f   : > { %10728 = vst.msk [vmem:[%s14934_s27 + $0x90] sm:$0xff] %vm2046_vm8, %v13497_v12  ;;  %v13501_v37 = vadd.f32 %v13500_v0, %v13353_v26  ;;  %v10138_v8 = vpop.f32.mrb[19].mxu0  ;;  %12939 = vmatmul.mubr.msk.bf16.gmra.mrb[124].mxu1 %vm2240_vm9, %v18169_v56  ;;  %v13508_v56 = vadd.f32 %v18414_v55, %v18574_v62  ;;  %v13514_v55 = vadd.f32 %v18574_v62, %v18428_v30 }
 0x630   : > { %10726 = vst.msk [vmem:[%s14934_s27 + $0x80] sm:$0xff] %vm2046_vm8, %v13499_v9  ;;  %v13503_v35 = vadd.f32 %v13502_v7, %v10138_v8  ;;  %v13520_v30 = vadd.f32 %v18440_v18, %v18574_v62  ;;  %v13534_v12 = vadd.f32 %v18574_v62, %v18464_v22  ;;  %v19691_v22 = vld [vmem:[#allocation59_spill] sm:$0xff]  ;;  %v19692_v8 = vld [vmem:[#allocation56_spill] sm:$0xff] }
 0x631   : > { %10729 = vst.msk [vmem:[%s14934_s27 + $0x98] sm:$0xff] %vm2046_vm8, %v13501_v37  ;;  %13459 = vmatmul.mubr.msk.bf16.gmra.mrb[124].mxu0 %vm2240_vm9, %v9833_v17  ;;  %v13538_v17 = vadd.f32 %v18574_v62, %v19691_v22 }
 0x632   : > { %10727 = vst.msk [vmem:[%s14934_s27 + $0x88] sm:$0xff] %vm2046_vm8, %v13503_v35  ;;  %v13540_v35 = vadd.f32 %v19692_v8, %v18574_v62 }
 0x634   : > { %v13356_v5 = vpop.f32.mrb[20].mxu0 }
 0x635   : > { %v13505_v57 = vadd.f32 %v13504_v31, %v13356_v5  ;;  %v10151_v44 = vpop.f32.mrb[21].mxu0  ;;  %v13542_v5 = vadd.f32 %v18574_v62, %v18480_v3  ;;  %v13544_v3 = vadd.f32 %v18488_v46, %v18574_v62 }
 0x636   : > { %v13507_v54 = vadd.f32 %v13506_v60, %v10151_v44  ;;  %v13357_v23 = vpop.f32.mrb[22].mxu0 }
 0x637   : > { %10732 = vst.msk [vmem:[%s14934_s27 + $0xb0] sm:$0xff] %vm2046_vm8, %v13505_v57  ;;  %v13509_v47 = vadd.f32 %v13508_v56, %v13357_v23  ;;  %v10154_v1 = vpop.f32.mrb[23].mxu0 }
 0x638   : > { %10730 = vst.msk [vmem:[%s14934_s27 + $0xa0] sm:$0xff] %vm2046_vm8, %v13507_v54  ;;  %v13511_v10 = vadd.f32 %v13510_v28, %v10154_v1  ;;  %v19693_v54 = vld [vmem:[#allocation64_spill] sm:$0xff]  ;;  %v19694_v1 = vld [vmem:[#allocation66_spill] sm:$0xff] }
 0x639   : > { %10733 = vst.msk [vmem:[%s14934_s27 + $0xb8] sm:$0xff] %vm2046_vm8, %v13509_v47  ;;  %v13546_v23 = vadd.f32 %v18574_v62, %v19693_v54  ;;  %v19705_v54 = vld [vmem:[#allocation25_spill] sm:$0xff] }
 0x63a   : > { %10731 = vst.msk [vmem:[%s14934_s27 + $0xa8] sm:$0xff] %vm2046_vm8, %v13511_v10  ;;  %v13548_v10 = vadd.f32 %v19694_v1, %v18574_v62 }
 0x63c   : > { %v13360_v43 = vpop.f32.mrb[24].mxu0 }
 0x63d   : > { %v13513_v38 = vadd.f32 %v13512_v63, %v13360_v43  ;;  %v10167_v27 = vpop.f32.mrb[25].mxu0  ;;  %v13550_v43 = vadd.f32 %v18574_v62, %v18496_v42  ;;  %v13552_v42 = vadd.f32 %v18504_v61, %v18574_v62 }
 0x63e   : > { %v13515_v6 = vadd.f32 %v13514_v55, %v10167_v27  ;;  %v13361_v24 = vpop.f32.mrb[26].mxu0 }
 0x63f   : > { %10736 = vst.msk [vmem:[%s14934_s27 + $0xd0] sm:$0xff] %vm2046_vm8, %v13513_v38  ;;  %v13517_v4 = vadd.f32 %v13516_v21, %v13361_v24  ;;  %v10170_v58 = vpop.f32.mrb[27].mxu0 }
 0x640   : > { %10734 = vst.msk [vmem:[%s14934_s27 + $0xc0] sm:$0xff] %vm2046_vm8, %v13515_v6  ;;  %v13519_v52 = vadd.f32 %v13518_v53, %v10170_v58  ;;  %v19695_v6 = vld [vmem:[#allocation21_spill] sm:$0xff] }
 0x641   : > { %10737 = vst.msk [vmem:[%s14934_s27 + $0xd8] sm:$0xff] %vm2046_vm8, %v13517_v4  ;;  %v13554_v24 = vadd.f32 %v18574_v62, %v19695_v6  ;;  %v19696_v58 = vld [vmem:[#allocation17_spill] sm:$0xff] }
 0x642   : > { %10735 = vst.msk [vmem:[%s14934_s27 + $0xc8] sm:$0xff] %vm2046_vm8, %v13519_v52  ;;  %v13556_v52 = vadd.f32 %v19696_v58, %v18574_v62 }
 0x644   : > { %v13364_v45 = vpop.f32.mrb[28].mxu0 }
 0x645   : > { %v13521_v13 = vadd.f32 %v13520_v30, %v13364_v45  ;;  %v10183_v41 = vpop.f32.mrb[29].mxu0  ;;  %v19697_v45 = vld [vmem:[#allocation70_spill] sm:$0xff] }
 0x646   : > { %v13523_v59 = vadd.f32 %v13522_v15, %v10183_v41  ;;  %v13365_v48 = vpop.f32.mrb[30].mxu0 }
 0x647   : > { %10740 = vst.msk [vmem:[%s14934_s27 + $0xf0] sm:$0xff] %vm2046_vm8, %v13521_v13  ;;  %v13525_v34 = vadd.f32 %v13524_v29, %v13365_v48  ;;  %v10186_v25 = vpop.f32.mrb[31].mxu0  ;;  %v13558_v29 = vadd.f32 %v18574_v62, %v19697_v45  ;;  %v19698_v48 = vld [vmem:[#allocation68_spill] sm:$0xff] }
 0x648   : > { %10738 = vst.msk [vmem:[%s14934_s27 + $0xe0] sm:$0xff] %vm2046_vm8, %v13523_v59  ;;  %v13527_v18 = vadd.f32 %v13526_v16, %v10186_v25  ;;  %v19699_v25 = vld [vmem:[#allocation63_spill] sm:$0xff] }
 0x649   : > { %10741 = vst.msk [vmem:[%s14934_s27 + $0xf8] sm:$0xff] %vm2046_vm8, %v13525_v34  ;;  %v13560_v34 = vadd.f32 %v19698_v48, %v18574_v62 }
 0x64a   : > { %10739 = vst.msk [vmem:[%s14934_s27 + $0xe8] sm:$0xff] %vm2046_vm8, %v13527_v18  ;;  %v13562_v18 = vadd.f32 %v18574_v62, %v19699_v25 }
 0x64c   : > { %v13368_v14 = vpop.f32.mrb[32].mxu0 }
 0x64d   : > { %v13529_v39 = vadd.f32 %v13528_v19, %v13368_v14  ;;  %v10199_v0 = vpop.f32.mrb[33].mxu0 }
 0x64e   : > { %v13531_v50 = vadd.f32 %v13530_v20, %v10199_v0  ;;  %v13369_v7 = vpop.f32.mrb[34].mxu0  ;;  %v19700_v20 = vld [vmem:[#allocation20_spill] sm:$0xff] }
 0x64f   : > { %10744 = vst.msk [vmem:[%s14934_s27 + $0x110] sm:$0xff] %vm2046_vm8, %v13529_v39  ;;  %v13533_v9 = vadd.f32 %v13532_v51, %v13369_v7  ;;  %v10202_v26 = vpop.f32.mrb[35].mxu0  ;;  %v13564_v14 = vadd.f32 %v19700_v20, %v18574_v62  ;;  %v19701_v39 = vld [vmem:[#allocation16_spill] sm:$0xff] }
 0x650   : > { %10742 = vst.msk [vmem:[%s14934_s27 + $0x100] sm:$0xff] %vm2046_vm8, %v13531_v50  ;;  %v13535_v33 = vadd.f32 %v13534_v12, %v10202_v26  ;;  %v13566_v0 = vadd.f32 %v18574_v62, %v19701_v39 }
 0x651   : > { %10745 = vst.msk [vmem:[%s14934_s27 + $0x118] sm:$0xff] %vm2046_vm8, %v13533_v9 }
 0x652   : > { %10743 = vst.msk [vmem:[%s14934_s27 + $0x108] sm:$0xff] %vm2046_vm8, %v13535_v33  ;;  %v13568_v33 = vadd.f32 %v18535_v2, %v18574_v62  ;;  %v13576_v2 = vadd.f32 %v18549_v49, %v18574_v62 }
 0x654   : > { %v13372_v37 = vpop.f32.mrb[36].mxu0 }
 0x655   : > { %v13537_v31 = vadd.f32 %v13536_v40, %v13372_v37  ;;  %v10215_v60 = vpop.f32.mrb[37].mxu0  ;;  %v13570_v40 = vadd.f32 %v18574_v62, %v18538_v11 }
 0x656   : > { %v13539_v56 = vadd.f32 %v13538_v17, %v10215_v60  ;;  %v13373_v57 = vpop.f32.mrb[38].mxu0  ;;  %v19702_v17 = vld [vmem:[#allocation67_spill] sm:$0xff] }
 0x657   : > { %10748 = vst.msk [vmem:[%s14934_s27 + $0x130] sm:$0xff] %vm2046_vm8, %v13537_v31  ;;  %v13541_v44 = vadd.f32 %v13540_v35, %v13373_v57  ;;  %v10218_v28 = vpop.f32.mrb[39].mxu0  ;;  %v13572_v37 = vadd.f32 %v19702_v17, %v18574_v62  ;;  %v19703_v31 = vld [vmem:[#allocation61_spill] sm:$0xff] }
 0x658   : > { %10746 = vst.msk [vmem:[%s14934_s27 + $0x120] sm:$0xff] %vm2046_vm8, %v13539_v56  ;;  %v13543_v36 = vadd.f32 %v13542_v5, %v10218_v28  ;;  %v13574_v60 = vadd.f32 %v18574_v62, %v19703_v31  ;;  %v19704_v28 = vld [vmem:[#allocation23_spill] sm:$0xff] }
 0x659   : > { %10749 = vst.msk [vmem:[%s14934_s27 + $0x138] sm:$0xff] %vm2046_vm8, %v13541_v44 }
 0x65a   : > { %10747 = vst.msk [vmem:[%s14934_s27 + $0x128] sm:$0xff] %vm2046_vm8, %v13543_v36  ;;  %v13578_v36 = vadd.f32 %v18574_v62, %v19704_v28 }
 0x65c   : > { %v13376_v47 = vpop.f32.mrb[40].mxu0 }
 0x65d   : > { %v13545_v63 = vadd.f32 %v13544_v3, %v13376_v47  ;;  %v10231_v55 = vpop.f32.mrb[41].mxu0 }
 0x65e   : > { %v13547_v21 = vadd.f32 %v13546_v23, %v10231_v55  ;;  %v13377_v38 = vpop.f32.mrb[42].mxu0  ;;  %v13580_v23 = vadd.f32 %v19705_v54, %v18574_v62 }
 0x65f   : > { %10752 = vst.msk [vmem:[%s14934_s27 + $0x150] sm:$0xff] %vm2046_vm8, %v13545_v63  ;;  %v13549_v27 = vadd.f32 %v13548_v10, %v13377_v38  ;;  %v10234_v53 = vpop.f32.mrb[43].mxu0  ;;  %v19706_v10 = vld [vmem:[#allocation73_spill] sm:$0xff] }
 0x660   : > { %10750 = vst.msk [vmem:[%s14934_s27 + $0x140] sm:$0xff] %vm2046_vm8, %v13547_v21  ;;  %v13551_v46 = vadd.f32 %v13550_v43, %v10234_v53  ;;  %v13582_v63 = vadd.f32 %v18574_v62, %v19706_v10 }
 0x661   : > { %10753 = vst.msk [vmem:[%s14934_s27 + $0x158] sm:$0xff] %vm2046_vm8, %v13549_v27  ;;  %v19707_v27 = vld [vmem:[#allocation75_spill] sm:$0xff] }
 0x662   : > { %10751 = vst.msk [vmem:[%s14934_s27 + $0x148] sm:$0xff] %vm2046_vm8, %v13551_v46  ;;  %v13584_v53 = vadd.f32 %v19707_v27, %v18574_v62  ;;  %v19708_v46 = vld [vmem:[#allocation26_spill] sm:$0xff] }
 0x664   : > { %v13380_v4 = vpop.f32.mrb[44].mxu0 }
 0x665   : > { %v13553_v30 = vadd.f32 %v13552_v42, %v13380_v4  ;;  %v10247_v15 = vpop.f32.mrb[45].mxu0  ;;  %v13586_v42 = vadd.f32 %v18574_v62, %v19708_v46 }
 0x666   : > { %v13555_v13 = vadd.f32 %v13554_v24, %v10247_v15  ;;  %v13381_v41 = vpop.f32.mrb[46].mxu0  ;;  %v19709_v24 = vld [vmem:[#allocation28_spill] sm:$0xff] }
 0x667   : > { %10756 = vst.msk [vmem:[%s14934_s27 + $0x170] sm:$0xff] %vm2046_vm8, %v13553_v30  ;;  %v13557_v16 = vadd.f32 %v13556_v52, %v13381_v41  ;;  %v10250_v59 = vpop.f32.mrb[47].mxu0  ;;  %v13588_v4 = vadd.f32 %v19709_v24, %v18574_v62  ;;  %v19710_v30 = vld [vmem:[#allocation76_spill] sm:$0xff] }
 0x668   : > { %10754 = vst.msk [vmem:[%s14934_s27 + $0x160] sm:$0xff] %vm2046_vm8, %v13555_v13  ;;  %v13559_v61 = vadd.f32 %v13558_v29, %v10250_v59  ;;  %v13590_v15 = vadd.f32 %v18574_v62, %v19710_v30 }
 0x669   : > { %10757 = vst.msk [vmem:[%s14934_s27 + $0x178] sm:$0xff] %vm2046_vm8, %v13557_v16 }
 0x66a   : > { %10755 = vst.msk [vmem:[%s14934_s27 + $0x168] sm:$0xff] %vm2046_vm8, %v13559_v61 }
 0x66c   : > { %v13384_v19 = vpop.f32.mrb[48].mxu0 }
 0x66d   : > { %v13561_v32 = vadd.f32 %v13560_v34, %v13384_v19  ;;  %v10263_v51 = vpop.f32.mrb[49].mxu0 }
 0x66e   : > { %v13563_v12 = vadd.f32 %v13562_v18, %v10263_v51  ;;  %v13385_v50 = vpop.f32.mrb[50].mxu0 }
 0x66f   : > { %10760 = vst.msk [vmem:[%s14934_s27 + $0x190] sm:$0xff] %vm2046_vm8, %v13561_v32  ;;  %v13565_v7 = vadd.f32 %v13564_v14, %v13385_v50  ;;  %v10266_v9 = vpop.f32.mrb[51].mxu0 }
 0x670   : > { %10758 = vst.msk [vmem:[%s14934_s27 + $0x180] sm:$0xff] %vm2046_vm8, %v13563_v12  ;;  %v13567_v26 = vadd.f32 %v13566_v0, %v10266_v9 }
 0x671   : > { %10761 = vst.msk [vmem:[%s14934_s27 + $0x198] sm:$0xff] %vm2046_vm8, %v13565_v7 }
 0x672   : > { %10759 = vst.msk [vmem:[%s14934_s27 + $0x188] sm:$0xff] %vm2046_vm8, %v13567_v26 }
 0x674   : > { %v13388_v22 = vpop.f32.mrb[52].mxu0 }
 0x675   : > { %v13569_v8 = vadd.f32 %v13568_v33, %v13388_v22  ;;  %v10279_v35 = vpop.f32.mrb[53].mxu0 }
 0x676   : > { %v13571_v5 = vadd.f32 %v13570_v40, %v10279_v35  ;;  %v13389_v56 = vpop.f32.mrb[54].mxu0 }
 0x677   : > { %10764 = vst.msk [vmem:[%s14934_s27 + $0x1b0] sm:$0xff] %vm2046_vm8, %v13569_v8  ;;  %v13573_v57 = vadd.f32 %v13572_v37, %v13389_v56  ;;  %v10282_v44 = vpop.f32.mrb[55].mxu0 }
 0x678   : > { %10762 = vst.msk [vmem:[%s14934_s27 + $0x1a0] sm:$0xff] %vm2046_vm8, %v13571_v5  ;;  %v13575_v11 = vadd.f32 %v13574_v60, %v10282_v44 }
 0x679   : > { %10765 = vst.msk [vmem:[%s14934_s27 + $0x1b8] sm:$0xff] %vm2046_vm8, %v13573_v57 }
 0x67a   : > { %10763 = vst.msk [vmem:[%s14934_s27 + $0x1a8] sm:$0xff] %vm2046_vm8, %v13575_v11 }
 0x67c   : > { %v13392_v3 = vpop.f32.mrb[56].mxu0 }
 0x67d   : > { %v13577_v47 = vadd.f32 %v13576_v2, %v13392_v3  ;;  %v10295_v1 = vpop.f32.mrb[57].mxu0 }
 0x67e   : > { %v13579_v55 = vadd.f32 %v13578_v36, %v10295_v1  ;;  %v13393_v43 = vpop.f32.mrb[58].mxu0 }
 0x67f   : > { %10768 = vst.msk [vmem:[%s14934_s27 + $0x1d0] sm:$0xff] %vm2046_vm8, %v13577_v47  ;;  %v13581_v21 = vadd.f32 %v13580_v23, %v13393_v43  ;;  %v10298_v38 = vpop.f32.mrb[59].mxu0 }
 0x680   : > { %10766 = vst.msk [vmem:[%s14934_s27 + $0x1c0] sm:$0xff] %vm2046_vm8, %v13579_v55  ;;  %v13583_v49 = vadd.f32 %v13582_v63, %v10298_v38 }
 0x681   : > { %10769 = vst.msk [vmem:[%s14934_s27 + $0x1d8] sm:$0xff] %vm2046_vm8, %v13581_v21 }
 0x682   : > { %10767 = vst.msk [vmem:[%s14934_s27 + $0x1c8] sm:$0xff] %vm2046_vm8, %v13583_v49 }
 0x684   : > { %v13396_v6 = vpop.f32.mrb[60].mxu0 }
 0x685   : > { %v13585_v58 = vadd.f32 %v13584_v53, %v13396_v6  ;;  %v10311_v52 = vpop.f32.mrb[61].mxu0 }
 0x686   : > { %v13587_v45 = vadd.f32 %v13586_v42, %v10311_v52  ;;  %v13397_v29 = vpop.f32.mrb[62].mxu0 }
 0x687   : > { %10772 = vst.msk [vmem:[%s14934_s27 + $0x1f0] sm:$0xff] %vm2046_vm8, %v13585_v58  ;;  %v13589_v13 = vadd.f32 %v13588_v4, %v13397_v29  ;;  %v10314_v41 = vpop.f32.mrb[63].mxu0 }
 0x688   : > { %10770 = vst.msk [vmem:[%s14934_s27 + $0x1e0] sm:$0xff] %vm2046_vm8, %v13587_v45  ;;  %v13591_v16 = vadd.f32 %v13590_v15, %v10314_v41 }
 0x689   : > { %10773 = vst.msk [vmem:[%s14934_s27 + $0x1f8] sm:$0xff] %vm2046_vm8, %v13589_v13 }
 0x68a   : > { %10771 = vst.msk [vmem:[%s14934_s27 + $0x1e8] sm:$0xff] %vm2046_vm8, %v13591_v16  ;;  %v12880_v59 = vpop.f32.mrb[64].mxu1 }
 0x68b   : > { %v13592_v61 = vadd.f32 %v12880_v59, %v18574_v62  ;;  %v6564_v48 = vpop.f32.mrb[65].mxu1 }
 0x68c   : > { %v13400_v34 = vpop.f32.mrb[64].mxu0  ;;  %v13594_v25 = vadd.f32 %v18574_v62, %v6564_v48  ;;  %v12881_v18 = vpop.f32.mrb[66].mxu1 }
 0x68d   : > { %v13593_v19 = vadd.f32 %v13592_v61, %v13400_v34  ;;  %v10327_v20 = vpop.f32.mrb[65].mxu0  ;;  %v13596_v14 = vadd.f32 %v12881_v18, %v18574_v62  ;;  %v6567_v32 = vpop.f32.mrb[67].mxu1 }
 0x68e   : > { %v13595_v51 = vadd.f32 %v13594_v25, %v10327_v20  ;;  %v13401_v39 = vpop.f32.mrb[66].mxu0  ;;  %v13598_v0 = vadd.f32 %v18574_v62, %v6567_v32 }
 0x68f   : > { %10776 = vst.msk [vmem:[%s14934_s27 + $0x210] sm:$0xff] %vm2046_vm8, %v13593_v19  ;;  %v13597_v12 = vadd.f32 %v13596_v14, %v13401_v39  ;;  %v10330_v50 = vpop.f32.mrb[67].mxu0 }
 0x690   : > { %10774 = vst.msk [vmem:[%s14934_s27 + $0x200] sm:$0xff] %vm2046_vm8, %v13595_v51  ;;  %v13599_v7 = vadd.f32 %v13598_v0, %v10330_v50 }
 0x691   : > { %10777 = vst.msk [vmem:[%s14934_s27 + $0x218] sm:$0xff] %vm2046_vm8, %v13597_v12 }
 0x692   : > { %10775 = vst.msk [vmem:[%s14934_s27 + $0x208] sm:$0xff] %vm2046_vm8, %v13599_v7  ;;  %v12884_v9 = vpop.f32.mrb[68].mxu1 }
 0x693   : > { %v13600_v26 = vadd.f32 %v12884_v9, %v18574_v62  ;;  %v6580_v33 = vpop.f32.mrb[69].mxu1 }
 0x694   : > { %v13404_v40 = vpop.f32.mrb[68].mxu0  ;;  %v13602_v22 = vadd.f32 %v18574_v62, %v6580_v33  ;;  %v12885_v17 = vpop.f32.mrb[70].mxu1 }
 0x695   : > { %v13601_v37 = vadd.f32 %v13600_v26, %v13404_v40  ;;  %v10343_v8 = vpop.f32.mrb[69].mxu0  ;;  %v13604_v35 = vadd.f32 %v12885_v17, %v18574_v62  ;;  %v6583_v31 = vpop.f32.mrb[71].mxu1 }
 0x696   : > { %v13603_v60 = vadd.f32 %v13602_v22, %v10343_v8  ;;  %v13405_v5 = vpop.f32.mrb[70].mxu0  ;;  %v13606_v56 = vadd.f32 %v18574_v62, %v6583_v31 }
 0x697   : > { %10780 = vst.msk [vmem:[%s14934_s27 + $0x230] sm:$0xff] %vm2046_vm8, %v13601_v37  ;;  %v13605_v57 = vadd.f32 %v13604_v35, %v13405_v5  ;;  %v10346_v44 = vpop.f32.mrb[71].mxu0 }
 0x698   : > { %10778 = vst.msk [vmem:[%s14934_s27 + $0x220] sm:$0xff] %vm2046_vm8, %v13603_v60  ;;  %v13607_v11 = vadd.f32 %v13606_v56, %v10346_v44 }
 0x699   : > { %10781 = vst.msk [vmem:[%s14934_s27 + $0x238] sm:$0xff] %vm2046_vm8, %v13605_v57 }
 0x69a   : > { %10779 = vst.msk [vmem:[%s14934_s27 + $0x228] sm:$0xff] %vm2046_vm8, %v13607_v11  ;;  %v12888_v2 = vpop.f32.mrb[72].mxu1 }
 0x69b   : > { %v13608_v28 = vadd.f32 %v12888_v2, %v18574_v62  ;;  %v6596_v36 = vpop.f32.mrb[73].mxu1 }
 0x69c   : > { %v13408_v3 = vpop.f32.mrb[72].mxu0  ;;  %v13610_v54 = vadd.f32 %v18574_v62, %v6596_v36  ;;  %v12889_v23 = vpop.f32.mrb[74].mxu1 }
 0x69d   : > { %v13609_v47 = vadd.f32 %v13608_v28, %v13408_v3  ;;  %v10359_v1 = vpop.f32.mrb[73].mxu0  ;;  %v13612_v10 = vadd.f32 %v12889_v23, %v18574_v62  ;;  %v6599_v63 = vpop.f32.mrb[75].mxu1 }
 0x69e   : > { %v13611_v55 = vadd.f32 %v13610_v54, %v10359_v1  ;;  %v13409_v43 = vpop.f32.mrb[74].mxu0  ;;  %v13614_v21 = vadd.f32 %v18574_v62, %v6599_v63 }
 0x69f   : > { %10784 = vst.msk [vmem:[%s14934_s27 + $0x250] sm:$0xff] %vm2046_vm8, %v13609_v47  ;;  %v13613_v38 = vadd.f32 %v13612_v10, %v13409_v43  ;;  %v10362_v49 = vpop.f32.mrb[75].mxu0 }
 0x6a0   : > { %10782 = vst.msk [vmem:[%s14934_s27 + $0x240] sm:$0xff] %vm2046_vm8, %v13611_v55  ;;  %v13615_v27 = vadd.f32 %v13614_v21, %v10362_v49 }
 0x6a1   : > { %10785 = vst.msk [vmem:[%s14934_s27 + $0x258] sm:$0xff] %vm2046_vm8, %v13613_v38 }
 0x6a2   : > { %10783 = vst.msk [vmem:[%s14934_s27 + $0x248] sm:$0xff] %vm2046_vm8, %v13615_v27  ;;  %v12892_v53 = vpop.f32.mrb[76].mxu1 }
 0x6a3   : > { %v13616_v46 = vadd.f32 %v12892_v53, %v18574_v62  ;;  %v6612_v42 = vpop.f32.mrb[77].mxu1 }
 0x6a4   : > { %v13412_v6 = vpop.f32.mrb[76].mxu0  ;;  %v13618_v24 = vadd.f32 %v18574_v62, %v6612_v42  ;;  %v12893_v4 = vpop.f32.mrb[78].mxu1 }
 0x6a5   : > { %v13617_v58 = vadd.f32 %v13616_v46, %v13412_v6  ;;  %v10375_v52 = vpop.f32.mrb[77].mxu0  ;;  %v13620_v30 = vadd.f32 %v12893_v4, %v18574_v62  ;;  %v6615_v15 = vpop.f32.mrb[79].mxu1 }
 0x6a6   : > { %v13619_v45 = vadd.f32 %v13618_v24, %v10375_v52  ;;  %v13413_v29 = vpop.f32.mrb[78].mxu0  ;;  %v13622_v13 = vadd.f32 %v18574_v62, %v6615_v15 }
 0x6a7   : > { %10788 = vst.msk [vmem:[%s14934_s27 + $0x270] sm:$0xff] %vm2046_vm8, %v13617_v58  ;;  %v13621_v41 = vadd.f32 %v13620_v30, %v13413_v29  ;;  %v10378_v16 = vpop.f32.mrb[79].mxu0 }
 0x6a8   : > { %10786 = vst.msk [vmem:[%s14934_s27 + $0x260] sm:$0xff] %vm2046_vm8, %v13619_v45  ;;  %v13623_v59 = vadd.f32 %v13622_v13, %v10378_v16 }
 0x6a9   : > { %10789 = vst.msk [vmem:[%s14934_s27 + $0x278] sm:$0xff] %vm2046_vm8, %v13621_v41 }
 0x6aa   : > { %10787 = vst.msk [vmem:[%s14934_s27 + $0x268] sm:$0xff] %vm2046_vm8, %v13623_v59  ;;  %v12896_v61 = vpop.f32.mrb[80].mxu1 }
 0x6ab   : > { %v13624_v48 = vadd.f32 %v12896_v61, %v18574_v62  ;;  %v6628_v34 = vpop.f32.mrb[81].mxu1 }
 0x6ac   : > { %v13416_v25 = vpop.f32.mrb[80].mxu0  ;;  %v13626_v18 = vadd.f32 %v18574_v62, %v6628_v34  ;;  %v12897_v19 = vpop.f32.mrb[82].mxu1 }
 0x6ad   : > { %v13625_v20 = vadd.f32 %v13624_v48, %v13416_v25  ;;  %v10391_v14 = vpop.f32.mrb[81].mxu0  ;;  %v13628_v32 = vadd.f32 %v12897_v19, %v18574_v62  ;;  %v6631_v51 = vpop.f32.mrb[83].mxu1 }
 0x6ae   : > { %v13627_v39 = vadd.f32 %v13626_v18, %v10391_v14  ;;  %v13417_v0 = vpop.f32.mrb[82].mxu0  ;;  %v13630_v12 = vadd.f32 %v18574_v62, %v6631_v51 }
 0x6af   : > { %10792 = vst.msk [vmem:[%s14934_s27 + $0x290] sm:$0xff] %vm2046_vm8, %v13625_v20  ;;  %v13629_v50 = vadd.f32 %v13628_v32, %v13417_v0  ;;  %v10394_v7 = vpop.f32.mrb[83].mxu0 }
 0x6b0   : > { %10790 = vst.msk [vmem:[%s14934_s27 + $0x280] sm:$0xff] %vm2046_vm8, %v13627_v39  ;;  %v13631_v9 = vadd.f32 %v13630_v12, %v10394_v7 }
 0x6b1   : > { %10793 = vst.msk [vmem:[%s14934_s27 + $0x298] sm:$0xff] %vm2046_vm8, %v13629_v50 }
 0x6b2   : > { %10791 = vst.msk [vmem:[%s14934_s27 + $0x288] sm:$0xff] %vm2046_vm8, %v13631_v9  ;;  %v12900_v26 = vpop.f32.mrb[84].mxu1 }
 0x6b3   : > { %v13632_v33 = vadd.f32 %v12900_v26, %v18574_v62  ;;  %v6644_v40 = vpop.f32.mrb[85].mxu1 }
 0x6b4   : > { %v13420_v22 = vpop.f32.mrb[84].mxu0  ;;  %v13634_v17 = vadd.f32 %v18574_v62, %v6644_v40  ;;  %v12901_v37 = vpop.f32.mrb[86].mxu1 }
 0x6b5   : > { %v13633_v8 = vadd.f32 %v13632_v33, %v13420_v22  ;;  %v10407_v35 = vpop.f32.mrb[85].mxu0  ;;  %v13636_v31 = vadd.f32 %v12901_v37, %v18574_v62  ;;  %v6647_v60 = vpop.f32.mrb[87].mxu1 }
 0x6b6   : > { %v13635_v5 = vadd.f32 %v13634_v17, %v10407_v35  ;;  %v13421_v56 = vpop.f32.mrb[86].mxu0  ;;  %v13638_v57 = vadd.f32 %v18574_v62, %v6647_v60 }
 0x6b7   : > { %10796 = vst.msk [vmem:[%s14934_s27 + $0x2b0] sm:$0xff] %vm2046_vm8, %v13633_v8  ;;  %v13637_v44 = vadd.f32 %v13636_v31, %v13421_v56  ;;  %v10410_v11 = vpop.f32.mrb[87].mxu0 }
 0x6b8   : > { %10794 = vst.msk [vmem:[%s14934_s27 + $0x2a0] sm:$0xff] %vm2046_vm8, %v13635_v5  ;;  %v13639_v2 = vadd.f32 %v13638_v57, %v10410_v11 }
 0x6b9   : > { %10797 = vst.msk [vmem:[%s14934_s27 + $0x2b8] sm:$0xff] %vm2046_vm8, %v13637_v44 }
 0x6ba   : > { %10795 = vst.msk [vmem:[%s14934_s27 + $0x2a8] sm:$0xff] %vm2046_vm8, %v13639_v2  ;;  %v12904_v28 = vpop.f32.mrb[88].mxu1 }
 0x6bb   : > { %v13640_v36 = vadd.f32 %v12904_v28, %v18574_v62  ;;  %v6660_v3 = vpop.f32.mrb[89].mxu1 }
 0x6bc   : > { %v13424_v54 = vpop.f32.mrb[88].mxu0  ;;  %v13642_v23 = vadd.f32 %v18574_v62, %v6660_v3  ;;  %v12905_v47 = vpop.f32.mrb[90].mxu1 }
 0x6bd   : > { %v13641_v1 = vadd.f32 %v13640_v36, %v13424_v54  ;;  %v10423_v10 = vpop.f32.mrb[89].mxu0  ;;  %v13644_v63 = vadd.f32 %v12905_v47, %v18574_v62  ;;  %v6663_v55 = vpop.f32.mrb[91].mxu1 }
 0x6be   : > { %v13643_v43 = vadd.f32 %v13642_v23, %v10423_v10  ;;  %v13425_v21 = vpop.f32.mrb[90].mxu0  ;;  %v13646_v38 = vadd.f32 %v18574_v62, %v6663_v55 }
 0x6bf   : > { %10800 = vst.msk [vmem:[%s14934_s27 + $0x2d0] sm:$0xff] %vm2046_vm8, %v13641_v1  ;;  %v13645_v49 = vadd.f32 %v13644_v63, %v13425_v21  ;;  %v10426_v27 = vpop.f32.mrb[91].mxu0 }
 0x6c0   : > { %10798 = vst.msk [vmem:[%s14934_s27 + $0x2c0] sm:$0xff] %vm2046_vm8, %v13643_v43  ;;  %v13647_v53 = vadd.f32 %v13646_v38, %v10426_v27 }
 0x6c1   : > { %10801 = vst.msk [vmem:[%s14934_s27 + $0x2d8] sm:$0xff] %vm2046_vm8, %v13645_v49 }
 0x6c2   : > { %10799 = vst.msk [vmem:[%s14934_s27 + $0x2c8] sm:$0xff] %vm2046_vm8, %v13647_v53  ;;  %v12908_v46 = vpop.f32.mrb[92].mxu1 }
 0x6c3   : > { %v13648_v42 = vadd.f32 %v12908_v46, %v18574_v62  ;;  %v6676_v6 = vpop.f32.mrb[93].mxu1 }
 0x6c4   : > { %v13428_v24 = vpop.f32.mrb[92].mxu0  ;;  %v13650_v4 = vadd.f32 %v18574_v62, %v6676_v6  ;;  %v12909_v58 = vpop.f32.mrb[94].mxu1 }
 0x6c5   : > { %v13649_v52 = vadd.f32 %v13648_v42, %v13428_v24  ;;  %v10439_v30 = vpop.f32.mrb[93].mxu0  ;;  %v13652_v15 = vadd.f32 %v12909_v58, %v18574_v62  ;;  %v6679_v45 = vpop.f32.mrb[95].mxu1 }
 0x6c6   : > { %v13651_v29 = vadd.f32 %v13650_v4, %v10439_v30  ;;  %v13429_v13 = vpop.f32.mrb[94].mxu0  ;;  %v13654_v41 = vadd.f32 %v18574_v62, %v6679_v45  ;;  %v18997_v45 = vld [vmem:[#allocation3] ss:$0 sm:$0xff] }
 0x6c7   : > { %10804 = vst.msk [vmem:[%s14934_s27 + $0x2f0] sm:$0xff] %vm2046_vm8, %v13649_v52  ;;  %v13653_v16 = vadd.f32 %v13652_v15, %v13429_v13  ;;  %v10442_v59 = vpop.f32.mrb[95].mxu0 }
 0x6c8   : > { %10802 = vst.msk [vmem:[%s14934_s27 + $0x2e0] sm:$0xff] %vm2046_vm8, %v13651_v29  ;;  %v13655_v61 = vadd.f32 %v13654_v41, %v10442_v59 }
 0x6c9   : > { %10805 = vst.msk [vmem:[%s14934_s27 + $0x2f8] sm:$0xff] %vm2046_vm8, %v13653_v16 }
 0x6ca   : > { %10803 = vst.msk [vmem:[%s14934_s27 + $0x2e8] sm:$0xff] %vm2046_vm8, %v13655_v61  ;;  %v12912_v48 = vpop.f32.mrb[96].mxu1 }
 0x6cb   : > { %v13656_v34 = vadd.f32 %v12912_v48, %v18574_v62  ;;  %v6692_v25 = vpop.f32.mrb[97].mxu1 }
 0x6cc   : > { %v13432_v18 = vpop.f32.mrb[96].mxu0  ;;  %v13658_v19 = vadd.f32 %v18574_v62, %v6692_v25  ;;  %v12913_v20 = vpop.f32.mrb[98].mxu1 }
 0x6cd   : > { %v13657_v14 = vadd.f32 %v13656_v34, %v13432_v18  ;;  %v10455_v32 = vpop.f32.mrb[97].mxu0  ;;  %v13660_v51 = vadd.f32 %v12913_v20, %v18574_v62  ;;  %v6695_v39 = vpop.f32.mrb[99].mxu1 }
 0x6ce   : > { %v13659_v0 = vadd.f32 %v13658_v19, %v10455_v32  ;;  %v13433_v12 = vpop.f32.mrb[98].mxu0  ;;  %v13662_v50 = vadd.f32 %v18574_v62, %v6695_v39 }
 0x6cf   : > { %10808 = vst.msk [vmem:[%s14934_s27 + $0x310] sm:$0xff] %vm2046_vm8, %v13657_v14  ;;  %v13661_v7 = vadd.f32 %v13660_v51, %v13433_v12  ;;  %v10458_v9 = vpop.f32.mrb[99].mxu0 }
 0x6d0   : > { %10806 = vst.msk [vmem:[%s14934_s27 + $0x300] sm:$0xff] %vm2046_vm8, %v13659_v0  ;;  %v13663_v26 = vadd.f32 %v13662_v50, %v10458_v9 }
 0x6d1   : > { %10809 = vst.msk [vmem:[%s14934_s27 + $0x318] sm:$0xff] %vm2046_vm8, %v13661_v7 }
 0x6d2   : > { %10807 = vst.msk [vmem:[%s14934_s27 + $0x308] sm:$0xff] %vm2046_vm8, %v13663_v26  ;;  %v12916_v33 = vpop.f32.mrb[100].mxu1 }
 0x6d3   : > { %v13664_v40 = vadd.f32 %v12916_v33, %v18574_v62  ;;  %v6708_v22 = vpop.f32.mrb[101].mxu1 }
 0x6d4   : > { %v13436_v17 = vpop.f32.mrb[100].mxu0  ;;  %v13666_v37 = vadd.f32 %v18574_v62, %v6708_v22  ;;  %v12917_v8 = vpop.f32.mrb[102].mxu1 }
 0x6d5   : > { %v13665_v35 = vadd.f32 %v13664_v40, %v13436_v17  ;;  %v10471_v31 = vpop.f32.mrb[101].mxu0  ;;  %v13668_v60 = vadd.f32 %v12917_v8, %v18574_v62  ;;  %v6711_v5 = vpop.f32.mrb[103].mxu1 }
 0x6d6   : > { %v13667_v56 = vadd.f32 %v13666_v37, %v10471_v31  ;;  %v13437_v57 = vpop.f32.mrb[102].mxu0  ;;  %v13670_v44 = vadd.f32 %v18574_v62, %v6711_v5 }
 0x6d7   : > { %10812 = vst.msk [vmem:[%s14934_s27 + $0x330] sm:$0xff] %vm2046_vm8, %v13665_v35  ;;  %v13669_v11 = vadd.f32 %v13668_v60, %v13437_v57  ;;  %v10474_v2 = vpop.f32.mrb[103].mxu0 }
 0x6d8   : > { %10810 = vst.msk [vmem:[%s14934_s27 + $0x320] sm:$0xff] %vm2046_vm8, %v13667_v56  ;;  %v13671_v28 = vadd.f32 %v13670_v44, %v10474_v2 }
 0x6d9   : > { %10813 = vst.msk [vmem:[%s14934_s27 + $0x338] sm:$0xff] %vm2046_vm8, %v13669_v11 }
 0x6da   : > { %10811 = vst.msk [vmem:[%s14934_s27 + $0x328] sm:$0xff] %vm2046_vm8, %v13671_v28  ;;  %v12920_v36 = vpop.f32.mrb[104].mxu1 }
 0x6db   : > { %v13672_v3 = vadd.f32 %v12920_v36, %v18574_v62  ;;  %v6724_v54 = vpop.f32.mrb[105].mxu1 }
 0x6dc   : > { %v13440_v23 = vpop.f32.mrb[104].mxu0  ;;  %v13674_v47 = vadd.f32 %v18574_v62, %v6724_v54  ;;  %v12921_v1 = vpop.f32.mrb[106].mxu1 }
 0x6dd   : > { %v13673_v10 = vadd.f32 %v13672_v3, %v13440_v23  ;;  %v10487_v63 = vpop.f32.mrb[105].mxu0  ;;  %v13676_v55 = vadd.f32 %v12921_v1, %v18574_v62  ;;  %v6727_v43 = vpop.f32.mrb[107].mxu1 }
 0x6de   : > { %v13675_v21 = vadd.f32 %v13674_v47, %v10487_v63  ;;  %v13441_v38 = vpop.f32.mrb[106].mxu0  ;;  %v13678_v49 = vadd.f32 %v18574_v62, %v6727_v43 }
 0x6df   : > { %10816 = vst.msk [vmem:[%s14934_s27 + $0x350] sm:$0xff] %vm2046_vm8, %v13673_v10  ;;  %v13677_v27 = vadd.f32 %v13676_v55, %v13441_v38  ;;  %v10490_v53 = vpop.f32.mrb[107].mxu0 }
 0x6e0   : > { %10814 = vst.msk [vmem:[%s14934_s27 + $0x340] sm:$0xff] %vm2046_vm8, %v13675_v21  ;;  %v13679_v46 = vadd.f32 %v13678_v49, %v10490_v53 }
 0x6e1   : > { %10817 = vst.msk [vmem:[%s14934_s27 + $0x358] sm:$0xff] %vm2046_vm8, %v13677_v27 }
 0x6e2   : > { %10815 = vst.msk [vmem:[%s14934_s27 + $0x348] sm:$0xff] %vm2046_vm8, %v13679_v46  ;;  %v12924_v42 = vpop.f32.mrb[108].mxu1 }
 0x6e3   : > { %v13680_v6 = vadd.f32 %v12924_v42, %v18574_v62  ;;  %v6740_v24 = vpop.f32.mrb[109].mxu1 }
 0x6e4   : > { %v13444_v4 = vpop.f32.mrb[108].mxu0  ;;  %v13682_v58 = vadd.f32 %v18574_v62, %v6740_v24  ;;  %v12925_v52 = vpop.f32.mrb[110].mxu1 }
 0x6e5   : > { %v13681_v30 = vadd.f32 %v13680_v6, %v13444_v4  ;;  %v10503_v15 = vpop.f32.mrb[109].mxu0  ;;  %v13684_v29 = vadd.f32 %v18997_v45, %v12925_v52  ;;  %v6743_v13 = vpop.f32.mrb[111].mxu1 }
 0x6e6   : > { %v13683_v41 = vadd.f32 %v13682_v58, %v10503_v15  ;;  %v13445_v16 = vpop.f32.mrb[110].mxu0  ;;  %v13686_v59 = vadd.f32 %v18997_v45, %v6743_v13 }
 0x6e7   : > { %10820 = vst.msk [vmem:[%s14934_s27 + $0x370] sm:$0xff] %vm2046_vm8, %v13681_v30  ;;  %v13685_v61 = vadd.f32 %v13684_v29, %v13445_v16  ;;  %v10506_v48 = vpop.f32.mrb[111].mxu0 }
 0x6e8   : > { %10818 = vst.msk [vmem:[%s14934_s27 + $0x360] sm:$0xff] %vm2046_vm8, %v13683_v41  ;;  %v13687_v62 = vadd.f32 %v13686_v59, %v10506_v48 }
 0x6e9   : > { %10821 = vst.msk [vmem:[%s14934_s27 + $0x378] sm:$0xff] %vm2046_vm8, %v13685_v61 }
 0x6ea   : > { %10819 = vst.msk [vmem:[%s14934_s27 + $0x368] sm:$0xff] %vm2046_vm8, %v13687_v62  ;;  %v12928_v34 = vpop.f32.mrb[112].mxu1 }
 0x6eb   : > { %v13688_v25 = vadd.f32 %v18997_v45, %v12928_v34  ;;  %v6756_v18 = vpop.f32.mrb[113].mxu1 }
 0x6ec   : > { %v13448_v19 = vpop.f32.mrb[112].mxu0  ;;  %v13690_v20 = vadd.f32 %v18997_v45, %v6756_v18  ;;  %v12929_v14 = vpop.f32.mrb[114].mxu1 }
 0x6ed   : > { %v13689_v32 = vadd.f32 %v13688_v25, %v13448_v19  ;;  %v10519_v51 = vpop.f32.mrb[113].mxu0  ;;  %v13692_v39 = vadd.f32 %v18997_v45, %v12929_v14  ;;  %v6759_v0 = vpop.f32.mrb[115].mxu1 }
 0x6ee   : > { %v13691_v12 = vadd.f32 %v13690_v20, %v10519_v51  ;;  %v13449_v50 = vpop.f32.mrb[114].mxu0  ;;  %v13694_v7 = vadd.f32 %v18997_v45, %v6759_v0 }
 0x6ef   : > { %10824 = vst.msk [vmem:[%s14934_s27 + $0x390] sm:$0xff] %vm2046_vm8, %v13689_v32  ;;  %v13693_v9 = vadd.f32 %v13692_v39, %v13449_v50  ;;  %v10522_v26 = vpop.f32.mrb[115].mxu0 }
 0x6f0   : > { %10822 = vst.msk [vmem:[%s14934_s27 + $0x380] sm:$0xff] %vm2046_vm8, %v13691_v12  ;;  %v13695_v33 = vadd.f32 %v13694_v7, %v10522_v26 }
 0x6f1   : > { %10825 = vst.msk [vmem:[%s14934_s27 + $0x398] sm:$0xff] %vm2046_vm8, %v13693_v9 }
 0x6f2   : > { %10823 = vst.msk [vmem:[%s14934_s27 + $0x388] sm:$0xff] %vm2046_vm8, %v13695_v33  ;;  %v12932_v40 = vpop.f32.mrb[116].mxu1 }
 0x6f3   : > { %v13696_v22 = vadd.f32 %v18997_v45, %v12932_v40  ;;  %v6772_v17 = vpop.f32.mrb[117].mxu1 }
 0x6f4   : > { %v13452_v37 = vpop.f32.mrb[116].mxu0  ;;  %v13698_v8 = vadd.f32 %v18997_v45, %v6772_v17  ;;  %v12933_v35 = vpop.f32.mrb[118].mxu1 }
 0x6f5   : > { %v13697_v31 = vadd.f32 %v13696_v22, %v13452_v37  ;;  %v10535_v60 = vpop.f32.mrb[117].mxu0  ;;  %v13700_v5 = vadd.f32 %v18997_v45, %v12933_v35  ;;  %v6775_v56 = vpop.f32.mrb[119].mxu1 }
 0x6f6   : > { %v13699_v57 = vadd.f32 %v13698_v8, %v10535_v60  ;;  %v13453_v44 = vpop.f32.mrb[118].mxu0  ;;  %v13702_v11 = vadd.f32 %v18997_v45, %v6775_v56 }
 0x6f7   : > { %10828 = vst.msk [vmem:[%s14934_s27 + $0x3b0] sm:$0xff] %vm2046_vm8, %v13697_v31  ;;  %v13701_v2 = vadd.f32 %v13700_v5, %v13453_v44  ;;  %v10538_v28 = vpop.f32.mrb[119].mxu0 }
 0x6f8   : > { %10826 = vst.msk [vmem:[%s14934_s27 + $0x3a0] sm:$0xff] %vm2046_vm8, %v13699_v57  ;;  %v13703_v36 = vadd.f32 %v13702_v11, %v10538_v28 }
 0x6f9   : > { %10829 = vst.msk [vmem:[%s14934_s27 + $0x3b8] sm:$0xff] %vm2046_vm8, %v13701_v2 }
 0x6fa   : > { %10827 = vst.msk [vmem:[%s14934_s27 + $0x3a8] sm:$0xff] %vm2046_vm8, %v13703_v36  ;;  %v12936_v3 = vpop.f32.mrb[120].mxu1 }
 0x6fb   : > { %v13704_v54 = vadd.f32 %v18997_v45, %v12936_v3  ;;  %v6788_v23 = vpop.f32.mrb[121].mxu1 }
 0x6fc   : > { %v13456_v47 = vpop.f32.mrb[120].mxu0  ;;  %v13706_v1 = vadd.f32 %v18997_v45, %v6788_v23  ;;  %v12937_v10 = vpop.f32.mrb[122].mxu1 }
 0x6fd   : > { %v13705_v63 = vadd.f32 %v13704_v54, %v13456_v47  ;;  %v10551_v55 = vpop.f32.mrb[121].mxu0  ;;  %v13708_v43 = vadd.f32 %v18997_v45, %v12937_v10  ;;  %v6791_v21 = vpop.f32.mrb[123].mxu1 }
 0x6fe   : > { %v13707_v38 = vadd.f32 %v13706_v1, %v10551_v55  ;;  %v13457_v49 = vpop.f32.mrb[122].mxu0  ;;  %v13710_v27 = vadd.f32 %v18997_v45, %v6791_v21 }
 0x6ff   : > { %10832 = vst.msk [vmem:[%s14934_s27 + $0x3d0] sm:$0xff] %vm2046_vm8, %v13705_v63  ;;  %v13709_v53 = vadd.f32 %v13708_v43, %v13457_v49  ;;  %v10554_v46 = vpop.f32.mrb[123].mxu0 }
 0x700   : > { %10830 = vst.msk [vmem:[%s14934_s27 + $0x3c0] sm:$0xff] %vm2046_vm8, %v13707_v38  ;;  %v13711_v42 = vadd.f32 %v13710_v27, %v10554_v46 }
 0x701   : > { %10833 = vst.msk [vmem:[%s14934_s27 + $0x3d8] sm:$0xff] %vm2046_vm8, %v13709_v53 }
 0x702   : > { %10831 = vst.msk [vmem:[%s14934_s27 + $0x3c8] sm:$0xff] %vm2046_vm8, %v13711_v42  ;;  %v12940_v6 = vpop.f32.mrb[124].mxu1 }
 0x703   : > { %v13712_v24 = vadd.f32 %v18997_v45, %v12940_v6  ;;  %v6804_v4 = vpop.f32.mrb[125].mxu1 }
 0x704   : > { %v13460_v58 = vpop.f32.mrb[124].mxu0  ;;  %v13714_v52 = vadd.f32 %v18997_v45, %v6804_v4  ;;  %v12941_v30 = vpop.f32.mrb[126].mxu1 }
 0x705   : > { %v13713_v15 = vadd.f32 %v13712_v24, %v13460_v58  ;;  %v10567_v29 = vpop.f32.mrb[125].mxu0  ;;  %v13716_v13 = vadd.f32 %v18997_v45, %v12941_v30  ;;  %v6807_v41 = vpop.f32.mrb[127].mxu1 }
 0x706   : > { %v13715_v16 = vadd.f32 %v13714_v52, %v10567_v29  ;;  %v13461_v59 = vpop.f32.mrb[126].mxu0  ;;  %v13718_v61 = vadd.f32 %v18997_v45, %v6807_v41 }
 0x707   : > { %10836 = vst.msk [vmem:[%s14934_s27 + $0x3f0] sm:$0xff] %vm2046_vm8, %v13713_v15  ;;  %v13717_v48 = vadd.f32 %v13716_v13, %v13461_v59  ;;  %v10570_v62 = vpop.f32.mrb[127].mxu0 }
 0x708   : > { %10834 = vst.msk [vmem:[%s14934_s27 + $0x3e0] sm:$0xff] %vm2046_vm8, %v13715_v16  ;;  %v13719_v34 = vadd.f32 %v13718_v61, %v10570_v62 }
 0x709   : > { %10837 = vst.msk [vmem:[%s14934_s27 + $0x3f8] sm:$0xff] %vm2046_vm8, %v13717_v48 }
 0x70a   : > { %10835 = vst.msk [vmem:[%s14934_s27 + $0x3e8] sm:$0xff] %vm2046_vm8, %v13719_v34 }
 0x70b PF: > { %s14_s16 = sadd.s32 1, %s14824_s16   ;;  %s19711_s12 = smov %s14816_s14 }
 0x70c   : > { %p11_p9 = scmp.ge.s32.totalorder %s14_s16, 6   ;;  %s19712_s13 = smov %s14820_s15 }
 0x70d   : > { %s19713_s14 = smov %s19716_s18  ;;  %s19714_s15 = smov %s19720_s19 }
 0x70e   :  { %13 = sbr.rel (!%p11_p9) target bundleno = 3 (0x3), region = 95 }
 0x715   :  { %10943 = vsyncpa [#allocation4], 1 }
 0x716   :  { %10945 = vsyncpa [#allocation4 + $0x1], 1 }

</bundles_post_ra>
